<compile_context>
chip_gen: v5e
topology: v5e:2x2
jax: 0.10.0
libtpu: 0.0.40
codegen_flags: <defaults>
</compile_context>

<pallas_src>
import math

import numpy as np
import jax
import jax.numpy as jnp
from jax.experimental import pallas as pl
from jax.experimental.pallas import tpu as pltpu

N_FFT = 4096
N_MELS = 256
SAMPLE_RATE = 44100
EPSILON = 1e-4
EMB_SIZES = (4096, 2048, 512, 128, 20)
INT8_MAX, INT8_MIN = 127, -128

N_FREQ = N_FFT // 2 + 1                          # 2049
F_PAD = ((N_FREQ + 127) // 128) * 128            # 2176 (lane-aligned freq dim)
EMB20_PAD = 128                                  # lane-dense slot for the 20-d head
N_TOTAL = 4096 + 2048 + 512 + 128 + EMB20_PAD    # 6912  (multiple of 128)


# ---------------------------------------------------------------------------
# Deterministic in-script mel filterbank (stands in for librosa.filters.mel).
# TODO(synk): HTK-style mel triangles + Slaney area-norm; librosa's default
# Slaney mel scale places break frequencies slightly differently.
# ---------------------------------------------------------------------------
def _hz_to_mel(f):
    return 2595.0 * np.log10(1.0 + np.asarray(f, dtype=np.float64) / 700.0)


def _mel_to_hz(m):
    return 700.0 * (10.0 ** (np.asarray(m, dtype=np.float64) / 2595.0) - 1.0)


def mel_filterbank(sr, n_fft, n_mels):
    n_freqs = n_fft // 2 + 1
    fft_freqs = np.linspace(0.0, sr / 2.0, n_freqs)
    mel_pts = np.linspace(_hz_to_mel(0.0), _hz_to_mel(sr / 2.0), n_mels + 2)
    hz_pts = _mel_to_hz(mel_pts)
    fb = np.zeros((n_mels, n_freqs), dtype=np.float32)
    for m in range(1, n_mels + 1):
        left, center, right = hz_pts[m - 1], hz_pts[m], hz_pts[m + 1]
        up = (fft_freqs - left) / max(center - left, 1e-8)
        down = (right - fft_freqs) / max(right - center, 1e-8)
        fb[m - 1] = np.maximum(0.0, np.minimum(up, down)).astype(np.float32)
    enorm = 2.0 / (hz_pts[2:n_mels + 2] - hz_pts[:n_mels])  # Slaney area norm
    fb *= enorm[:, None].astype(np.float32)
    return fb


# ---------------------------------------------------------------------------
# Pallas kernel.
#   grid = (N_TOTAL // tn,)  -- tiles over the fused projection output dim,
#   marked "parallel" (no cross-step state: log-mel is recomputed per step).
#   each step: log-mel (B,256) = log(pspec @ melT + eps), then
#              (B,256) bf16 @ (256,tn) bf16 -> f32 tile of the fused output.
#   last tile: sigmoid + int8-range scaling of the emb20 block (last 128
#              lanes), stored in-place in the f32 slab (wrapper casts to int8).
# ---------------------------------------------------------------------------
def _rpme_kernel(pspec_ref, melT_ref, emb_ref, of_ref):
    # (B, F_PAD) @ (F_PAD, n_mels) -> (B, n_mels); zero-padded rows/cols inert.
    mel = jnp.dot(pspec_ref[...], melT_ref[...],
                  preferred_element_type=jnp.float32)
    lm = jnp.log(mel + EPSILON).astype(jnp.bfloat16)

    z = jnp.dot(lm, emb_ref[...], preferred_element_type=jnp.float32)
    of_ref[...] = z

    @pl.when(pl.program_id(0) == pl.num_programs(0) - 1)
    def _():
        # emb20 (padded to 128 lanes) = last 128 lanes of the final tile.
        tn = z.shape[1]
        zt = z[:, tn - EMB20_PAD:]
        # numerically stable sigmoid (exp goes to the EUP slot -> ~free)
        ez = jnp.exp(-jnp.abs(zt))
        sig = jnp.where(zt >= 0.0, 1.0 / (1.0 + ez), ez / (1.0 + ez))
        q = sig * float(INT8_MAX - INT8_MIN) + float(INT8_MIN)
        # Quantized-but-still-float head stored in the f32 slab; exact in f32.
        of_ref[:, tn - EMB20_PAD:] = q


def random_projection_mel_embedding(x, params, *, tn=2304):
    window = params["window"]          # (n_fft,) f32
    melT = params["melT"]              # (F_PAD, n_mels) bf16
    emb_cat = params["emb_cat"]        # (n_mels, N_TOTAL) bf16

    assert N_TOTAL % tn == 0 and tn >= EMB20_PAD
    n_tiles = N_TOTAL // tn            # keep >= 2 for double-buffering

    b = x.shape[0]
    b_pad = ((b + 15) // 16) * 16      # bf16 LHS packs (16,128) sublanes/vreg

    # --- glue (elementwise window, FFT, power spectrum, padding) -------------
    xw = x.astype(jnp.float32) * window[None, :]
    spec = jnp.fft.rfft(xw, axis=-1)   # TODO(synk): no Pallas FFT primitive; stays in XLA
    pspec = spec.real * spec.real + spec.imag * spec.imag      # (b, N_FREQ) f32
    pspec_p = jnp.pad(pspec, ((0, b_pad - b), (0, F_PAD - N_FREQ))).astype(jnp.bfloat16)

    # TODO(synk): for many-frame workloads, add a leading row-tile grid axis
    # (128-256 rows, "parallel") so pspec/output tiles stay bounded in VMEM.

    flops = 2 * b_pad * (F_PAD * N_MELS * n_tiles + N_MELS * N_TOTAL)
    bytes_accessed = (pspec_p.size * 2 + melT.size * 2 + emb_cat.size * 2
                      + b_pad * N_TOTAL * 4)

    of = pl.pallas_call(
        _rpme_kernel,
        grid=(n_tiles,),
        in_specs=[
            pl.BlockSpec((b_pad, F_PAD), lambda j: (0, 0)),    # pspec (resident block)
            pl.BlockSpec((F_PAD, N_MELS), lambda j: (0, 0)),   # melT  (resident block)
            pl.BlockSpec((N_MELS, tn), lambda j: (0, j)),      # fused weight, streamed
        ],
        out_specs=pl.BlockSpec((b_pad, tn), lambda j: (0, j)), # fused f32 output slab
        out_shape=jax.ShapeDtypeStruct((b_pad, N_TOTAL), jnp.float32),
        compiler_params=pltpu.CompilerParams(
            # No cross-step state -> N axis is independent; dual-TC on v7x.
            dimension_semantics=("parallel",),
            vmem_limit_bytes=32 * 1024 * 1024,
        ),
        cost_estimate=pl.CostEstimate(
            flops=flops,
            transcendentals=b_pad * (N_MELS * n_tiles + EMB20_PAD),
            bytes_accessed=bytes_accessed,
        ),
    )(pspec_p, melT, emb_cat)

    of = of[:b]
    q20 = of[:, N_TOTAL - EMB20_PAD:N_TOTAL - EMB20_PAD + 20]
    return {
        4096: of[:, 0:4096],
        2048: of[:, 4096:6144],
        512: of[:, 6144:6656],
        128: of[:, 6656:6784],
        # truncate-toward-zero like torch's .type(torch.int8)
        20: q20.astype(jnp.int32).astype(jnp.int8),
    }


def init_params(key):
    normalization = math.sqrt(N_MELS)
    ks = jax.random.split(key, len(EMB_SIZES))
    embs = {
        n: jax.random.uniform(k, (N_MELS, n), dtype=jnp.float32) / normalization
        for k, n in zip(ks, EMB_SIZES)
    }
    # Fused lane-dense bf16 projection weight: [4096 | 2048 | 512 | 128 | 20->128 pad].
    emb20_p = jnp.pad(embs[20], ((0, 0), (0, EMB20_PAD - 20)))
    emb_cat = jnp.concatenate(
        [embs[4096], embs[2048], embs[512], embs[128], emb20_p], axis=1
    ).astype(jnp.bfloat16)                                      # (256, 6912)

    n = jnp.arange(N_FFT, dtype=jnp.float32)
    window = 0.5 * (1.0 - jnp.cos(2.0 * jnp.pi * n / N_FFT))    # periodic Hann (torch default)

    mel = mel_filterbank(SAMPLE_RATE, N_FFT, N_MELS)            # (n_mels, n_freq)
    melT = np.zeros((F_PAD, N_MELS), dtype=np.float32)
    melT[:N_FREQ, :] = mel.T                                    # freq-padded transpose
    return {
        "window": window,
        "melT": jnp.asarray(melT, dtype=jnp.bfloat16),
        "emb_cat": emb_cat,
    }


if __name__ == "__main__":
    key = jax.random.PRNGKey(0)
    pkey, xkey = jax.random.split(key)
    params = init_params(pkey)

    batch = 2
    x = jax.random.normal(xkey, (batch, N_FFT), dtype=jnp.float32)

    out = random_projection_mel_embedding(x, params)
    out = jax.tree_util.tree_map(jax.block_until_ready, out)

    assert out[4096].shape == (batch, 4096) and out[4096].dtype == jnp.float32
    assert out[2048].shape == (batch, 2048) and out[2048].dtype == jnp.float32
    assert out[512].shape == (batch, 512) and out[512].dtype == jnp.float32
    assert out[128].shape == (batch, 128) and out[128].dtype == jnp.float32
    assert out[20].shape == (batch, 20) and out[20].dtype == jnp.int8
    assert jnp.all(jnp.isfinite(out[4096]))
    assert jnp.all((out[20] >= INT8_MIN) & (out[20] <= INT8_MAX))

    print("KERNEL_OK")
</pallas_src>

<mosaic_0001>
module attributes {stable_mosaic.version = 11 : i64} {
  func.func @_rpme_kernel(%arg0: i32, %arg1: memref<16x2176xbf16, #tpu.memory_space<vmem>>, %arg2: memref<2176x256xbf16, #tpu.memory_space<vmem>>, %arg3: memref<256x2304xbf16, #tpu.memory_space<vmem>>, %arg4: memref<16x2304xf32, #tpu.memory_space<vmem>>) attributes {dimension_semantics = [#tpu.dimension_semantics<parallel>], iteration_bounds = array<i64: 3>, scalar_prefetch = 0 : i64, scratch_operands = 0 : i64, tpu.core_type = #tpu.core_type<tc>, window_params = [{pipeline_mode = #tpu.pipeline_mode<synchronous>, transform_indices = @transform_0, window_bounds = array<i64: 16, 2176>}, {pipeline_mode = #tpu.pipeline_mode<synchronous>, transform_indices = @transform_1, window_bounds = array<i64: 2176, 256>}, {transform_indices = @transform_2, window_bounds = array<i64: 256, 2304>}, {transform_indices = @transform_3, window_bounds = array<i64: 16, 2304>}]} {
    %c0 = arith.constant 0 : index
    %c0_0 = arith.constant 0 : index
    %0 = vector.load %arg1[%c0, %c0_0] : memref<16x2176xbf16, #tpu.memory_space<vmem>>, vector<16x2176xbf16>
    %c0_1 = arith.constant 0 : index
    %c0_2 = arith.constant 0 : index
    %1 = vector.load %arg2[%c0_1, %c0_2] : memref<2176x256xbf16, #tpu.memory_space<vmem>>, vector<2176x256xbf16>
    %cst = arith.constant dense<0.000000e+00> : vector<16x256xf32>
    %2 = tpu.matmul %0, %1, %cst {dimension_numbers = #tpu.dot_dimension_numbers<[1], [0], [0], [1], [0, 0, 1, 1], [], []>} : vector<16x2176xbf16>, vector<2176x256xbf16>, vector<16x256xf32> -> vector<16x256xf32>
    %cst_3 = arith.constant 9.99999974E-5 : f32
    %3 = vector.broadcast %cst_3 : f32 to vector<16x256xf32>
    %4 = arith.addf %2, %3 : vector<16x256xf32>
    %5 = math.log %4 : vector<16x256xf32>
    %6 = arith.truncf %5 : vector<16x256xf32> to vector<16x256xbf16>
    %c0_4 = arith.constant 0 : index
    %c0_5 = arith.constant 0 : index
    %7 = vector.load %arg3[%c0_4, %c0_5] : memref<256x2304xbf16, #tpu.memory_space<vmem>>, vector<256x2304xbf16>
    %cst_6 = arith.constant dense<0.000000e+00> : vector<16x2304xf32>
    %8 = tpu.matmul %6, %7, %cst_6 {dimension_numbers = #tpu.dot_dimension_numbers<[1], [0], [0], [1], [0, 0, 1, 1], [], []>} : vector<16x256xbf16>, vector<256x2304xbf16>, vector<16x2304xf32> -> vector<16x2304xf32>
    %c0_7 = arith.constant 0 : index
    %c0_8 = arith.constant 0 : index
    %9 = vector.load %arg4[%c0_7, %c0_8] : memref<16x2304xf32, #tpu.memory_space<vmem>>, vector<16x2304xf32>
    tpu.vector_store %arg4[%c0_7, %c0_8], %8 {strides = array<i32>} : memref<16x2304xf32, #tpu.memory_space<vmem>>, vector<16x2304xf32>,
    %c2_i32 = arith.constant 2 : i32
    %10 = arith.cmpi eq, %arg0, %c2_i32 : i32
    %11 = arith.extui %10 : i1 to i32
    %c0_i32 = arith.constant 0 : i32
    %12 = arith.cmpi ne, %11, %c0_i32 : i32
    scf.if %12 {
      %13 = vector.extract_strided_slice %8 {offsets = [0, 2176], sizes = [16, 128], strides = [1, 1]} : vector<16x2304xf32> to vector<16x128xf32>
      %14 = math.absf %13 : vector<16x128xf32>
      %cst_9 = arith.constant 0.000000e+00 : f32
      %15 = vector.broadcast %cst_9 : f32 to vector<16x128xf32>
      %16 = arith.subf %15, %14 : vector<16x128xf32>
      %17 = math.exp %16 : vector<16x128xf32>
      %cst_10 = arith.constant 0.000000e+00 : f32
      %18 = vector.broadcast %cst_10 : f32 to vector<16x128xf32>
      %19 = arith.cmpf oge, %13, %18 : vector<16x128xf32>
      %cst_11 = arith.constant 1.000000e+00 : f32
      %20 = vector.broadcast %cst_11 : f32 to vector<16x128xf32>
      %21 = arith.addf %20, %17 : vector<16x128xf32>
      %cst_12 = arith.constant 1.000000e+00 : f32
      %22 = vector.broadcast %cst_12 : f32 to vector<16x128xf32>
      %23 = arith.divf %22, %21 : vector<16x128xf32>
      %cst_13 = arith.constant 1.000000e+00 : f32
      %24 = vector.broadcast %cst_13 : f32 to vector<16x128xf32>
      %25 = arith.addf %24, %17 : vector<16x128xf32>
      %26 = arith.divf %17, %25 : vector<16x128xf32>
      %27 = arith.select %19, %23, %26 : vector<16x128xi1>, vector<16x128xf32>
      %cst_14 = arith.constant 2.550000e+02 : f32
      %28 = vector.broadcast %cst_14 : f32 to vector<16x128xf32>
      %29 = arith.mulf %27, %28 : vector<16x128xf32>
      %cst_15 = arith.constant -1.280000e+02 : f32
      %30 = vector.broadcast %cst_15 : f32 to vector<16x128xf32>
      %31 = arith.addf %29, %30 : vector<16x128xf32>
      %c0_16 = arith.constant 0 : index
      %c2176 = arith.constant 2176 : index
      %32 = vector.load %arg4[%c0_16, %c2176] : memref<16x2304xf32, #tpu.memory_space<vmem>>, vector<16x128xf32>
      tpu.vector_store %arg4[%c0_16, %c2176], %31 {strides = array<i32>} : memref<16x2304xf32, #tpu.memory_space<vmem>>, vector<16x128xf32>,
    } else {
    }
    return
  }
  func.func @transform_0(%arg0: i32) -> (i32, i32) {
    %c0_i32 = arith.constant 0 : i32
    %c0_i32_0 = arith.constant 0 : i32
    %c0_i32_1 = arith.constant 0 : i32
    return %c0_i32, %c0_i32_0 : i32, i32
  }
  func.func @transform_1(%arg0: i32) -> (i32, i32) {
    %c0_i32 = arith.constant 0 : i32
    %c0_i32_0 = arith.constant 0 : i32
    %c0_i32_1 = arith.constant 0 : i32
    return %c0_i32, %c0_i32_0 : i32, i32
  }
  func.func @transform_2(%arg0: i32) -> (i32, i32) {
    %c0_i32 = arith.constant 0 : i32
    %c0_i32_0 = arith.constant 0 : i32
    return %c0_i32, %arg0 : i32, i32
  }
  func.func @transform_3(%arg0: i32) -> (i32, i32) {
    %c0_i32 = arith.constant 0 : i32
    %c0_i32_0 = arith.constant 0 : i32
    return %c0_i32, %arg0 : i32, i32
  }
}

</mosaic_0001>

<bundles_post_ra>
// kernel: tpu_custom_call.1
= control target key start
LH: loop header
LB: loop body
LE: loop exit
PB: predicated region body
PF: predicated region fallthrough
CT: control target
= control target key end

     0   :  { %s9070_s0 = inlined_call_operand.hbm [shape: bf16[16,2176], index: 0, kind: input, shape index: {}]   ;;  %s9071_s1 = inlined_call_operand.hbm [shape: bf16[2176,256], index: 1, kind: input, shape index: {}]   ;;  %s9072_s2 = inlined_call_operand.hbm [shape: bf16[256,6912], index: 2, kind: input, shape index: {}]   ;;  %s9073_s3 = inlined_call_operand.hbm [shape: f32[16,6912], index: 3, kind: output, shape index: {}]  }
   0x1   :  { %9074 = sst [smem:[#allocation14_spill]] %s9070_s0 }
   0x2   :  { %9075 = sst [smem:[#allocation15_spill]] %s9071_s1 }
   0x3   :  { %8 = vsyncpa [#allocation3], 0 }
   0x4   :  { %9 = vsyncpa [#allocation6], 0 }
   0x5   :  { %10 = vsyncpa [#allocation4], 0 }
   0x6   :  { %12 = vsyncpa [#allocation4 + $0x1], 0  ;;  %s8072_s12 = smov 0   ;;  %s8074_s13 = smov 0  }
   0x7   :  { %s8076_s14 = smov 0   ;;  %s8078_s15 = smov 0  }
   0x8 LB: > { %s8093_s16 = sadd.s32 4294967295, %s8038_s15   ;;  %s4878_s17 = sadd.s32 4294967294, %s8038_s15   ;;  %s8038_s15 = sphi %s8078_s15, %s9090_s15   ;;  %s8034_s14 = sphi %s8076_s14, %s9089_s14   ;;  %s8030_s13 = sphi %s8074_s13, %s9088_s13   ;;  %s8026_s12 = sphi %s8072_s12, %s9087_s12  }
   0x9   : > { %s8097_s18 = sadd.s32 1, %s8038_s15   ;;  %s67_s19 = sadd.s32 1, %s8034_s14 }
   0xa   : > { %s64_s20 = ssub.s32 %s8038_s15, %s8097_s18  ;;  %p74_p0 = scmp.ne.s32.totalorder %s8034_s14, %s8030_s13 }
   0xb   : > { %p65_p1 = scmp.eq.s32.totalorder %s64_s20, 0  ;;  %p75_p2 = scmp.eq.s32.totalorder %s8038_s15, 0 }
   0xc   : > { %p80_p3 = scmp.ne.s32.totalorder %s8030_s13, %s8026_s12  ;;  %p81_p4 = scmp.eq.s32.totalorder %s8093_s16, 0 }
   0xd   : > { %s8109_s21 = scalar_select %p65_p1, %s8034_s14, %s67_s19  }
   0xe   : > { %p8111_p5 = por %p75_p2, %p74_p0  ;;  %p8117_p6 = por %p81_p4, %p80_p3 }
   0xf   : > { %9076 = sst [smem:[#allocation13_spill]] %s8109_s21  ;;  %p104_p7 = scmp.eq.s32.totalorder %s8093_s16, 2 }
  0x10   : > { %p110_p8 = scmp.eq.s32.totalorder %s4878_s17, 2  ;;  %p4879_p9 = scmp.ge.s32.totalorder %s8038_s15, 1 }
  0x11   : > { %p117_p10 = scmp.lt.s32.totalorder %s8038_s15, 4  ;;  %p8124_p11 = por %p104_p7, %p74_p0 }
  0x12   : > { %p8128_p12 = por %p110_p8, %p80_p3  ;;  %s9082_s0 = sld [smem:[#allocation14_spill]] }
  0x13   : > { %p8132_p13 = pnand %p4879_p9, %p117_p10  ;;  %s8040_s30 = smov [#allocation2]  }
  0x14   : > { %s130_s4 = sshll.u32 %s8040_s30, 4  ;;  %p7810_p2 = scmp.lt.s32.totalorder %s8038_s15, 3  ;;  %s131_s4 = int_to_ptr.vmem [resolvable:$true] %s130_s4 }
  0x15   : > { %p7793_p1 = pneg %p8132_p13  ;;  %s8041_s6 = smov 1088  }
  0x16   : > { %s8042_s7 = smov 68   ;;  %p8152_p3 = pnand %p7810_p2, %p8111_p5 }
  0x17   : > { %p8143_p0 = pnand %p7793_p1, %p81_p4  ;;  %s9085_s1 = sld [smem:[#allocation15_spill]] }
  0x18   : > { %s128_s29 = sshll.u32 %s9082_s0, 4  ;;  %s8043_s17 = smov [#allocation5]   ;;  %s129_s29 = int_to_ptr.hbm [resolvable:$true] %s128_s29 }
  0x19   : > { %7796 = dma.hbm_to_vmem [thread:$0]  (!%p8143_p0), %s129_s29, 2176, %s131_s4, [#allocation3], %s8041_s6, %s8041_s6, %s8042_s7  }
  0x1a   : > { %s144_s19 = sshll.u32 %s8043_s17, 4  ;;  %s158_s20 = sand.u32 1, %s8038_s15   ;;  %s145_s19 = int_to_ptr.vmem [resolvable:$true] %s144_s19 }
  0x1b   : > { %s8044_s27 = smov 128   ;;  %s8045_s28 = smov 8  }
  0x1c   : > { %s160_s29 = sand.u32 1, %s8034_s14   ;;  %s7199_s30 = smul.u32 72, %s8038_s15 }
  0x1d   : > { %s142_s11 = sshll.u32 %s9085_s1, 4  ;;  %s7778_s22 = smul.u32 2304, %s160_s29  ;;  %s143_s11 = int_to_ptr.hbm [resolvable:$true] %s142_s11 }
  0x1e   : > { %7799 = dma.hbm_to_vmem [thread:$0]  (!%p8143_p0), %s143_s11, 34816, %s145_s19, [#allocation6], %s8044_s27, %s8044_s27, %s8045_s28  }
  0x1f   : > { %s167_s7 = scalar_lea.hbm %s9072_s2, %s7199_s30  ;;  %s162_s0 = scalar_lea.vmem [#allocation7], %s7778_s22 }
  0x20   : > { %s170_s9 = sshll.u32 %s162_s0, 4  ;;  %s168_s10 = sshll.u32 %s167_s7, 4  ;;  %s171_s9 = int_to_ptr.vmem [resolvable:$true] %s170_s9  ;;  %s169_s10 = int_to_ptr.hbm [resolvable:$true] %s168_s10 }
  0x21   : > { %s159_s17 = scalar_lea.sflag [#allocation3], %s158_s20  ;;  %s7934_s1 = sshra.s32 %s169_s10, 4  ;;  %s7935_s1 = int_to_ptr.hbm [resolvable:$true] %s7934_s1 }
  0x22   : > { %s7936_s21 = scalar_lea.hbm %s7935_s1, 2304  ;;  %p7938_p7 = pneg %p8152_p3 }
  0x23   : > { %p7937_p5 = scmp.ne.s32.totalorder %s7935_s1, %s7936_s21  ;;  %s7941_s19 = scalar_lea.hbm %s9072_s2, 6912 }
  0x24   : > { %p7942_p10 = scmp.lt.s32.totalorder %s7935_s1, %s9072_s2  ;;  %p7943_p1 = scmp.lt.s32.totalorder %s7941_s19, %s7936_s21 }
  0x25   : > { %p7939_p8 = pnand %p7938_p7, %p7937_p5 }
  0x26   : > { %p7944_p0 = por %p7943_p1, %p7942_p10 }
  0x27   : > { %p7940_p9 = pneg %p7939_p8 }
  0x29   : > { %p7945_p2 = pnand %p7944_p0, %p7940_p9 }
  0x2b   : > { %7948 = shalt.err (!%p7945_p2)
}
  0x2c   : > { %s8046_s0 = smov 3456   ;;  %s8047_s20 = smov 1152  }
  0x2d   : > { %s8048_s29 = smov 72   ;;  %182 = sbr.rel (%p8132_p13) target bundleno = 928 (0x3a0), region = 32 }
  0x2e   : > { %7803 = dma.hbm_to_vmem [thread:$0]  (!%p8152_p3), %s169_s10, 36864, %s171_s9, %s159_s17, %s8046_s0, %s8047_s20, %s8048_s29  }
  0x32   : > { %8009 = dma.done.wait (%p81_p4), [#allocation3], 2176  }
  0x33   : > { %8011 = vsyncadd (%p81_p4), [#allocation3], 4294965120 }
  0x34   : > { %8013 = dma.done.wait (%p81_p4), [#allocation6], 34816  }
  0x35   : > { %8015 = vsyncadd (%p81_p4), [#allocation6], 4294932480  ;;  %s194_s1 = sand.u32 1, %s8093_s16   ;;  %s8189_s21 = sand.u32 1, %s8030_s13  }
  0x36   : > { %s7779_s26 = smul.u32 2304, %s8189_s21  ;;  %s195_s8 = scalar_lea.sflag [#allocation3], %s194_s1 }
  0x38   : > { %s8192_s22 = scalar_lea.vmem [#allocation7], %s7779_s26 }
  0x39   : > { %8017 = dma.done.wait (%p8117_p6), %s195_s8, 36864  }
  0x3a   : > { %8019 = vsyncadd (%p8117_p6), %s195_s8, 4294930432  ;;  %v5013_v0 = vld [vmem:[#allocation5 + $0x70] sm:$0xf]  ;;  %v7232_v1 = vld [vmem:[#allocation5 + $0x74] sm:$0xf0]  ;;  %s7780_s23 = smul.u32 288, %s8189_s21 }
  0x3b   : > { %v5077_v2 = vld [vmem:[#allocation5 + $0xf0] sm:$0xf]  ;;  %v5014_v3 = vor.u32 %v7232_v1, %v5013_v0  ;;  %v7248_v4 = vld [vmem:[#allocation5 + $0xf4] sm:$0xf0]  ;;  %v5005_v11 = vld [vmem:[#allocation5 + $0x60] sm:$0xf] }
  0x3c   : > { %v5141_v5 = vld [vmem:[#allocation5 + $0x170] sm:$0xf]  ;;  %v7264_v6 = vld [vmem:[#allocation5 + $0x174] sm:$0xf0]  ;;  %v5078_v7 = vor.u32 %v7248_v4, %v5077_v2  ;;  %v7230_v13 = vld [vmem:[#allocation5 + $0x64] sm:$0xf0] }
  0x3d   : > { %v5142_v8 = vor.u32 %v7264_v6, %v5141_v5  ;;  %v5205_v9 = vld [vmem:[#allocation5 + $0x1f0] sm:$0xf]  ;;  %v7280_v10 = vld [vmem:[#allocation5 + $0x1f4] sm:$0xf0]  ;;  %1960 = vmatpush.bf16.msra.mxu0 %v5014_v3  ;;  %v5069_v14 = vld [vmem:[#allocation5 + $0xe0] sm:$0xf]  ;;  %v5006_v16 = vor.u32 %v7230_v13, %v5005_v11 }
  0x3e   : > { %v5206_v12 = vor.u32 %v7280_v10, %v5205_v9  ;;  %v7246_v15 = vld [vmem:[#allocation5 + $0xe4] sm:$0xf0]  ;;  %1974 = vmatpush.bf16.msra.mxu1 %v5078_v7  ;;  %v5133_v18 = vld [vmem:[#allocation5 + $0x160] sm:$0xf]  ;;  %v4997_v23 = vld [vmem:[#allocation5 + $0x50] sm:$0xf] }
  0x3f   : > { %1988 = vmatpush.bf16.msra.mxu2 %v5142_v8  ;;  %v5070_v17 = vor.u32 %v7246_v15, %v5069_v14  ;;  %v7262_v19 = vld [vmem:[#allocation5 + $0x164] sm:$0xf0]  ;;  %v5197_v20 = vld [vmem:[#allocation5 + $0x1e0] sm:$0xf]  ;;  %v7228_v24 = vld [vmem:[#allocation5 + $0x54] sm:$0xf0] }
  0x40   : > { %2002 = vmatpush.bf16.msra.mxu3 %v5206_v12  ;;  %v5134_v21 = vor.u32 %v7262_v19, %v5133_v18  ;;  %v7278_v22 = vld [vmem:[#allocation5 + $0x1e4] sm:$0xf0]  ;;  %v5061_v26 = vld [vmem:[#allocation5 + $0xd0] sm:$0xf]  ;;  %v7244_v27 = vld [vmem:[#allocation5 + $0xd4] sm:$0xf0]  ;;  %v4998_v29 = vor.u32 %v7228_v24, %v4997_v23 }
  0x41   : > { %v5198_v25 = vor.u32 %v7278_v22, %v5197_v20  ;;  %v5125_v28 = vld [vmem:[#allocation5 + $0x150] sm:$0xf]  ;;  %1961 = vmatpush.bf16.msra.mxu0 %v5006_v16  ;;  %v7260_v30 = vld [vmem:[#allocation5 + $0x154] sm:$0xf0]  ;;  %v5062_v33 = vor.u32 %v7244_v27, %v5061_v26  ;;  %v4989_v35 = vld [vmem:[#allocation5 + $0x40] sm:$0xf] }
  0x42   : > { %v5189_v31 = vld [vmem:[#allocation5 + $0x1d0] sm:$0xf]  ;;  %v7276_v32 = vld [vmem:[#allocation5 + $0x1d4] sm:$0xf0]  ;;  %1975 = vmatpush.bf16.msra.mxu1 %v5070_v17  ;;  %v5126_v34 = vor.u32 %v7260_v30, %v5125_v28  ;;  %v7226_v36 = vld [vmem:[#allocation5 + $0x44] sm:$0xf0] }
  0x43   : > { %1989 = vmatpush.bf16.msra.mxu2 %v5134_v21  ;;  %v5053_v37 = vld [vmem:[#allocation5 + $0xc0] sm:$0xf]  ;;  %v5190_v38 = vor.u32 %v7276_v32, %v5189_v31  ;;  %v7242_v39 = vld [vmem:[#allocation5 + $0xc4] sm:$0xf0]  ;;  %v4990_v44 = vor.u32 %v7226_v36, %v4989_v35  ;;  %v4981_v47 = vld [vmem:[#allocation5 + $0x30] sm:$0xf] }
  0x44   : > { %2003 = vmatpush.bf16.msra.mxu3 %v5198_v25  ;;  %v5117_v40 = vld [vmem:[#allocation5 + $0x140] sm:$0xf]  ;;  %v7258_v41 = vld [vmem:[#allocation5 + $0x144] sm:$0xf0]  ;;  %v5054_v45 = vor.u32 %v7242_v39, %v5053_v37  ;;  %v7224_v48 = vld [vmem:[#allocation5 + $0x34] sm:$0xf0] }
  0x45   : > { %v5181_v42 = vld [vmem:[#allocation5 + $0x1c0] sm:$0xf]  ;;  %v7274_v43 = vld [vmem:[#allocation5 + $0x1c4] sm:$0xf0]  ;;  %1962 = vmatpush.bf16.msra.mxu0 %v4998_v29  ;;  %v5118_v46 = vor.u32 %v7258_v41, %v5117_v40  ;;  %v5045_v49 = vld [vmem:[#allocation5 + $0xb0] sm:$0xf]  ;;  %v4982_v56 = vor.u32 %v7224_v48, %v4981_v47 }
  0x46   : > { %1976 = vmatpush.bf16.msra.mxu1 %v5062_v33  ;;  %v5182_v50 = vor.u32 %v7274_v43, %v5181_v42  ;;  %v7240_v51 = vld [vmem:[#allocation5 + $0xb4] sm:$0xf0]  ;;  %v5109_v52 = vld [vmem:[#allocation5 + $0x130] sm:$0xf]  ;;  %v4973_v59 = vld [vmem:[#allocation5 + $0x20] sm:$0xf] }
  0x47   : > { %1990 = vmatpush.bf16.msra.mxu2 %v5126_v34  ;;  %v7256_v53 = vld [vmem:[#allocation5 + $0x134] sm:$0xf0]  ;;  %v5173_v54 = vld [vmem:[#allocation5 + $0x1b0] sm:$0xf]  ;;  %v5046_v57 = vor.u32 %v7240_v51, %v5045_v49  ;;  %v7222_v60 = vld [vmem:[#allocation5 + $0x24] sm:$0xf0] }
  0x48   : > { %2004 = vmatpush.bf16.msra.mxu3 %v5190_v38  ;;  %v7272_v55 = vld [vmem:[#allocation5 + $0x1b4] sm:$0xf0]  ;;  %v5110_v58 = vor.u32 %v7256_v53, %v5109_v52  ;;  %v5037_v61 = vld [vmem:[#allocation5 + $0xa0] sm:$0xf]  ;;  %v7238_v63 = vld [vmem:[#allocation5 + $0xa4] sm:$0xf0]  ;;  %v4974_v4 = vor.u32 %v7222_v60, %v4973_v59 }
  0x49   : > { %1963 = vmatpush.bf16.msra.mxu0 %v4990_v44  ;;  %v5174_v62 = vor.u32 %v7272_v55, %v5173_v54  ;;  %v5101_v0 = vld [vmem:[#allocation5 + $0x120] sm:$0xf]  ;;  %v7254_v1 = vld [vmem:[#allocation5 + $0x124] sm:$0xf0]  ;;  %v5038_v5 = vor.u32 %v7238_v63, %v5037_v61  ;;  %v4965_v7 = vld [vmem:[#allocation5 + $0x10] sm:$0xf] }
  0x4a   : > { %1977 = vmatpush.bf16.msra.mxu1 %v5054_v45  ;;  %v5165_v2 = vld [vmem:[#allocation5 + $0x1a0] sm:$0xf]  ;;  %v7270_v3 = vld [vmem:[#allocation5 + $0x1a4] sm:$0xf0]  ;;  %v5102_v6 = vor.u32 %v7254_v1, %v5101_v0  ;;  %v7220_v8 = vld [vmem:[#allocation5 + $0x14] sm:$0xf0] }
  0x4b   : > { %1991 = vmatpush.bf16.msra.mxu2 %v5118_v46  ;;  %v5029_v9 = vld [vmem:[#allocation5 + $0x90] sm:$0xf]  ;;  %v5166_v10 = vor.u32 %v7270_v3, %v5165_v2  ;;  %v7236_v11 = vld [vmem:[#allocation5 + $0x94] sm:$0xf0]  ;;  %v4966_v16 = vor.u32 %v7220_v8, %v4965_v7  ;;  %v4957_v17 = vld [vmem:[#allocation5] sm:$0xf] }
  0x4c   : > { %2005 = vmatpush.bf16.msra.mxu3 %v5182_v50  ;;  %v5093_v12 = vld [vmem:[#allocation5 + $0x110] sm:$0xf]  ;;  %v7252_v13 = vld [vmem:[#allocation5 + $0x114] sm:$0xf0]  ;;  %v7218_v18 = vld [vmem:[#allocation5 + $0x4] sm:$0xf0]  ;;  %v5030_v19 = vor.u32 %v7236_v11, %v5029_v9 }
  0x4d   : > { %1964 = vmatpush.bf16.msra.mxu0 %v4982_v56  ;;  %v5157_v14 = vld [vmem:[#allocation5 + $0x190] sm:$0xf]  ;;  %v7268_v15 = vld [vmem:[#allocation5 + $0x194] sm:$0xf0]  ;;  %v5094_v20 = vor.u32 %v7252_v13, %v5093_v12  ;;  %v5021_v21 = vld [vmem:[#allocation5 + $0x80] sm:$0xf]  ;;  %v4958_v31 = vor.u32 %v7218_v18, %v4957_v17 }
  0x4e   : > { %1978 = vmatpush.bf16.msra.mxu1 %v5046_v57  ;;  %v7234_v22 = vld [vmem:[#allocation5 + $0x84] sm:$0xf0]  ;;  %v5085_v23 = vld [vmem:[#allocation5 + $0x100] sm:$0xf]  ;;  %v5158_v24 = vor.u32 %v7268_v15, %v5157_v14  ;;  %v5269_v26 = vld [vmem:[#allocation5 + $0x270] sm:$0xf] }
  0x4f   : > { %1992 = vmatpush.bf16.msra.mxu2 %v5110_v58  ;;  %v7250_v25 = vld [vmem:[#allocation5 + $0x104] sm:$0xf0]  ;;  %v7296_v27 = vld [vmem:[#allocation5 + $0x274] sm:$0xf0]  ;;  %v5333_v28 = vld [vmem:[#allocation5 + $0x2f0] sm:$0xf]  ;;  %v5022_v35 = vor.u32 %v7234_v22, %v5021_v21 }
  0x50   : > { %2006 = vmatpush.bf16.msra.mxu3 %v5174_v62  ;;  %v7312_v29 = vld [vmem:[#allocation5 + $0x2f4] sm:$0xf0]  ;;  %v5397_v30 = vld [vmem:[#allocation5 + $0x370] sm:$0xf]  ;;  %v5149_v33 = vld [vmem:[#allocation5 + $0x180] sm:$0xf]  ;;  %v5086_v36 = vor.u32 %v7250_v25, %v5085_v23  ;;  %v5270_v39 = vor.u32 %v7296_v27, %v5269_v26 }
  0x51   : > { %1965 = vmatpush.bf16.msra.mxu0 %v4974_v4  ;;  %v7328_v32 = vld [vmem:[#allocation5 + $0x374] sm:$0xf0]  ;;  %v7266_v34 = vld [vmem:[#allocation5 + $0x184] sm:$0xf0]  ;;  %v5461_v37 = vld [vmem:[#allocation5 + $0x3f0] sm:$0xf]  ;;  %v5334_v40 = vor.u32 %v7312_v29, %v5333_v28 }
  0x52   : > { %1979 = vmatpush.bf16.msra.mxu1 %v5038_v5  ;;  %v7344_v38 = vld [vmem:[#allocation5 + $0x3f4] sm:$0xf0]  ;;  %v5261_v41 = vld [vmem:[#allocation5 + $0x260] sm:$0xf]  ;;  %v7294_v42 = vld [vmem:[#allocation5 + $0x264] sm:$0xf0]  ;;  %v5398_v43 = vor.u32 %v7328_v32, %v5397_v30  ;;  %v5150_v44 = vor.u32 %v7266_v34, %v5149_v33 }
  0x53   : > { %1993 = vmatpush.bf16.msra.mxu2 %v5102_v6  ;;  %v5325_v45 = vld [vmem:[#allocation5 + $0x2e0] sm:$0xf]  ;;  %v7310_v46 = vld [vmem:[#allocation5 + $0x2e4] sm:$0xf0]  ;;  %v5462_v48 = vor.u32 %v7344_v38, %v5461_v37  ;;  %v5253_v52 = vld [vmem:[#allocation5 + $0x250] sm:$0xf]  ;;  %v5262_v56 = vor.u32 %v7294_v42, %v5261_v41 }
  0x54   : > { %2007 = vmatpush.bf16.msra.mxu3 %v5166_v10  ;;  %v5389_v47 = vld [vmem:[#allocation5 + $0x360] sm:$0xf]  ;;  %v7326_v49 = vld [vmem:[#allocation5 + $0x364] sm:$0xf0]  ;;  %v4889_v53 = vld [vmem:[#allocation2] sm:$0xf]  ;;  %v5326_v57 = vor.u32 %v7310_v46, %v5325_v45 }
  0x55   : > { %1966 = vmatpush.bf16.msra.mxu0 %v4966_v16  ;;  %v5453_v50 = vld [vmem:[#allocation5 + $0x3e0] sm:$0xf]  ;;  %v7342_v51 = vld [vmem:[#allocation5 + $0x3e4] sm:$0xf0]  ;;  %v7208_v54 = vld [vmem:[#allocation2 + $0x40] sm:$0xf0]  ;;  %v5390_v62 = vor.u32 %v7326_v49, %v5389_v47 }
  0x56   : > { %1980 = vmatpush.bf16.msra.mxu1 %v5030_v19  ;;  %v4897_v55 = vld [vmem:[#allocation2 + $0x8] sm:$0xf]  ;;  %v7292_v58 = vld [vmem:[#allocation5 + $0x254] sm:$0xf0]  ;;  %v5317_v59 = vld [vmem:[#allocation5 + $0x2d0] sm:$0xf]  ;;  %v8198_v60 = vor.u32 %v7208_v54, %v4889_v53  ;;  %v5454_v3 = vor.u32 %v7342_v51, %v5453_v50 }
  0x57   : > { %1994 = vmatpush.bf16.msra.mxu2 %v5094_v20  ;;  %v7209_v61 = vld [vmem:[#allocation2 + $0x48] sm:$0xf0]  ;;  %v7308_v63 = vld [vmem:[#allocation5 + $0x2d4] sm:$0xf0]  ;;  %v5381_v0 = vld [vmem:[#allocation5 + $0x350] sm:$0xf]  ;;  %v5254_v11 = vor.u32 %v7292_v58, %v5253_v52 }
  0x58   : > { %2008 = vmatpush.bf16.msra.mxu3 %v5158_v24  ;;  %v7324_v1 = vld [vmem:[#allocation5 + $0x354] sm:$0xf0]  ;;  %v8200_v2 = vor.u32 %v7209_v61, %v4897_v55  ;;  %v5445_v4 = vld [vmem:[#allocation5 + $0x3d0] sm:$0xf]  ;;  %v7200_v5 = vld [vmem:[#allocation2 + $0x4] sm:$0xf]  ;;  %v5318_v12 = vor.u32 %v7308_v63, %v5317_v59 }
  0x59   : > { %1967 = vmatpush.bf16.msra.mxu0 %v4958_v31  ;;  %v4891_v6 = vld [vmem:[#allocation2 + $0x44] sm:$0xf0]  ;;  %v7340_v7 = vld [vmem:[#allocation5 + $0x3d4] sm:$0xf0]  ;;  %v7201_v9 = vld [vmem:[#allocation2 + $0xc] sm:$0xf]  ;;  %v5382_v15 = vor.u32 %v7324_v1, %v5381_v0 }
  0x5a   : > { %1981 = vmatpush.bf16.msra.mxu1 %v5022_v35  ;;  %v8204_v8 = vor.u32 %v7200_v5, %v4891_v6  ;;  %v4899_v10 = vld [vmem:[#allocation2 + $0x4c] sm:$0xf0]  ;;  %v5245_v13 = vld [vmem:[#allocation5 + $0x240] sm:$0xf]  ;;  %v5446_v19 = vor.u32 %v7340_v7, %v5445_v4  ;;  %v5237_v26 = vld [vmem:[#allocation5 + $0x230] sm:$0xf] }
  0x5b   : > { %1995 = vmatpush.bf16.msra.mxu2 %v5086_v36  ;;  %v8206_v14 = vor.u32 %v7201_v9, %v4899_v10  ;;  %v7290_v16 = vld [vmem:[#allocation5 + $0x244] sm:$0xf0]  ;;  %v5309_v17 = vld [vmem:[#allocation5 + $0x2c0] sm:$0xf]  ;;  %v7288_v28 = vld [vmem:[#allocation5 + $0x234] sm:$0xf0] }
  0x5c   : > { %2009 = vmatpush.bf16.msra.mxu3 %v5150_v44  ;;  %1968 = vmatmul.bf16.vlgmr.msra.gmra.mxu0 %v8198_v60  ;;  %v7306_v18 = vld [vmem:[#allocation5 + $0x2c4] sm:$0xf0]  ;;  %v5373_v20 = vld [vmem:[#allocation5 + $0x340] sm:$0xf]  ;;  %v5246_v24 = vor.u32 %v7290_v16, %v5245_v13  ;;  %v5301_v29 = vld [vmem:[#allocation5 + $0x2b0] sm:$0xf]  ;;  %v5238_v36 = vor.u32 %v7288_v28, %v5237_v26 }
  0x5d   : > { %2016 = vmatpush.bf16.msrb.mxu0 %v5270_v39  ;;  %1982 = vmatmul.bf16.vlgmr.msra.gmra.mxu1 %v8204_v8  ;;  %v7322_v21 = vld [vmem:[#allocation5 + $0x344] sm:$0xf0]  ;;  %v5437_v22 = vld [vmem:[#allocation5 + $0x3c0] sm:$0xf]  ;;  %v5310_v25 = vor.u32 %v7306_v18, %v5309_v17  ;;  %v7304_v30 = vld [vmem:[#allocation5 + $0x2b4] sm:$0xf0] }
  0x5e   : > { %2030 = vmatpush.bf16.msrb.mxu1 %v5334_v40  ;;  %1996 = vmatmul.bf16.vlgmr.msra.gmra.mxu2 %v8200_v2  ;;  %v7338_v23 = vld [vmem:[#allocation5 + $0x3c4] sm:$0xf0]  ;;  %v5374_v27 = vor.u32 %v7322_v21, %v5373_v20  ;;  %v5365_v32 = vld [vmem:[#allocation5 + $0x330] sm:$0xf]  ;;  %v7320_v33 = vld [vmem:[#allocation5 + $0x334] sm:$0xf0]  ;;  %v5302_v37 = vor.u32 %v7304_v30, %v5301_v29 }
  0x5f   : > { %2044 = vmatpush.bf16.msrb.mxu2 %v5398_v43  ;;  %2010 = vmatmul.bf16.vlgmr.msra.gmra.mxu3 %v8206_v14  ;;  %v5438_v31 = vor.u32 %v7338_v23, %v5437_v22  ;;  %v5429_v34 = vld [vmem:[#allocation5 + $0x3b0] sm:$0xf]  ;;  %v7336_v35 = vld [vmem:[#allocation5 + $0x3b4] sm:$0xf0]  ;;  %v5229_v38 = vld [vmem:[#allocation5 + $0x220] sm:$0xf]  ;;  %v5366_v39 = vor.u32 %v7320_v33, %v5365_v32 }
  0x60   : > { %2058 = vmatpush.bf16.msrb.mxu3 %v5462_v48  ;;  %v7286_v40 = vld [vmem:[#allocation5 + $0x224] sm:$0xf0]  ;;  %v5293_v41 = vld [vmem:[#allocation5 + $0x2a0] sm:$0xf]  ;;  %v5430_v43 = vor.u32 %v7336_v35, %v5429_v34  ;;  %v5221_v50 = vld [vmem:[#allocation5 + $0x210] sm:$0xf] }
  0x61   : > { %2017 = vmatpush.bf16.msrb.mxu0 %v5262_v56  ;;  %v7302_v42 = vld [vmem:[#allocation5 + $0x2a4] sm:$0xf0]  ;;  %v5357_v44 = vld [vmem:[#allocation5 + $0x320] sm:$0xf]  ;;  %v5230_v48 = vor.u32 %v7286_v40, %v5229_v38  ;;  %v7284_v51 = vld [vmem:[#allocation5 + $0x214] sm:$0xf0] }
  0x62   : > { %2031 = vmatpush.bf16.msrb.mxu1 %v5326_v57  ;;  %v7318_v45 = vld [vmem:[#allocation5 + $0x324] sm:$0xf0]  ;;  %v5421_v46 = vld [vmem:[#allocation5 + $0x3a0] sm:$0xf]  ;;  %v5294_v49 = vor.u32 %v7302_v42, %v5293_v41  ;;  %v5285_v53 = vld [vmem:[#allocation5 + $0x290] sm:$0xf]  ;;  %v5222_v1 = vor.u32 %v7284_v51, %v5221_v50 }
  0x63   : > { %2045 = vmatpush.bf16.msrb.mxu2 %v5390_v62  ;;  %v7334_v47 = vld [vmem:[#allocation5 + $0x3a4] sm:$0xf0]  ;;  %v5358_v52 = vor.u32 %v7318_v45, %v5357_v44  ;;  %v7300_v54 = vld [vmem:[#allocation5 + $0x294] sm:$0xf0]  ;;  %v5349_v55 = vld [vmem:[#allocation5 + $0x310] sm:$0xf] }
  0x64   : > { %2059 = vmatpush.bf16.msrb.mxu3 %v5454_v3  ;;  %v5422_v56 = vor.u32 %v7334_v47, %v5421_v46  ;;  %v7316_v57 = vld [vmem:[#allocation5 + $0x314] sm:$0xf0]  ;;  %v5413_v58 = vld [vmem:[#allocation5 + $0x390] sm:$0xf]  ;;  %v5213_v61 = vld [vmem:[#allocation5 + $0x200] sm:$0xf]  ;;  %v5286_v3 = vor.u32 %v7300_v54, %v5285_v53 }
  0x65   : > { %2018 = vmatpush.bf16.msrb.mxu0 %v5254_v11  ;;  %v7332_v59 = vld [vmem:[#allocation5 + $0x394] sm:$0xf0]  ;;  %v7282_v62 = vld [vmem:[#allocation5 + $0x204] sm:$0xf0]  ;;  %v5277_v63 = vld [vmem:[#allocation5 + $0x280] sm:$0xf]  ;;  %v5350_v7 = vor.u32 %v7316_v57, %v5349_v55 }
  0x66   : > { %2032 = vmatpush.bf16.msrb.mxu1 %v5318_v12  ;;  %v7298_v0 = vld [vmem:[#allocation5 + $0x284] sm:$0xf0]  ;;  %v5341_v4 = vld [vmem:[#allocation5 + $0x300] sm:$0xf]  ;;  %v5525_v6 = vld [vmem:[#allocation5 + $0x470] sm:$0xf]  ;;  %v5414_v12 = vor.u32 %v7332_v59, %v5413_v58  ;;  %v5214_v20 = vor.u32 %v7282_v62, %v5213_v61 }
  0x67   : > { %2046 = vmatpush.bf16.msrb.mxu2 %v5382_v15  ;;  %v7314_v5 = vld [vmem:[#allocation5 + $0x304] sm:$0xf0]  ;;  %v7360_v9 = vld [vmem:[#allocation5 + $0x474] sm:$0xf0]  ;;  %v5589_v10 = vld [vmem:[#allocation5 + $0x4f0] sm:$0xf]  ;;  %v5278_v21 = vor.u32 %v7298_v0, %v5277_v63 }
  0x68   : > { %2060 = vmatpush.bf16.msrb.mxu3 %v5446_v19  ;;  %v7376_v11 = vld [vmem:[#allocation5 + $0x4f4] sm:$0xf0]  ;;  %v5653_v13 = vld [vmem:[#allocation5 + $0x570] sm:$0xf]  ;;  %v5405_v16 = vld [vmem:[#allocation5 + $0x380] sm:$0xf]  ;;  %v5526_v26 = vor.u32 %v7360_v9, %v5525_v6 }
  0x69   : > { %2019 = vmatpush.bf16.msrb.mxu0 %v5246_v24  ;;  %v7392_v15 = vld [vmem:[#allocation5 + $0x574] sm:$0xf0]  ;;  %v7330_v17 = vld [vmem:[#allocation5 + $0x384] sm:$0xf0]  ;;  %v7210_v19 = vld [vmem:[#allocation2 + $0x50] sm:$0xf0]  ;;  %v5590_v30 = vor.u32 %v7376_v11, %v5589_v10 }
  0x6a   : > { %2033 = vmatpush.bf16.msrb.mxu1 %v5310_v25  ;;  %v4905_v18 = vld [vmem:[#allocation2 + $0x10] sm:$0xf]  ;;  %v4913_v22 = vld [vmem:[#allocation2 + $0x18] sm:$0xf]  ;;  %v7211_v23 = vld [vmem:[#allocation2 + $0x58] sm:$0xf0]  ;;  %v5342_v25 = vor.u32 %v7314_v5, %v5341_v4  ;;  %v5406_v35 = vor.u32 %v7330_v17, %v5405_v16 }
  0x6b   : > { %2047 = vmatpush.bf16.msrb.mxu2 %v5374_v27  ;;  %v5717_v24 = vld [vmem:[#allocation5 + $0x5f0] sm:$0xf]  ;;  %v7408_v27 = vld [vmem:[#allocation5 + $0x5f4] sm:$0xf0]  ;;  %v7202_v28 = vld [vmem:[#allocation2 + $0x14] sm:$0xf]  ;;  %v8212_v40 = vor.u32 %v7211_v23, %v4913_v22 }
  0x6c   : > { %2061 = vmatpush.bf16.msrb.mxu3 %v5438_v31  ;;  %v4907_v29 = vld [vmem:[#allocation2 + $0x54] sm:$0xf0]  ;;  %v5654_v31 = vor.u32 %v7392_v15, %v5653_v13  ;;  %v7203_v32 = vld [vmem:[#allocation2 + $0x1c] sm:$0xf]  ;;  %v5517_v33 = vld [vmem:[#allocation5 + $0x460] sm:$0xf]  ;;  %v5718_v41 = vor.u32 %v7408_v27, %v5717_v24 }
  0x6d   : > { %2020 = vmatpush.bf16.msrb.mxu0 %v5238_v36  ;;  %v7358_v34 = vld [vmem:[#allocation5 + $0x464] sm:$0xf0]  ;;  %v8210_v36 = vor.u32 %v7210_v19, %v4905_v18  ;;  %v5581_v38 = vld [vmem:[#allocation5 + $0x4e0] sm:$0xf]  ;;  %v8214_v44 = vor.u32 %v7202_v28, %v4907_v29  ;;  %v5509_v50 = vld [vmem:[#allocation5 + $0x450] sm:$0xf] }
  0x6e   : > { %2034 = vmatpush.bf16.msrb.mxu1 %v5302_v37  ;;  %v4915_v37 = vld [vmem:[#allocation2 + $0x5c] sm:$0xf0]  ;;  %v5645_v42 = vld [vmem:[#allocation5 + $0x560] sm:$0xf]  ;;  %v5518_v45 = vor.u32 %v7358_v34, %v5517_v33  ;;  %v7406_v47 = vld [vmem:[#allocation5 + $0x5e4] sm:$0xf0] }
  0x6f   : > { %2048 = vmatpush.bf16.msrb.mxu2 %v5366_v39  ;;  %v7374_v39 = vld [vmem:[#allocation5 + $0x4e4] sm:$0xf0]  ;;  %v5709_v46 = vld [vmem:[#allocation5 + $0x5e0] sm:$0xf]  ;;  %v7356_v51 = vld [vmem:[#allocation5 + $0x454] sm:$0xf0] }
  0x70   : > { %2062 = vmatpush.bf16.msrb.mxu3 %v5430_v43  ;;  %v7390_v43 = vld [vmem:[#allocation5 + $0x564] sm:$0xf0]  ;;  %v5573_v53 = vld [vmem:[#allocation5 + $0x4d0] sm:$0xf]  ;;  %v7372_v54 = vld [vmem:[#allocation5 + $0x4d4] sm:$0xf0]  ;;  %v5710_v55 = vor.u32 %v7406_v47, %v5709_v46  ;;  %v5510_v58 = vor.u32 %v7356_v51, %v5509_v50 }
  0x71   : > { %2021 = vmatpush.bf16.msrb.mxu0 %v5230_v48  ;;  %v8216_v48 = vor.u32 %v7203_v32, %v4915_v37  ;;  %v7388_v57 = vld [vmem:[#allocation5 + $0x554] sm:$0xf0]  ;;  %v5701_v59 = vld [vmem:[#allocation5 + $0x5d0] sm:$0xf]  ;;  %v5574_v62 = vor.u32 %v7372_v54, %v5573_v53  ;;  %v5501_v63 = vld [vmem:[#allocation5 + $0x440] sm:$0xf] }
  0x72   : > { %2035 = vmatpush.bf16.msrb.mxu1 %v5294_v49  ;;  %v5582_v49 = vor.u32 %v7374_v39, %v5581_v38  ;;  %v7404_v61 = vld [vmem:[#allocation5 + $0x5d4] sm:$0xf0]  ;;  %v7354_v0 = vld [vmem:[#allocation5 + $0x444] sm:$0xf0]  ;;  %v5629_v6 = vld [vmem:[#allocation5 + $0x540] sm:$0xf] }
  0x73   : > { %2049 = vmatpush.bf16.msrb.mxu2 %v5358_v52  ;;  %v5646_v52 = vor.u32 %v7390_v43, %v5645_v42  ;;  %v7370_v4 = vld [vmem:[#allocation5 + $0x4c4] sm:$0xf0]  ;;  %v5702_v5 = vor.u32 %v7404_v61, %v5701_v59  ;;  %v5502_v9 = vor.u32 %v7354_v0, %v5501_v63  ;;  %v5693_v10 = vld [vmem:[#allocation5 + $0x5c0] sm:$0xf]  ;;  %v5493_v13 = vld [vmem:[#allocation5 + $0x430] sm:$0xf] }
  0x74   : > { %2063 = vmatpush.bf16.msrb.mxu3 %v5422_v56  ;;  %v5637_v56 = vld [vmem:[#allocation5 + $0x550] sm:$0xf]  ;;  %v7402_v11 = vld [vmem:[#allocation5 + $0x5c4] sm:$0xf0]  ;;  %v7352_v15 = vld [vmem:[#allocation5 + $0x434] sm:$0xf0] }
  0x75   : > { %2022 = vmatpush.bf16.msrb.mxu0 %v5222_v1  ;;  %v5638_v1 = vor.u32 %v7388_v57, %v5637_v56  ;;  %v5557_v17 = vld [vmem:[#allocation5 + $0x4b0] sm:$0xf]  ;;  %v7368_v18 = vld [vmem:[#allocation5 + $0x4b4] sm:$0xf0]  ;;  %v5694_v19 = vor.u32 %v7402_v11, %v5693_v10  ;;  %v5494_v22 = vor.u32 %v7352_v15, %v5493_v13  ;;  %v7350_v27 = vld [vmem:[#allocation5 + $0x424] sm:$0xf0] }
  0x76   : > { %2036 = vmatpush.bf16.msrb.mxu1 %v5286_v3  ;;  %v5565_v3 = vld [vmem:[#allocation5 + $0x4c0] sm:$0xf]  ;;  %v5685_v23 = vld [vmem:[#allocation5 + $0x5b0] sm:$0xf]  ;;  %v7400_v24 = vld [vmem:[#allocation5 + $0x5b4] sm:$0xf0] }
  0x77   : > { %2050 = vmatpush.bf16.msrb.mxu2 %v5350_v7  ;;  %v7386_v7 = vld [vmem:[#allocation5 + $0x544] sm:$0xf0]  ;;  %v5549_v29 = vld [vmem:[#allocation5 + $0x4a0] sm:$0xf]  ;;  %v5477_v39 = vld [vmem:[#allocation5 + $0x410] sm:$0xf] }
  0x78   : > { %2064 = vmatpush.bf16.msrb.mxu3 %v5414_v12  ;;  %v5566_v12 = vor.u32 %v7370_v4, %v5565_v3  ;;  %v5630_v16 = vor.u32 %v7386_v7, %v5629_v6  ;;  %v5613_v32 = vld [vmem:[#allocation5 + $0x520] sm:$0xf]  ;;  %v7382_v33 = vld [vmem:[#allocation5 + $0x524] sm:$0xf0]  ;;  %v5541_v42 = vld [vmem:[#allocation5 + $0x490] sm:$0xf] }
  0x79   : > { %2023 = vmatpush.bf16.msrb.mxu0 %v5214_v20  ;;  %v5621_v20 = vld [vmem:[#allocation5 + $0x530] sm:$0xf]  ;;  %v7398_v37 = vld [vmem:[#allocation5 + $0x5a4] sm:$0xf0]  ;;  %v5614_v43 = vor.u32 %v7382_v33, %v5613_v32  ;;  %v7380_v47 = vld [vmem:[#allocation5 + $0x514] sm:$0xf0] }
  0x7a   : > { %2037 = vmatpush.bf16.msrb.mxu1 %v5278_v21  ;;  %v7384_v21 = vld [vmem:[#allocation5 + $0x534] sm:$0xf0]  ;;  %v5605_v46 = vld [vmem:[#allocation5 + $0x510] sm:$0xf]  ;;  %v7346_v54 = vld [vmem:[#allocation5 + $0x404] sm:$0xf0] }
  0x7b   : > { %2051 = vmatpush.bf16.msrb.mxu2 %v5342_v25  ;;  %v5558_v25 = vor.u32 %v7368_v18, %v5557_v17  ;;  %v5622_v28 = vor.u32 %v7384_v21, %v5621_v20  ;;  %v5669_v50 = vld [vmem:[#allocation5 + $0x590] sm:$0xf]  ;;  %v7396_v51 = vld [vmem:[#allocation5 + $0x594] sm:$0xf0]  ;;  %v7362_v56 = vld [vmem:[#allocation5 + $0x484] sm:$0xf0]  ;;  %v5606_v0 = vor.u32 %v7380_v47, %v5605_v46 }
  0x7c   : > { %2065 = vmatpush.bf16.msrb.mxu3 %v5406_v35  ;;  %2024 = vmatmul.bf16.vlgmr.msrb.gmra.mxu0 %v8210_v36  ;;  %v5677_v35 = vld [vmem:[#allocation5 + $0x5a0] sm:$0xf]  ;;  %v7378_v59 = vld [vmem:[#allocation5 + $0x504] sm:$0xf0]  ;;  %v5781_v61 = vld [vmem:[#allocation5 + $0x670] sm:$0xf] }
  0x7d   : > { %2072 = vmatpush.bf16.msra.mxu0 %v5526_v26  ;;  %2038 = vmatmul.bf16.vlgmr.msrb.gmra.mxu1 %v8214_v44  ;;  %v5485_v26 = vld [vmem:[#allocation5 + $0x420] sm:$0xf]  ;;  %v5845_v63 = vld [vmem:[#allocation5 + $0x6f0] sm:$0xf]  ;;  %v7456_v4 = vld [vmem:[#allocation5 + $0x774] sm:$0xf0] }
  0x7e   : > { %2086 = vmatpush.bf16.msra.mxu1 %v5590_v30  ;;  %2052 = vmatmul.bf16.vlgmr.msrb.gmra.mxu2 %v8212_v40  ;;  %v7366_v30 = vld [vmem:[#allocation5 + $0x4a4] sm:$0xf0]  ;;  %v5486_v34 = vor.u32 %v7350_v27, %v5485_v26  ;;  %v5909_v3 = vld [vmem:[#allocation5 + $0x770] sm:$0xf]  ;;  %v5661_v6 = vld [vmem:[#allocation5 + $0x580] sm:$0xf] }
  0x7f   : > { %2100 = vmatpush.bf16.msra.mxu2 %v5654_v31  ;;  %2066 = vmatmul.bf16.vlgmr.msrb.gmra.mxu3 %v8216_v48  ;;  %v5686_v31 = vor.u32 %v7400_v24, %v5685_v23  ;;  %v5550_v38 = vor.u32 %v7366_v30, %v5549_v29  ;;  %v7394_v7 = vld [vmem:[#allocation5 + $0x584] sm:$0xf0]  ;;  %v7212_v11 = vld [vmem:[#allocation2 + $0x60] sm:$0xf0]  ;;  %v7213_v13 = vld [vmem:[#allocation2 + $0x68] sm:$0xf0] }
  0x80   : > { %2114 = vmatpush.bf16.msra.mxu3 %v5718_v41  ;;  %v7348_v41 = vld [vmem:[#allocation5 + $0x414] sm:$0xf0]  ;;  %v5973_v17 = vld [vmem:[#allocation5 + $0x7f0] sm:$0xf]  ;;  %v7205_v23 = vld [vmem:[#allocation2 + $0x2c] sm:$0xf]  ;;  %v5662_v26 = vor.u32 %v7394_v7, %v5661_v6 }
  0x81   : > { %2073 = vmatpush.bf16.msra.mxu0 %v5518_v45  ;;  %v7364_v45 = vld [vmem:[#allocation5 + $0x494] sm:$0xf0]  ;;  %v5478_v53 = vor.u32 %v7348_v41, %v5477_v39  ;;  %v4931_v24 = vld [vmem:[#allocation2 + $0x6c] sm:$0xf0]  ;;  %v5773_v27 = vld [vmem:[#allocation5 + $0x660] sm:$0xf] }
  0x82   : > { %2087 = vmatpush.bf16.msra.mxu1 %v5582_v49  ;;  %v5678_v49 = vor.u32 %v7398_v37, %v5677_v35  ;;  %v5542_v57 = vor.u32 %v7364_v45, %v5541_v42  ;;  %v7472_v18 = vld [vmem:[#allocation5 + $0x7f4] sm:$0xf0]  ;;  %v5837_v29 = vld [vmem:[#allocation5 + $0x6e0] sm:$0xf]  ;;  %v7438_v32 = vld [vmem:[#allocation5 + $0x6e4] sm:$0xf0]  ;;  %v8228_v41 = vor.u32 %v7205_v23, %v4931_v24 }
  0x83   : > { %2101 = vmatpush.bf16.msra.mxu2 %v5646_v52  ;;  %v5469_v52 = vld [vmem:[#allocation5 + $0x400] sm:$0xf]  ;;  %v7470_v39 = vld [vmem:[#allocation5 + $0x7e4] sm:$0xf0]  ;;  %v5765_v46 = vld [vmem:[#allocation5 + $0x650] sm:$0xf] }
  0x84   : > { %2115 = vmatpush.bf16.msra.mxu3 %v5710_v55  ;;  %v5533_v55 = vld [vmem:[#allocation5 + $0x480] sm:$0xf]  ;;  %v5470_v10 = vor.u32 %v7346_v54, %v5469_v52  ;;  %v7420_v47 = vld [vmem:[#allocation5 + $0x654] sm:$0xf0]  ;;  %v5893_v52 = vld [vmem:[#allocation5 + $0x750] sm:$0xf] }
  0x85   : > { %2074 = vmatpush.bf16.msra.mxu0 %v5510_v58  ;;  %v5597_v58 = vld [vmem:[#allocation5 + $0x500] sm:$0xf]  ;;  %v5534_v15 = vor.u32 %v7362_v56, %v5533_v55  ;;  %v5957_v54 = vld [vmem:[#allocation5 + $0x7d0] sm:$0xf]  ;;  %v7468_v55 = vld [vmem:[#allocation5 + $0x7d4] sm:$0xf0]  ;;  %v5766_v56 = vor.u32 %v7420_v47, %v5765_v46 }
  0x86   : > { %2088 = vmatpush.bf16.msra.mxu1 %v5574_v62  ;;  %v7424_v62 = vld [vmem:[#allocation5 + $0x674] sm:$0xf0]  ;;  %v5598_v20 = vor.u32 %v7378_v59, %v5597_v58  ;;  %v5901_v33 = vld [vmem:[#allocation5 + $0x760] sm:$0xf]  ;;  %v7414_v24 = vld [vmem:[#allocation5 + $0x624] sm:$0xf0] }
  0x87   : > { %2102 = vmatpush.bf16.msra.mxu2 %v5638_v1  ;;  %v7440_v1 = vld [vmem:[#allocation5 + $0x6f4] sm:$0xf0]  ;;  %v5757_v59 = vld [vmem:[#allocation5 + $0x640] sm:$0xf]  ;;  %v5861_v47 = vld [vmem:[#allocation5 + $0x710] sm:$0xf] }
  0x88   : > { %2116 = vmatpush.bf16.msra.mxu3 %v5702_v5  ;;  %v5670_v5 = vor.u32 %v7396_v51, %v5669_v50  ;;  %v5846_v21 = vor.u32 %v7440_v1, %v5845_v63  ;;  %v7436_v51 = vld [vmem:[#allocation5 + $0x6d4] sm:$0xf0]  ;;  %v5958_v63 = vor.u32 %v7468_v55, %v5957_v54  ;;  %v5885_v1 = vld [vmem:[#allocation5 + $0x740] sm:$0xf]  ;;  %s8909_s30 = scalar_lea.vmem [#allocation8], %s7780_s23  ;;  %p7195_p4 = scmp.ne.s32.totalorder %s8093_s16, 2 }
  0x89   : > { %2075 = vmatpush.bf16.msra.mxu0 %v5502_v9  ;;  %v4921_v9 = vld [vmem:[#allocation2 + $0x20] sm:$0xf]  ;;  %v5741_v23 = vld [vmem:[#allocation5 + $0x620] sm:$0xf] }
  0x8a   : > { %2089 = vmatpush.bf16.msra.mxu1 %v5566_v12  ;;  %v4929_v12 = vld [vmem:[#allocation2 + $0x28] sm:$0xf]  ;;  %v8222_v30 = vor.u32 %v7212_v11, %v4921_v9  ;;  %v7416_v11 = vld [vmem:[#allocation5 + $0x634] sm:$0xf0] }
  0x8b   : > { %2103 = vmatpush.bf16.msra.mxu2 %v5630_v16  ;;  %v5782_v16 = vor.u32 %v7424_v62, %v5781_v61  ;;  %v8224_v35 = vor.u32 %v7213_v13, %v4929_v12  ;;  %v7418_v61 = vld [vmem:[#allocation5 + $0x644] sm:$0xf0]  ;;  %v5821_v62 = vld [vmem:[#allocation5 + $0x6c0] sm:$0xf]  ;;  %v5813_v12 = vld [vmem:[#allocation5 + $0x6b0] sm:$0xf] }
  0x8c   : > { %2117 = vmatpush.bf16.msra.mxu3 %v5694_v19  ;;  %v7204_v19 = vld [vmem:[#allocation2 + $0x24] sm:$0xf]  ;;  %v5758_v6 = vor.u32 %v7418_v61, %v5757_v59  ;;  %v5789_v55 = vld [vmem:[#allocation5 + $0x680] sm:$0xf] }
  0x8d   : > { %2076 = vmatpush.bf16.msra.mxu0 %v5494_v22  ;;  %v4923_v22 = vld [vmem:[#allocation2 + $0x64] sm:$0xf0] }
  0x8e   : > { %2090 = vmatpush.bf16.msra.mxu1 %v5558_v25  ;;  %v5910_v25 = vor.u32 %v7456_v4, %v5909_v3  ;;  %v8226_v37 = vor.u32 %v7204_v19, %v4923_v22  ;;  %v7450_v3 = vld [vmem:[#allocation5 + $0x744] sm:$0xf0]  ;;  %v5949_v4 = vld [vmem:[#allocation5 + $0x7c0] sm:$0xf]  ;;  %v7464_v19 = vld [vmem:[#allocation5 + $0x7b4] sm:$0xf0] }
  0x8f   : > { %2104 = vmatpush.bf16.msra.mxu2 %v5622_v28  ;;  %v7422_v28 = vld [vmem:[#allocation5 + $0x664] sm:$0xf0]  ;;  %v5886_v9 = vor.u32 %v7450_v3, %v5885_v1  ;;  %v5015_v3 = vld [vmem:[#allocation5 + $0x78] sm:$0xf0] }
  0x90   : > { %2118 = vmatpush.bf16.msra.mxu3 %v5686_v31  ;;  %v5974_v31 = vor.u32 %v7472_v18, %v5973_v17  ;;  %v5774_v42 = vor.u32 %v7422_v28, %v5773_v27  ;;  %v7448_v17 = vld [vmem:[#allocation5 + $0x734] sm:$0xf0]  ;;  %v5941_v18 = vld [vmem:[#allocation5 + $0x7b0] sm:$0xf]  ;;  %v7430_v27 = vld [vmem:[#allocation5 + $0x6a4] sm:$0xf0] }
  0x91   : > { %2077 = vmatpush.bf16.msra.mxu0 %v5486_v34  ;;  %v7454_v34 = vld [vmem:[#allocation5 + $0x764] sm:$0xf0]  ;;  %v5869_v28 = vld [vmem:[#allocation5 + $0x720] sm:$0xf] }
  0x92   : > { %2091 = vmatpush.bf16.msra.mxu1 %v5550_v38  ;;  %v5965_v38 = vld [vmem:[#allocation5 + $0x7e0] sm:$0xf]  ;;  %v5902_v45 = vor.u32 %v7454_v34, %v5901_v33  ;;  %v5742_v33 = vor.u32 %v7414_v24, %v5741_v23  ;;  %v5733_v34 = vld [vmem:[#allocation5 + $0x610] sm:$0xf]  ;;  %v7207_v23 = vld [vmem:[#allocation2 + $0x3c] sm:$0xf] }
  0x93   : > { %2105 = vmatpush.bf16.msra.mxu2 %v5614_v43  ;;  %v5838_v43 = vor.u32 %v7438_v32, %v5837_v29  ;;  %v5966_v50 = vor.u32 %v7470_v39, %v5965_v38  ;;  %v7446_v29 = vld [vmem:[#allocation5 + $0x724] sm:$0xf0]  ;;  %v4947_v24 = vld [vmem:[#allocation2 + $0x7c] sm:$0xf0] }
  0x94   : > { %2119 = vmatpush.bf16.msra.mxu3 %v5678_v49  ;;  %v5829_v49 = vld [vmem:[#allocation5 + $0x6d0] sm:$0xf]  ;;  %v7462_v32 = vld [vmem:[#allocation5 + $0x7a4] sm:$0xf0]  ;;  %v5870_v39 = vor.u32 %v7446_v29, %v5869_v28  ;;  %v7229_v29 = vld [vmem:[#allocation5 + $0x64] sm:$0xf] }
  0x95   : > { %2078 = vmatpush.bf16.msra.mxu0 %v5478_v53  ;;  %v7452_v53 = vld [vmem:[#allocation5 + $0x754] sm:$0xf0]  ;;  %v7486_v28 = vld [vmem:[#allocation5 + $0x864] sm:$0xf0] }
  0x96   : > { %2092 = vmatpush.bf16.msra.mxu1 %v5542_v57  ;;  %v5830_v57 = vor.u32 %v7436_v51, %v5829_v49  ;;  %v5894_v58 = vor.u32 %v7452_v53, %v5893_v52  ;;  %v7444_v49 = vld [vmem:[#allocation5 + $0x714] sm:$0xf0]  ;;  %v5725_v52 = vld [vmem:[#allocation5 + $0x600] sm:$0xf]  ;;  %v7410_v53 = vld [vmem:[#allocation5 + $0x604] sm:$0xf0] }
  0x97   : > { %2106 = vmatpush.bf16.msra.mxu2 %v5606_v0  ;;  %v7434_v0 = vld [vmem:[#allocation5 + $0x6c4] sm:$0xf0]  ;;  %v7460_v51 = vld [vmem:[#allocation5 + $0x794] sm:$0xf0]  ;;  %v5862_v61 = vor.u32 %v7444_v49, %v5861_v47  ;;  %v5135_v47 = vld [vmem:[#allocation5 + $0x168] sm:$0xf0] }
  0x98   : > { %2120 = vmatpush.bf16.msra.mxu3 %v5670_v5  ;;  %v7466_v5 = vld [vmem:[#allocation5 + $0x7c4] sm:$0xf0]  ;;  %v5822_v7 = vor.u32 %v7434_v0, %v5821_v62  ;;  %v6037_v62 = vld [vmem:[#allocation5 + $0x870] sm:$0xf]  ;;  %v7231_v0 = vld [vmem:[#allocation5 + $0x74] sm:$0xf] }
  0x99   : > { %2079 = vmatpush.bf16.msra.mxu0 %v5470_v10  ;;  %v5749_v10 = vld [vmem:[#allocation5 + $0x630] sm:$0xf]  ;;  %v5950_v13 = vor.u32 %v7466_v5, %v5949_v4  ;;  %v7247_v4 = vld [vmem:[#allocation5 + $0xf4] sm:$0xf]  ;;  %v5079_v5 = vld [vmem:[#allocation5 + $0xf8] sm:$0xf0] }
  0x9a   : > { %2093 = vmatpush.bf16.msra.mxu1 %v5534_v15  ;;  %v7432_v15 = vld [vmem:[#allocation5 + $0x6b4] sm:$0xf0] }
  0x9b   : > { %2107 = vmatpush.bf16.msra.mxu2 %v5598_v20  ;;  %v5750_v20 = vor.u32 %v7416_v11, %v5749_v10  ;;  %v5726_v10 = vor.u32 %v7410_v53, %v5725_v52  ;;  %v7214_v11 = vld [vmem:[#allocation2 + $0x70] sm:$0xf0]  ;;  %v7484_v52 = vld [vmem:[#allocation5 + $0x854] sm:$0xf0]  ;;  %v7227_v53 = vld [vmem:[#allocation5 + $0x54] sm:$0xf] }
  0x9c   : > { %2121 = vmatpush.bf16.msra.mxu3 %v5662_v26  ;;  %2080 = vmatmul.bf16.vlgmr.msra.gmra.mxu0 %v8222_v30  ;;  %v5942_v26 = vor.u32 %v7464_v19, %v5941_v18  ;;  %v5143_v18 = vld [vmem:[#allocation5 + $0x178] sm:$0xf0]  ;;  %v7206_v19 = vld [vmem:[#allocation2 + $0x34] sm:$0xf] }
  0x9d   : > { %2128 = vmatpush.bf16.msrb.mxu0 %v5782_v16  ;;  %2094 = vmatmul.bf16.vlgmr.msra.gmra.mxu1 %v8226_v37  ;;  %v5877_v16 = vld [vmem:[#allocation5 + $0x730] sm:$0xf] }
  0x9e   : > { %2142 = vmatpush.bf16.msrb.mxu1 %v5846_v21  ;;  %2108 = vmatmul.bf16.vlgmr.msra.gmra.mxu2 %v8224_v35  ;;  %v5814_v21 = vor.u32 %v7432_v15, %v5813_v12  ;;  %v5878_v22 = vor.u32 %v7448_v17, %v5877_v16  ;;  %v4945_v12 = vld [vmem:[#allocation2 + $0x38] sm:$0xf]  ;;  %v7263_v17 = vld [vmem:[#allocation5 + $0x174] sm:$0xf] }
  0x9f   : > { %2156 = vmatpush.bf16.msrb.mxu2 %v5910_v25  ;;  %2122 = vmatmul.bf16.vlgmr.msra.gmra.mxu3 %v8228_v41  ;;  %v5805_v25 = vld [vmem:[#allocation5 + $0x6a0] sm:$0xf] }
  0xa0   : > { %2170 = vmatpush.bf16.msrb.mxu3 %v5974_v31  ;;  %v5933_v31 = vld [vmem:[#allocation5 + $0x7a0] sm:$0xf]  ;;  %v5806_v38 = vor.u32 %v7430_v27, %v5805_v25  ;;  %v5082_v25 = vor.u32 %v7247_v4, %v5079_v5  ;;  %v4991_v4 = vld [vmem:[#allocation5 + $0x48] sm:$0xf0]  ;;  %v7241_v5 = vld [vmem:[#allocation5 + $0xc4] sm:$0xf] }
  0xa1   : > { %2129 = vmatpush.bf16.msrb.mxu0 %v5774_v42  ;;  %v7412_v42 = vld [vmem:[#allocation5 + $0x614] sm:$0xf0]  ;;  %v5934_v46 = vor.u32 %v7462_v32, %v5933_v31  ;;  %v6029_v27 = vld [vmem:[#allocation5 + $0x860] sm:$0xf] }
  0xa2   : > { %2143 = vmatpush.bf16.msrb.mxu1 %v5838_v43  ;;  %v5797_v43 = vld [vmem:[#allocation5 + $0x690] sm:$0xf]  ;;  %v5734_v54 = vor.u32 %v7412_v42, %v5733_v34  ;;  %v7245_v34 = vld [vmem:[#allocation5 + $0xe4] sm:$0xf] }
  0xa3   : > { %2157 = vmatpush.bf16.msrb.mxu2 %v5902_v45  ;;  %v7428_v45 = vld [vmem:[#allocation5 + $0x694] sm:$0xf0] }
  0xa4   : > { %2171 = vmatpush.bf16.msrb.mxu3 %v5966_v50  ;;  %v5925_v50 = vld [vmem:[#allocation5 + $0x790] sm:$0xf]  ;;  %v5798_v59 = vor.u32 %v7428_v45, %v5797_v43  ;;  %v8240_v43 = vor.u32 %v7207_v23, %v4947_v24  ;;  %v6030_v45 = vor.u32 %v7486_v28, %v6029_v27  ;;  %v7255_v23 = vld [vmem:[#allocation5 + $0x134] sm:$0xf]  ;;  %v5111_v24 = vld [vmem:[#allocation5 + $0x138] sm:$0xf0] }
  0xa5   : > { %2130 = vmatpush.bf16.msrb.mxu0 %v5766_v56  ;;  %v7426_v56 = vld [vmem:[#allocation5 + $0x684] sm:$0xf0]  ;;  %v5926_v1 = vor.u32 %v7460_v51, %v5925_v50  ;;  %v6021_v51 = vld [vmem:[#allocation5 + $0x850] sm:$0xf]  ;;  %v5997_v27 = vld [vmem:[#allocation5 + $0x820] sm:$0xf] }
  0xa6   : > { %2144 = vmatpush.bf16.msrb.mxu1 %v5830_v57  ;;  %v5853_v57 = vld [vmem:[#allocation5 + $0x700] sm:$0xf]  ;;  %v5790_v15 = vor.u32 %v7426_v56, %v5789_v55  ;;  %v7243_v55 = vld [vmem:[#allocation5 + $0xd4] sm:$0xf]  ;;  %v5063_v56 = vld [vmem:[#allocation5 + $0xd8] sm:$0xf0] }
  0xa7   : > { %2158 = vmatpush.bf16.msrb.mxu2 %v5894_v58  ;;  %v7442_v58 = vld [vmem:[#allocation5 + $0x704] sm:$0xf0] }
  0xa8   : > { %2172 = vmatpush.bf16.msrb.mxu3 %v5958_v63  ;;  %v7488_v63 = vld [vmem:[#allocation5 + $0x874] sm:$0xf0]  ;;  %v5854_v16 = vor.u32 %v7442_v58, %v5853_v57  ;;  %v6022_v58 = vor.u32 %v7484_v52, %v6021_v51  ;;  %v7478_v28 = vld [vmem:[#allocation5 + $0x824] sm:$0xf0]  ;;  %v5989_v51 = vld [vmem:[#allocation5 + $0x810] sm:$0xf] }
  0xa9   : > { %2131 = vmatpush.bf16.msrb.mxu0 %v5758_v6  ;;  %v5917_v6 = vld [vmem:[#allocation5 + $0x780] sm:$0xf]  ;;  %v7476_v52 = vld [vmem:[#allocation5 + $0x814] sm:$0xf0] }
  0xaa   : > { %2145 = vmatpush.bf16.msrb.mxu1 %v5822_v7  ;;  %v7458_v7 = vld [vmem:[#allocation5 + $0x784] sm:$0xf0] }
  0xab   : > { %2159 = vmatpush.bf16.msrb.mxu2 %v5886_v9  ;;  %v4937_v9 = vld [vmem:[#allocation2 + $0x30] sm:$0xf] }
  0xac   : > { %2173 = vmatpush.bf16.msrb.mxu3 %v5950_v13  ;;  %v7215_v13 = vld [vmem:[#allocation2 + $0x78] sm:$0xf0]  ;;  %v8234_v31 = vor.u32 %v7214_v11, %v4937_v9  ;;  %v5119_v11 = vld [vmem:[#allocation5 + $0x148] sm:$0xf0] }
  0xad   : > { %2132 = vmatpush.bf16.msrb.mxu0 %v5750_v20  ;;  %v6038_v20 = vor.u32 %v7488_v63, %v6037_v62  ;;  %v8236_v32 = vor.u32 %v7215_v13, %v4945_v12  ;;  %v5066_v63 = vor.u32 %v7243_v55, %v5063_v56  ;;  %v7235_v55 = vld [vmem:[#allocation5 + $0x94] sm:$0xf]  ;;  %v5031_v56 = vld [vmem:[#allocation5 + $0x98] sm:$0xf0] }
  0xae   : > { %2146 = vmatpush.bf16.msrb.mxu1 %v5814_v21  ;;  %v5018_v21 = vor.u32 %v7231_v0, %v5015_v3  ;;  %v6013_v0 = vld [vmem:[#allocation5 + $0x840] sm:$0xf]  ;;  %v7225_v3 = vld [vmem:[#allocation5 + $0x44] sm:$0xf] }
  0xaf   : > { %2160 = vmatpush.bf16.msrb.mxu2 %v5878_v22  ;;  %v4939_v22 = vld [vmem:[#allocation2 + $0x74] sm:$0xf0]  ;;  %v4994_v12 = vor.u32 %v7225_v3, %v4991_v4  ;;  %v5034_v3 = vor.u32 %v7235_v55, %v5031_v56  ;;  %v4959_v4 = vld [vmem:[#allocation5 + $0x8] sm:$0xf0]  ;;  %v5191_v55 = vld [vmem:[#allocation5 + $0x1d8] sm:$0xf0] }
  0xb0   : > { %2174 = vmatpush.bf16.msrb.mxu3 %v5942_v26  ;;  %v5918_v26 = vor.u32 %v7458_v7, %v5917_v6  ;;  %v8238_v42 = vor.u32 %v7206_v19, %v4939_v22  ;;  %v5055_v6 = vld [vmem:[#allocation5 + $0xc8] sm:$0xf0]  ;;  %v7239_v19 = vld [vmem:[#allocation5 + $0xb4] sm:$0xf] }
  0xb1   : > { %2133 = vmatpush.bf16.msrb.mxu0 %v5742_v33  ;;  %v5007_v33 = vld [vmem:[#allocation5 + $0x68] sm:$0xf0]  ;;  %v5058_v13 = vor.u32 %v7241_v5, %v5055_v6  ;;  %v7233_v5 = vld [vmem:[#allocation5 + $0x84] sm:$0xf]  ;;  %v7291_v56 = vld [vmem:[#allocation5 + $0x254] sm:$0xf] }
  0xb2   : > { %2147 = vmatpush.bf16.msrb.mxu1 %v5806_v38  ;;  %v5071_v38 = vld [vmem:[#allocation5 + $0xe8] sm:$0xf0]  ;;  %v5010_v49 = vor.u32 %v7229_v29, %v5007_v33  ;;  %v7221_v29 = vld [vmem:[#allocation5 + $0x24] sm:$0xf] }
  0xb3   : > { %2161 = vmatpush.bf16.msrb.mxu2 %v5870_v39  ;;  %v5146_v39 = vor.u32 %v7263_v17, %v5143_v18  ;;  %v5074_v50 = vor.u32 %v7245_v34, %v5071_v38  ;;  %v7223_v17 = vld [vmem:[#allocation5 + $0x34] sm:$0xf]  ;;  %v4983_v18 = vld [vmem:[#allocation5 + $0x38] sm:$0xf0]  ;;  %v4975_v33 = vld [vmem:[#allocation5 + $0x28] sm:$0xf0] }
  0xb4   : > { %2175 = vmatpush.bf16.msrb.mxu3 %v5934_v46  ;;  %v7261_v46 = vld [vmem:[#allocation5 + $0x164] sm:$0xf]  ;;  %v5039_v38 = vld [vmem:[#allocation5 + $0xa8] sm:$0xf0] }
  0xb5   : > { %2134 = vmatpush.bf16.msrb.mxu0 %v5734_v54  ;;  %v4999_v54 = vld [vmem:[#allocation5 + $0x58] sm:$0xf0]  ;;  %v5138_v57 = vor.u32 %v7261_v46, %v5135_v47  ;;  %v7237_v34 = vld [vmem:[#allocation5 + $0xa4] sm:$0xf]  ;;  %v5103_v47 = vld [vmem:[#allocation5 + $0x128] sm:$0xf0] }
  0xb6   : > { %2148 = vmatpush.bf16.msrb.mxu1 %v5798_v59  ;;  %v7259_v59 = vld [vmem:[#allocation5 + $0x154] sm:$0xf]  ;;  %v5002_v62 = vor.u32 %v7227_v53, %v4999_v54  ;;  %v7253_v46 = vld [vmem:[#allocation5 + $0x124] sm:$0xf]  ;;  %v4967_v54 = vld [vmem:[#allocation5 + $0x18] sm:$0xf0] }
  0xb7   : > { %2162 = vmatpush.bf16.msrb.mxu2 %v5862_v61  ;;  %v5127_v61 = vld [vmem:[#allocation5 + $0x158] sm:$0xf0]  ;;  %v7219_v53 = vld [vmem:[#allocation5 + $0x14] sm:$0xf]  ;;  %v5023_v6 = vld [vmem:[#allocation5 + $0x88] sm:$0xf0] }
  0xb8   : > { %2176 = vmatpush.bf16.msrb.mxu3 %v5926_v1  ;;  %v7482_v1 = vld [vmem:[#allocation5 + $0x844] sm:$0xf0]  ;;  %v5130_v7 = vor.u32 %v7259_v59, %v5127_v61  ;;  %v5095_v59 = vld [vmem:[#allocation5 + $0x118] sm:$0xf0]  ;;  %v5990_v61 = vor.u32 %v7476_v52, %v5989_v51 }
  0xb9   : > { %2135 = vmatpush.bf16.msrb.mxu0 %v5726_v10  ;;  %v6014_v9 = vor.u32 %v7482_v1, %v6013_v0  ;;  %v7257_v10 = vld [vmem:[#allocation5 + $0x144] sm:$0xf]  ;;  %v4970_v1 = vor.u32 %v7219_v53, %v4967_v54  ;;  %v7275_v53 = vld [vmem:[#allocation5 + $0x1d4] sm:$0xf] }
  0xba   : > { %2149 = vmatpush.bf16.msrb.mxu1 %v5790_v15  ;;  %v6005_v15 = vld [vmem:[#allocation5 + $0x830] sm:$0xf]  ;;  %v7217_v0 = vld [vmem:[#allocation5 + $0x4] sm:$0xf] }
  0xbb   : > { %2163 = vmatpush.bf16.msrb.mxu2 %v5854_v16  ;;  %v7480_v16 = vld [vmem:[#allocation5 + $0x834] sm:$0xf0] }
  0xbc   : > { %2177 = vmatpush.bf16.msrb.mxu3 %v5918_v26  ;;  %2136 = vmatmul.bf16.vlgmr.msrb.gmra.mxu0 %v8234_v31  ;;  %v6006_v22 = vor.u32 %v7480_v16, %v6005_v15  ;;  %v5335_v15 = vld [vmem:[#allocation5 + $0x2f8] sm:$0xf0] }
  0xbd   : > { %2184 = vmatpush.bf16.msra.mxu0 %v6038_v20  ;;  %2150 = vmatmul.bf16.vlgmr.msrb.gmra.mxu1 %v8238_v42  ;;  %v5047_v20 = vld [vmem:[#allocation5 + $0xb8] sm:$0xf0] }
  0xbe   : > { %2198 = vmatpush.bf16.msra.mxu1 %v5018_v21  ;;  %2164 = vmatmul.bf16.vlgmr.msrb.gmra.mxu2 %v8236_v32  ;;  %v5122_v21 = vor.u32 %v7257_v10, %v5119_v11  ;;  %v5050_v26 = vor.u32 %v7239_v19, %v5047_v20  ;;  %v7295_v10 = vld [vmem:[#allocation5 + $0x274] sm:$0xf]  ;;  %v4953_v19 = vld [vmem:[#allocation2 + $0x40] sm:$0xf]  ;;  %v4962_v20 = vor.u32 %v7217_v0, %v4959_v4 }
  0xbf   : > { %2212 = vmatpush.bf16.msra.mxu2 %v5082_v25  ;;  %2178 = vmatmul.bf16.vlgmr.msrb.gmra.mxu3 %v8240_v43  ;;  %v4986_v25 = vor.u32 %v7223_v17, %v4983_v18  ;;  %v7249_v17 = vld [vmem:[#allocation5 + $0x104] sm:$0xf]  ;;  %v5087_v18 = vld [vmem:[#allocation5 + $0x108] sm:$0xf0]  ;;  %v5194_v0 = vor.u32 %v7275_v53, %v5191_v55  ;;  %v5159_v53 = vld [vmem:[#allocation5 + $0x198] sm:$0xf0] }
  0xc0   : > { %2226 = vmatpush.bf16.msra.mxu3 %v5146_v39  ;;  %v5114_v39 = vor.u32 %v7255_v23, %v5111_v24  ;;  %v7327_v23 = vld [vmem:[#allocation5 + $0x374] sm:$0xf]  ;;  %v5399_v24 = vld [vmem:[#allocation5 + $0x378] sm:$0xf0] }
  0xc1   : > { %2185 = vmatpush.bf16.msra.mxu0 %v6030_v45  ;;  %v5998_v45 = vor.u32 %v7478_v28, %v5997_v27  ;;  %v7277_v27 = vld [vmem:[#allocation5 + $0x1e4] sm:$0xf]  ;;  %v5223_v55 = vld [vmem:[#allocation5 + $0x218] sm:$0xf0] }
  0xc2   : > { %2199 = vmatpush.bf16.msra.mxu1 %v5010_v49  ;;  %v4978_v49 = vor.u32 %v7221_v29, %v4975_v33  ;;  %v5090_v29 = vor.u32 %v7249_v17, %v5087_v18  ;;  %v5199_v33 = vld [vmem:[#allocation5 + $0x1e8] sm:$0xf0]  ;;  %v5175_v17 = vld [vmem:[#allocation5 + $0x1b8] sm:$0xf0]  ;;  %v7287_v18 = vld [vmem:[#allocation5 + $0x234] sm:$0xf] }
  0xc3   : > { %2213 = vmatpush.bf16.msra.mxu2 %v5074_v50  ;;  %v5042_v50 = vor.u32 %v7237_v34, %v5039_v38  ;;  %v7293_v34 = vld [vmem:[#allocation5 + $0x264] sm:$0xf]  ;;  %v5263_v38 = vld [vmem:[#allocation5 + $0x268] sm:$0xf0]  ;;  %v5202_v51 = vor.u32 %v7277_v27, %v5199_v33 }
  0xc4   : > { %2227 = vmatpush.bf16.msra.mxu3 %v5138_v57  ;;  %v5106_v57 = vor.u32 %v7253_v46, %v5103_v47  ;;  %v7309_v46 = vld [vmem:[#allocation5 + $0x2e4] sm:$0xf]  ;;  %v5327_v47 = vld [vmem:[#allocation5 + $0x2e8] sm:$0xf0]  ;;  %v5266_v52 = vor.u32 %v7293_v34, %v5263_v38 }
  0xc5   : > { %2186 = vmatpush.bf16.msra.mxu0 %v6022_v58  ;;  %v7251_v58 = vld [vmem:[#allocation5 + $0x114] sm:$0xf]  ;;  %v5330_v54 = vor.u32 %v7309_v46, %v5327_v47  ;;  %v5231_v33 = vld [vmem:[#allocation5 + $0x228] sm:$0xf0]  ;;  %v7301_v38 = vld [vmem:[#allocation5 + $0x2a4] sm:$0xf] }
  0xc6   : > { %2200 = vmatpush.bf16.msra.mxu1 %v5002_v62  ;;  %v5981_v62 = vld [vmem:[#allocation5 + $0x800] sm:$0xf]  ;;  %v5098_v11 = vor.u32 %v7251_v58, %v5095_v59  ;;  %v7307_v59 = vld [vmem:[#allocation5 + $0x2d4] sm:$0xf]  ;;  %v7317_v46 = vld [vmem:[#allocation5 + $0x324] sm:$0xf] }
  0xc7   : > { %2214 = vmatpush.bf16.msra.mxu2 %v5066_v63  ;;  %v7474_v63 = vld [vmem:[#allocation5 + $0x804] sm:$0xf0]  ;;  %v5359_v47 = vld [vmem:[#allocation5 + $0x328] sm:$0xf0] }
  0xc8   : > { %2228 = vmatpush.bf16.msra.mxu3 %v5130_v7  ;;  %v7279_v7 = vld [vmem:[#allocation5 + $0x1f4] sm:$0xf]  ;;  %v5982_v16 = vor.u32 %v7474_v63, %v5981_v62  ;;  %v5383_v63 = vld [vmem:[#allocation5 + $0x358] sm:$0xf0] }
  0xc9   : > { %2187 = vmatpush.bf16.msra.mxu0 %v6014_v9  ;;  %v5207_v9 = vld [vmem:[#allocation5 + $0x1f8] sm:$0xf0]  ;;  %v7323_v62 = vld [vmem:[#allocation5 + $0x354] sm:$0xf] }
  0xca   : > { %2201 = vmatpush.bf16.msra.mxu1 %v4994_v12  ;;  %v5271_v12 = vld [vmem:[#allocation5 + $0x278] sm:$0xf0] }
  0xcb   : > { %2215 = vmatpush.bf16.msra.mxu2 %v5058_v13  ;;  %v7311_v13 = vld [vmem:[#allocation5 + $0x2f4] sm:$0xf] }
  0xcc   : > { %2229 = vmatpush.bf16.msra.mxu3 %v5122_v21  ;;  %v5026_v21 = vor.u32 %v7233_v5, %v5023_v6  ;;  %v5338_v28 = vor.u32 %v7311_v13, %v5335_v15  ;;  %v5183_v5 = vld [vmem:[#allocation5 + $0x1c8] sm:$0xf0]  ;;  %v7289_v6 = vld [vmem:[#allocation5 + $0x244] sm:$0xf]  ;;  %v7271_v15 = vld [vmem:[#allocation5 + $0x1b4] sm:$0xf] }
  0xcd   : > { %2188 = vmatpush.bf16.msra.mxu0 %v6006_v22  ;;  %v7216_v22 = vld [vmem:[#allocation2 + $0x80] sm:$0xf0] }
  0xce   : > { %2202 = vmatpush.bf16.msra.mxu1 %v4986_v25  ;;  %v5210_v25 = vor.u32 %v7279_v7, %v5207_v9  ;;  %v5247_v7 = vld [vmem:[#allocation5 + $0x248] sm:$0xf0]  ;;  %v5386_v9 = vor.u32 %v7323_v62, %v5383_v63 }
  0xcf   : > { %2216 = vmatpush.bf16.msra.mxu2 %v5050_v26  ;;  %v5274_v26 = vor.u32 %v7295_v10, %v5271_v12  ;;  %v7305_v10 = vld [vmem:[#allocation5 + $0x2c4] sm:$0xf]  ;;  %v5250_v13 = vor.u32 %v7289_v6, %v5247_v7  ;;  %v5279_v7 = vld [vmem:[#allocation5 + $0x288] sm:$0xf0] }
  0xd0   : > { %2230 = vmatpush.bf16.msra.mxu3 %v5114_v39  ;;  %v8246_v39 = vor.u32 %v7216_v22, %v4953_v19  ;;  %v7321_v12 = vld [vmem:[#allocation5 + $0x344] sm:$0xf]  ;;  %v5239_v19 = vld [vmem:[#allocation5 + $0x238] sm:$0xf0]  ;;  %v7319_v22 = vld [vmem:[#allocation5 + $0x334] sm:$0xf] }
  0xd1   : > { %2189 = vmatpush.bf16.msra.mxu0 %v5998_v45  ;;  %v5402_v45 = vor.u32 %v7327_v23, %v5399_v24  ;;  %v5367_v23 = vld [vmem:[#allocation5 + $0x338] sm:$0xf0]  ;;  %v5178_v24 = vor.u32 %v7271_v15, %v5175_v17  ;;  %v7297_v6 = vld [vmem:[#allocation5 + $0x284] sm:$0xf] }
  0xd2   : > { %2203 = vmatpush.bf16.msra.mxu1 %v4978_v49  ;;  %v7325_v49 = vld [vmem:[#allocation5 + $0x364] sm:$0xf]  ;;  %v5370_v34 = vor.u32 %v7319_v22, %v5367_v23 }
  0xd3   : > { %2217 = vmatpush.bf16.msra.mxu2 %v5042_v50  ;;  %v5391_v50 = vld [vmem:[#allocation5 + $0x368] sm:$0xf0]  ;;  %v7313_v17 = vld [vmem:[#allocation5 + $0x304] sm:$0xf] }
  0xd4   : > { %2231 = vmatpush.bf16.msra.mxu3 %v5106_v57  ;;  %v5255_v57 = vld [vmem:[#allocation5 + $0x258] sm:$0xf0]  ;;  %v5394_v58 = vor.u32 %v7325_v49, %v5391_v50 }
  0xd5   : > { %2190 = vmatpush.bf16.msra.mxu0 %v5990_v61  ;;  %v5319_v61 = vld [vmem:[#allocation5 + $0x2d8] sm:$0xf0] }
  0xd6   : > { %2204 = vmatpush.bf16.msra.mxu1 %v4970_v1  ;;  %v5258_v1 = vor.u32 %v7291_v56, %v5255_v57  ;;  %v5322_v4 = vor.u32 %v7307_v59, %v5319_v61  ;;  %v5362_v56 = vor.u32 %v7317_v46, %v5359_v47  ;;  %v7299_v57 = vld [vmem:[#allocation5 + $0x294] sm:$0xf]  ;;  %v5351_v61 = vld [vmem:[#allocation5 + $0x318] sm:$0xf0]  ;;  %v5647_v46 = vld [vmem:[#allocation5 + $0x568] sm:$0xf0] }
  0xd7   : > { %2218 = vmatpush.bf16.msra.mxu2 %v5034_v3  ;;  %v7273_v3 = vld [vmem:[#allocation5 + $0x1c4] sm:$0xf]  ;;  %v7315_v59 = vld [vmem:[#allocation5 + $0x314] sm:$0xf] }
  0xd8   : > { %2232 = vmatpush.bf16.msra.mxu3 %v5098_v11  ;;  %v5311_v11 = vld [vmem:[#allocation5 + $0x2c8] sm:$0xf0] }
  0xd9   : > { %2191 = vmatpush.bf16.msra.mxu0 %v5982_v16  ;;  %v5314_v16 = vor.u32 %v7305_v10, %v5311_v11  ;;  %v7343_v10 = vld [vmem:[#allocation5 + $0x3f4] sm:$0xf]  ;;  %v5463_v11 = vld [vmem:[#allocation5 + $0x3f8] sm:$0xf0] }
  0xda   : > { %2205 = vmatpush.bf16.msra.mxu1 %v4962_v20 }
  0xdb   : > { %2219 = vmatpush.bf16.msra.mxu2 %v5026_v21  ;;  %v7303_v21 = vld [vmem:[#allocation5 + $0x2b4] sm:$0xf] }
  0xdc   : > { %2233 = vmatpush.bf16.msra.mxu3 %v5090_v29  ;;  %2192 = vmatmul.bf16.vlgmr.msra.gmra.mxu0 %v8246_v39  ;;  %v7285_v29 = vld [vmem:[#allocation5 + $0x224] sm:$0xf] }
  0xdd   : > { %2240 = vmatpush.bf16.msrb.mxu0 %v5210_v25  ;;  %2206 = vmatmul.bf16.vlgmr.msra.gmra.mxu1 %v8198_v60  ;;  %v5186_v60 = vor.u32 %v7273_v3, %v5183_v5  ;;  %v5242_v25 = vor.u32 %v7287_v18, %v5239_v19  ;;  %v5234_v50 = vor.u32 %v7285_v29, %v5231_v33  ;;  %v7281_v3 = vld [vmem:[#allocation5 + $0x204] sm:$0xf]  ;;  %v5215_v5 = vld [vmem:[#allocation5 + $0x208] sm:$0xf0] }
  0xde   : > { %2254 = vmatpush.bf16.msrb.mxu1 %v5274_v26  ;;  %2220 = vmatmul.bf16.vlgmr.msra.gmra.mxu2 %v8204_v8  ;;  %v5375_v8 = vld [vmem:[#allocation5 + $0x348] sm:$0xf0]  ;;  %v7269_v26 = vld [vmem:[#allocation5 + $0x1a4] sm:$0xf]  ;;  %v5282_v19 = vor.u32 %v7297_v6, %v5279_v7 }
  0xdf   : > { %2268 = vmatpush.bf16.msrb.mxu2 %v5338_v28  ;;  %2234 = vmatmul.bf16.vlgmr.msra.gmra.mxu3 %v8200_v2  ;;  %v5378_v20 = vor.u32 %v7321_v12, %v5375_v8  ;;  %v5303_v2 = vld [vmem:[#allocation5 + $0x2b8] sm:$0xf0]  ;;  %v5167_v28 = vld [vmem:[#allocation5 + $0x1a8] sm:$0xf0]  ;;  %v7359_v12 = vld [vmem:[#allocation5 + $0x474] sm:$0xf] }
  0xe0   : > { %2282 = vmatpush.bf16.msrb.mxu3 %v5402_v45  ;;  %v5306_v27 = vor.u32 %v7303_v21, %v5303_v2  ;;  %v5295_v45 = vld [vmem:[#allocation5 + $0x2a8] sm:$0xf0]  ;;  %v5170_v49 = vor.u32 %v7269_v26, %v5167_v28  ;;  %v5527_v8 = vld [vmem:[#allocation5 + $0x478] sm:$0xf0]  ;;  %v7391_v21 = vld [vmem:[#allocation5 + $0x574] sm:$0xf] }
  0xe1   : > { %2241 = vmatpush.bf16.msrb.mxu0 %v5202_v51  ;;  %v7267_v51 = vld [vmem:[#allocation5 + $0x194] sm:$0xf]  ;;  %v5343_v18 = vld [vmem:[#allocation5 + $0x308] sm:$0xf0]  ;;  %v5655_v2 = vld [vmem:[#allocation5 + $0x578] sm:$0xf0]  ;;  %v5530_v22 = vor.u32 %v7359_v12, %v5527_v8 }
  0xe2   : > { %2255 = vmatpush.bf16.msrb.mxu1 %v5266_v52  ;;  %v5298_v52 = vor.u32 %v7301_v38, %v5295_v45  ;;  %v5162_v62 = vor.u32 %v7267_v51, %v5159_v53  ;;  %v5346_v26 = vor.u32 %v7313_v17, %v5343_v18  ;;  %v5519_v28 = vld [vmem:[#allocation5 + $0x468] sm:$0xf0]  ;;  %v5658_v29 = vor.u32 %v7391_v21, %v5655_v2  ;;  %v7373_v33 = vld [vmem:[#allocation5 + $0x4e4] sm:$0xf]  ;;  %v5511_v53 = vld [vmem:[#allocation5 + $0x458] sm:$0xf0] }
  0xe3   : > { %2269 = vmatpush.bf16.msrb.mxu2 %v5330_v54  ;;  %v7283_v54 = vld [vmem:[#allocation5 + $0x214] sm:$0xf]  ;;  %v7389_v45 = vld [vmem:[#allocation5 + $0x564] sm:$0xf]  ;;  %v5631_v6 = vld [vmem:[#allocation5 + $0x548] sm:$0xf0] }
  0xe4   : > { %2283 = vmatpush.bf16.msrb.mxu3 %v5394_v58  ;;  %v5287_v58 = vld [vmem:[#allocation5 + $0x298] sm:$0xf0]  ;;  %v5226_v63 = vor.u32 %v7283_v54, %v5223_v55  ;;  %v5650_v54 = vor.u32 %v7389_v45, %v5647_v46  ;;  %v7371_v55 = vld [vmem:[#allocation5 + $0x4d4] sm:$0xf]  ;;  %v7349_v2 = vld [vmem:[#allocation5 + $0x424] sm:$0xf] }
  0xe5   : > { %2242 = vmatpush.bf16.msrb.mxu0 %v5194_v0  ;;  %v7265_v0 = vld [vmem:[#allocation5 + $0x184] sm:$0xf]  ;;  %v5495_v12 = vld [vmem:[#allocation5 + $0x438] sm:$0xf0]  ;;  %v7347_v45 = vld [vmem:[#allocation5 + $0x414] sm:$0xf] }
  0xe6   : > { %2256 = vmatpush.bf16.msrb.mxu1 %v5258_v1  ;;  %v5151_v1 = vld [vmem:[#allocation5 + $0x188] sm:$0xf0]  ;;  %v5623_v17 = vld [vmem:[#allocation5 + $0x538] sm:$0xf0] }
  0xe7   : > { %2270 = vmatpush.bf16.msrb.mxu2 %v5322_v4  ;;  %v5290_v4 = vor.u32 %v7299_v57, %v5287_v58  ;;  %v5154_v15 = vor.u32 %v7265_v0, %v5151_v1  ;;  %v7387_v58 = vld [vmem:[#allocation5 + $0x554] sm:$0xf]  ;;  %v7353_v0 = vld [vmem:[#allocation5 + $0x444] sm:$0xf]  ;;  %v5479_v46 = vld [vmem:[#allocation5 + $0x418] sm:$0xf0] }
  0xe8   : > { %2284 = vmatpush.bf16.msrb.mxu3 %v5386_v9  ;;  %v5354_v9 = vor.u32 %v7315_v59, %v5351_v61  ;;  %v5639_v59 = vld [vmem:[#allocation5 + $0x558] sm:$0xf0] }
  0xe9   : > { %2243 = vmatpush.bf16.msrb.mxu0 %v5186_v60  ;;  %v7375_v60 = vld [vmem:[#allocation5 + $0x4f4] sm:$0xf]  ;;  %v5642_v1 = vor.u32 %v7387_v58, %v5639_v59  ;;  %v5471_v58 = vld [vmem:[#allocation5 + $0x408] sm:$0xf0]  ;;  %v7361_v59 = vld [vmem:[#allocation5 + $0x484] sm:$0xf] }
  0xea   : > { %2257 = vmatpush.bf16.msrb.mxu1 %v5250_v13  ;;  %v5591_v13 = vld [vmem:[#allocation5 + $0x4f8] sm:$0xf0] }
  0xeb   : > { %2271 = vmatpush.bf16.msrb.mxu2 %v5314_v16  ;;  %v5218_v16 = vor.u32 %v7281_v3, %v5215_v5  ;;  %v5594_v23 = vor.u32 %v7375_v60, %v5591_v13  ;;  %v7369_v3 = vld [vmem:[#allocation5 + $0x4c4] sm:$0xf]  ;;  %v7367_v60 = vld [vmem:[#allocation5 + $0x4b4] sm:$0xf]  ;;  %v5559_v13 = vld [vmem:[#allocation5 + $0x4b8] sm:$0xf0] }
  0xec   : > { %2285 = vmatpush.bf16.msrb.mxu3 %v5378_v20  ;;  %v5466_v20 = vor.u32 %v7343_v10, %v5463_v11  ;;  %v7385_v5 = vld [vmem:[#allocation5 + $0x544] sm:$0xf]  ;;  %v7351_v11 = vld [vmem:[#allocation5 + $0x434] sm:$0xf]  ;;  %v5562_v21 = vor.u32 %v7367_v60, %v5559_v13 }
  0xed   : > { %2244 = vmatpush.bf16.msrb.mxu0 %v5178_v24  ;;  %v7341_v24 = vld [vmem:[#allocation5 + $0x3e4] sm:$0xf]  ;;  %v5634_v8 = vor.u32 %v7385_v5, %v5631_v6  ;;  %v5498_v18 = vor.u32 %v7351_v11, %v5495_v12  ;;  %v5847_v5 = vld [vmem:[#allocation5 + $0x6f8] sm:$0xf0] }
  0xee   : > { %2258 = vmatpush.bf16.msrb.mxu1 %v5242_v25  ;;  %v5455_v25 = vld [vmem:[#allocation5 + $0x3e8] sm:$0xf0]  ;;  %v7377_v6 = vld [vmem:[#allocation5 + $0x504] sm:$0xf]  ;;  %v5911_v11 = vld [vmem:[#allocation5 + $0x778] sm:$0xf0] }
  0xef   : > { %2272 = vmatpush.bf16.msrb.mxu2 %v5306_v27  ;;  %v7357_v27 = vld [vmem:[#allocation5 + $0x464] sm:$0xf]  ;;  %v5458_v38 = vor.u32 %v7341_v24, %v5455_v25  ;;  %v5551_v25 = vld [vmem:[#allocation5 + $0x4a8] sm:$0xf0] }
  0xf0   : > { %2286 = vmatpush.bf16.msrb.mxu3 %v5370_v34  ;;  %v5583_v34 = vld [vmem:[#allocation5 + $0x4e8] sm:$0xf0]  ;;  %v5522_v47 = vor.u32 %v7357_v27, %v5519_v28  ;;  %v7365_v24 = vld [vmem:[#allocation5 + $0x4a4] sm:$0xf] }
  0xf1   : > { %2245 = vmatpush.bf16.msrb.mxu0 %v5170_v49  ;;  %v7339_v49 = vld [vmem:[#allocation5 + $0x3d4] sm:$0xf]  ;;  %v5586_v51 = vor.u32 %v7373_v33, %v5583_v34  ;;  %v7381_v27 = vld [vmem:[#allocation5 + $0x524] sm:$0xf]  ;;  %v5615_v28 = vld [vmem:[#allocation5 + $0x528] sm:$0xf0] }
  0xf2   : > { %2259 = vmatpush.bf16.msrb.mxu1 %v5234_v50  ;;  %v5447_v50 = vld [vmem:[#allocation5 + $0x3d8] sm:$0xf0]  ;;  %v7331_v33 = vld [vmem:[#allocation5 + $0x394] sm:$0xf] }
  0xf3   : > { %2273 = vmatpush.bf16.msrb.mxu2 %v5298_v52  ;;  %v7355_v52 = vld [vmem:[#allocation5 + $0x454] sm:$0xf]  ;;  %v5450_v57 = vor.u32 %v7339_v49, %v5447_v50  ;;  %v5415_v34 = vld [vmem:[#allocation5 + $0x398] sm:$0xf0] }
  0xf4   : > { %2287 = vmatpush.bf16.msrb.mxu3 %v5362_v56  ;;  %v5575_v56 = vld [vmem:[#allocation5 + $0x4d8] sm:$0xf0]  ;;  %v5514_v61 = vor.u32 %v7355_v52, %v5511_v53  ;;  %v7363_v49 = vld [vmem:[#allocation5 + $0x494] sm:$0xf]  ;;  %v5418_v52 = vor.u32 %v7331_v33, %v5415_v34  ;;  %v8260_v33 = vpop.f32.mrf.mxu2 }
  0xf5   : > { %2246 = vmatpush.bf16.msrb.mxu0 %v5162_v62  ;;  %v5439_v62 = vld [vmem:[#allocation5 + $0x3c8] sm:$0xf0]  ;;  %v5543_v50 = vld [vmem:[#allocation5 + $0x498] sm:$0xf0] }
  0xf6   : > { %2260 = vmatpush.bf16.msrb.mxu1 %v5226_v63  ;;  %v5578_v63 = vor.u32 %v7371_v55, %v5575_v56  ;;  %v5607_v53 = vld [vmem:[#allocation5 + $0x518] sm:$0xf0]  ;;  %v5407_v55 = vld [vmem:[#allocation5 + $0x388] sm:$0xf0]  ;;  %v5482_v56 = vor.u32 %v7347_v45, %v5479_v46  ;;  %v7435_v45 = vld [vmem:[#allocation5 + $0x6d4] sm:$0xf] }
  0xf7   : > { %2274 = vmatpush.bf16.msrb.mxu2 %v5290_v4  ;;  %v5567_v4 = vld [vmem:[#allocation5 + $0x4c8] sm:$0xf0]  ;;  %v5831_v46 = vld [vmem:[#allocation5 + $0x6d8] sm:$0xf0] }
  0xf8   : > { %2288 = vmatpush.bf16.msrb.mxu3 %v5354_v9  ;;  %v7335_v9 = vld [vmem:[#allocation5 + $0x3b4] sm:$0xf]  ;;  %v5570_v10 = vor.u32 %v7369_v3, %v5567_v4  ;;  %v8256_v4 = vpop.f32.mrf.mxu0 }
  0xf9   : > { %2247 = vmatpush.bf16.msrb.mxu0 %v5154_v15  ;;  %v7439_v3 = vld [vmem:[#allocation5 + $0x6f4] sm:$0xf] }
  0xfa   : > { %2261 = vmatpush.bf16.msrb.mxu1 %v5218_v16  ;;  %v7383_v16 = vld [vmem:[#allocation5 + $0x534] sm:$0xf]  ;;  %v5850_v60 = vor.u32 %v7439_v3, %v5847_v5 }
  0xfb   : > { %2275 = vmatpush.bf16.msrb.mxu2 %v5282_v19  ;;  %v7333_v19 = vld [vmem:[#allocation5 + $0x3a4] sm:$0xf]  ;;  %v7431_v5 = vld [vmem:[#allocation5 + $0x6b4] sm:$0xf] }
  0xfc   : > { %2289 = vmatpush.bf16.msrb.mxu3 %v5346_v26  ;;  %2248 = vmatmul.bf16.vlgmr.msrb.gmra.mxu0 %v8206_v14  ;;  %v7337_v14 = vld [vmem:[#allocation5 + $0x3c4] sm:$0xf] }
  0xfd   : > { %2296 = vmatpush.bf16.msra.mxu0 %v5466_v20  ;;  %2262 = vmatmul.bf16.vlgmr.msrb.gmra.mxu1 %v8210_v36  ;;  %v5442_v36 = vor.u32 %v7337_v14, %v5439_v62  ;;  %v5423_v20 = vld [vmem:[#allocation5 + $0x3a8] sm:$0xf0]  ;;  %v7407_v62 = vld [vmem:[#allocation5 + $0x5f4] sm:$0xf] }
  0xfe   : > { %2310 = vmatpush.bf16.msra.mxu1 %v5530_v22  ;;  %2276 = vmatmul.bf16.vlgmr.msrb.gmra.mxu2 %v8214_v44  ;;  %v5503_v44 = vld [vmem:[#allocation5 + $0x448] sm:$0xf0]  ;;  %v5426_v26 = vor.u32 %v7333_v19, %v5423_v20  ;;  %v7437_v20 = vld [vmem:[#allocation5 + $0x6e4] sm:$0xf] }
  0xff   : > { %2324 = vmatpush.bf16.msra.mxu2 %v5594_v23  ;;  %2290 = vmatmul.bf16.vlgmr.msrb.gmra.mxu3 %v8212_v40  ;;  %v5506_v7 = vor.u32 %v7353_v0, %v5503_v44  ;;  %v5431_v40 = vld [vmem:[#allocation5 + $0x3b8] sm:$0xf0]  ;;  %v5487_v22 = vld [vmem:[#allocation5 + $0x428] sm:$0xf0]  ;;  %v5626_v23 = vor.u32 %v7383_v16, %v5623_v17  ;;  %v7423_v44 = vld [vmem:[#allocation5 + $0x674] sm:$0xf] }
 0x100   : > { %2338 = vmatpush.bf16.msra.mxu3 %v5658_v29  ;;  %v5434_v15 = vor.u32 %v7335_v9, %v5431_v40  ;;  %v5490_v29 = vor.u32 %v7349_v2, %v5487_v22  ;;  %v5535_v14 = vld [vmem:[#allocation5 + $0x488] sm:$0xf0]  ;;  %v7421_v17 = vld [vmem:[#allocation5 + $0x664] sm:$0xf] }
 0x101   : > { %2297 = vmatpush.bf16.msra.mxu0 %v5458_v38  ;;  %v5554_v38 = vor.u32 %v7365_v24, %v5551_v25  ;;  %v5538_v12 = vor.u32 %v7361_v59, %v5535_v14  ;;  %v5711_v16 = vld [vmem:[#allocation5 + $0x5e8] sm:$0xf0]  ;;  %v7453_v2 = vld [vmem:[#allocation5 + $0x764] sm:$0xf] }
 0x102   : > { %2311 = vmatpush.bf16.msra.mxu1 %v5522_v47  ;;  %v5618_v47 = vor.u32 %v7381_v27, %v5615_v28  ;;  %v5775_v19 = vld [vmem:[#allocation5 + $0x668] sm:$0xf0]  ;;  %v7403_v27 = vld [vmem:[#allocation5 + $0x5d4] sm:$0xf]  ;;  %v5703_v28 = vld [vmem:[#allocation5 + $0x5d8] sm:$0xf0] }
 0x103   : > { %2325 = vmatpush.bf16.msra.mxu2 %v5586_v51  ;;  %v7379_v51 = vld [vmem:[#allocation5 + $0x514] sm:$0xf]  ;;  %v5903_v22 = vld [vmem:[#allocation5 + $0x768] sm:$0xf0]  ;;  %v5778_v25 = vor.u32 %v7421_v17, %v5775_v19  ;;  %v7449_v59 = vld [vmem:[#allocation5 + $0x744] sm:$0xf] }
 0x104   : > { %2339 = vmatpush.bf16.msra.mxu3 %v5650_v54  ;;  %v7329_v54 = vld [vmem:[#allocation5 + $0x384] sm:$0xf]  ;;  %v5610_v0 = vor.u32 %v7379_v51, %v5607_v53  ;;  %v5906_v34 = vor.u32 %v7453_v2, %v5903_v22  ;;  %v5706_v51 = vor.u32 %v7403_v27, %v5703_v28  ;;  %v5743_v17 = vld [vmem:[#allocation5 + $0x628] sm:$0xf0]  ;;  %v5671_v27 = vld [vmem:[#allocation5 + $0x598] sm:$0xf0] }
 0x105   : > { %2298 = vmatpush.bf16.msra.mxu0 %v5450_v57  ;;  %v7345_v57 = vld [vmem:[#allocation5 + $0x404] sm:$0xf]  ;;  %v5807_v19 = vld [vmem:[#allocation5 + $0x6a8] sm:$0xf0]  ;;  %v7411_v28 = vld [vmem:[#allocation5 + $0x614] sm:$0xf] }
 0x106   : > { %2312 = vmatpush.bf16.msra.mxu1 %v5514_v61  ;;  %v5546_v61 = vor.u32 %v7363_v49, %v5543_v50  ;;  %v5474_v9 = vor.u32 %v7345_v57, %v5471_v58  ;;  %v5895_v49 = vld [vmem:[#allocation5 + $0x758] sm:$0xf0]  ;;  %v8265_v50 = vpop.f32.mrf.mxu0  ;;  %v7401_v53 = vld [vmem:[#allocation5 + $0x5c4] sm:$0xf]  ;;  %v5823_v58 = vld [vmem:[#allocation5 + $0x6c8] sm:$0xf0] }
 0x107   : > { %2326 = vmatpush.bf16.msra.mxu2 %v5578_v63  ;;  %v5719_v63 = vld [vmem:[#allocation5 + $0x5f8] sm:$0xf0]  ;;  %v7433_v57 = vld [vmem:[#allocation5 + $0x6c4] sm:$0xf] }
 0x108   : > { %2340 = vmatpush.bf16.msra.mxu3 %v5642_v1  ;;  %v5783_v1 = vld [vmem:[#allocation5 + $0x678] sm:$0xf0]  ;;  %v5722_v40 = vor.u32 %v7407_v62, %v5719_v63  ;;  %v5826_v62 = vor.u32 %v7433_v57, %v5823_v58  ;;  %v7399_v63 = vld [vmem:[#allocation5 + $0x5b4] sm:$0xf] }
 0x109   : > { %2299 = vmatpush.bf16.msra.mxu0 %v5442_v36  ;;  %v5410_v36 = vor.u32 %v7329_v54, %v5407_v55  ;;  %v5695_v54 = vld [vmem:[#allocation5 + $0x5c8] sm:$0xf0]  ;;  %v7417_v55 = vld [vmem:[#allocation5 + $0x644] sm:$0xf] }
 0x10a   : > { %2313 = vmatpush.bf16.msra.mxu1 %v5506_v7  ;;  %v5599_v7 = vld [vmem:[#allocation5 + $0x508] sm:$0xf0] }
 0x10b   : > { %2327 = vmatpush.bf16.msra.mxu2 %v5570_v10  ;;  %v7455_v10 = vld [vmem:[#allocation5 + $0x774] sm:$0xf]  ;;  %v5602_v13 = vor.u32 %v7377_v6, %v5599_v7  ;;  %v5815_v6 = vld [vmem:[#allocation5 + $0x6b8] sm:$0xf0] }
 0x10c   : > { %2341 = vmatpush.bf16.msra.mxu3 %v5634_v8  ;;  %v5786_v8 = vor.u32 %v7423_v44, %v5783_v1  ;;  %v7415_v44 = vld [vmem:[#allocation5 + $0x634] sm:$0xf] }
 0x10d   : > { %2300 = vmatpush.bf16.msra.mxu0 %v5434_v15  ;;  %v7405_v15 = vld [vmem:[#allocation5 + $0x5e4] sm:$0xf]  ;;  %v7447_v7 = vld [vmem:[#allocation5 + $0x734] sm:$0xf] }
 0x10e   : > { %2314 = vmatpush.bf16.msra.mxu1 %v5498_v18  ;;  %v5914_v18 = vor.u32 %v7455_v10, %v5911_v11  ;;  %v5714_v24 = vor.u32 %v7405_v15, %v5711_v16  ;;  %v8274_v15 = vpop.f32.mrf.mxu0 }
 0x10f   : > { %2328 = vmatpush.bf16.msra.mxu2 %v5562_v21  ;;  %v5839_v21 = vld [vmem:[#allocation5 + $0x6e8] sm:$0xf0] }
 0x110   : > { %2342 = vmatpush.bf16.msra.mxu3 %v5626_v23  ;;  %v8258_v23 = vpop.f32.mrf.mxu1 }
 0x111   : > { %2301 = vmatpush.bf16.msra.mxu0 %v5426_v26  ;;  %v5842_v26 = vor.u32 %v7437_v20, %v5839_v21  ;;  %v7445_v20 = vld [vmem:[#allocation5 + $0x724] sm:$0xf]  ;;  %v5871_v21 = vld [vmem:[#allocation5 + $0x728] sm:$0xf0] }
 0x112   : > { %2315 = vmatpush.bf16.msra.mxu1 %v5490_v29  ;;  %v7419_v29 = vld [vmem:[#allocation5 + $0x654] sm:$0xf] }
 0x113   : > { %2329 = vmatpush.bf16.msra.mxu2 %v5554_v38  ;;  %v5767_v38 = vld [vmem:[#allocation5 + $0x658] sm:$0xf0] }
 0x114   : > { %2343 = vmatpush.bf16.msra.mxu3 %v5618_v47  ;;  %v7451_v47 = vld [vmem:[#allocation5 + $0x754] sm:$0xf] }
 0x115   : > { %2302 = vmatpush.bf16.msra.mxu0 %v5418_v52  ;;  %v5834_v52 = vor.u32 %v7435_v45, %v5831_v46  ;;  %v5799_v45 = vld [vmem:[#allocation5 + $0x698] sm:$0xf0]  ;;  %v1970_v46 = vadd.f32 0.0001, %v8256_v4  ;;  %v5791_v4 = vld [vmem:[#allocation5 + $0x688] sm:$0xf0] }
 0x116   : > { %2316 = vmatpush.bf16.msra.mxu1 %v5482_v56  ;;  %v8268_v56 = vpop.f32.mrf.mxu3 }
 0x117   : > { %2330 = vmatpush.bf16.msra.mxu2 %v5546_v61  ;;  %v5887_v61 = vld [vmem:[#allocation5 + $0x748] sm:$0xf0] }
 0x118   : > { %2344 = vmatpush.bf16.msra.mxu3 %v5610_v0  ;;  %v5687_v0 = vld [vmem:[#allocation5 + $0x5b8] sm:$0xf0]  ;;  %v8270_v1 = vpop.f32.mrf.mxu1  ;;  %v5890_v3 = vor.u32 %v7449_v59, %v5887_v61  ;;  %v7425_v59 = vld [vmem:[#allocation5 + $0x684] sm:$0xf]  ;;  %v7471_v61 = vld [vmem:[#allocation5 + $0x7f4] sm:$0xf] }
 0x119   : > { %2303 = vmatpush.bf16.msra.mxu0 %v5410_v36  ;;  %v5751_v36 = vld [vmem:[#allocation5 + $0x638] sm:$0xf0]  ;;  %v5690_v10 = vor.u32 %v7399_v63, %v5687_v0  ;;  %v8284_v0 = vpop.f32.mrf.mxu0 }
 0x11a   : > { %2317 = vmatpush.bf16.msra.mxu1 %v5474_v9  ;;  %v5879_v9 = vld [vmem:[#allocation5 + $0x738] sm:$0xf0]  ;;  %v5754_v11 = vor.u32 %v7415_v44, %v5751_v36  ;;  %v5855_v36 = vld [vmem:[#allocation5 + $0x708] sm:$0xf0] }
 0x11b   : > { %2331 = vmatpush.bf16.msra.mxu2 %v5538_v12  ;;  %v5818_v12 = vor.u32 %v7431_v5, %v5815_v6  ;;  %v5882_v16 = vor.u32 %v7447_v7, %v5879_v9  ;;  %v6039_v63 = vld [vmem:[#allocation5 + $0x878] sm:$0xf0]  ;;  %v5794_v6 = vor.u32 %v7425_v59, %v5791_v4  ;;  %v7463_v59 = vld [vmem:[#allocation5 + $0x7b4] sm:$0xf] }
 0x11c   : > { %2345 = vmatpush.bf16.msra.mxu3 %v5602_v13  ;;  %2304 = vmatmul.bf16.vlgmr.msra.gmra.mxu0 %v8216_v48  ;;  %v5770_v48 = vor.u32 %v7419_v29, %v5767_v38  ;;  %v7413_v13 = vld [vmem:[#allocation5 + $0x624] sm:$0xf]  ;;  %v5874_v29 = vor.u32 %v7445_v20, %v5871_v21  ;;  %v7427_v38 = vld [vmem:[#allocation5 + $0x694] sm:$0xf]  ;;  %v5943_v4 = vld [vmem:[#allocation5 + $0x7b8] sm:$0xf0] }
 0x11d   : > { %2352 = vmatpush.bf16.msrb.mxu0 %v5722_v40  ;;  %2318 = vmatmul.bf16.vlgmr.msra.gmra.mxu1 %v8222_v30  ;;  %v5759_v30 = vld [vmem:[#allocation5 + $0x648] sm:$0xf0]  ;;  %v8272_v40 = vpop.f32.mrf.mxu2 }
 0x11e   : > { %2366 = vmatpush.bf16.msrb.mxu1 %v5786_v8  ;;  %2332 = vmatmul.bf16.vlgmr.msra.gmra.mxu2 %v8226_v37  ;;  %v5898_v37 = vor.u32 %v7451_v47, %v5895_v49  ;;  %v5762_v14 = vor.u32 %v7417_v55, %v5759_v30  ;;  %v7397_v8 = vld [vmem:[#allocation5 + $0x5a4] sm:$0xf]  ;;  %v8276_v2 = vpop.f32.mrf.mxu3  ;;  %v7443_v47 = vld [vmem:[#allocation5 + $0x714] sm:$0xf]  ;;  %v5863_v49 = vld [vmem:[#allocation5 + $0x718] sm:$0xf0] }
 0x11f   : > { %2380 = vmatpush.bf16.msrb.mxu2 %v5850_v60  ;;  %2346 = vmatmul.bf16.vlgmr.msra.gmra.mxu3 %v8224_v35  ;;  %v5698_v35 = vor.u32 %v7401_v53, %v5695_v54  ;;  %v5679_v60 = vld [vmem:[#allocation5 + $0x5a8] sm:$0xf0]  ;;  %v5802_v54 = vor.u32 %v7427_v38, %v5799_v45  ;;  %v5866_v58 = vor.u32 %v7443_v47, %v5863_v49  ;;  %v6023_v38 = vld [vmem:[#allocation5 + $0x858] sm:$0xf0]  ;;  %v7588_v45 = vld [vmem:[%s8192_s22 + $0x314] sm:$0xf0] }
 0x120   : > { %2394 = vmatpush.bf16.msrb.mxu3 %v5914_v18  ;;  %v7429_v18 = vld [vmem:[#allocation5 + $0x6a4] sm:$0xf]  ;;  %v5682_v22 = vor.u32 %v7397_v8, %v5679_v60  ;;  %v5663_v55 = vld [vmem:[#allocation5 + $0x588] sm:$0xf0]  ;;  %v1972_v8 = vadd.f32 0.0001, %v8265_v50 }
 0x121   : > { %2353 = vmatpush.bf16.msrb.mxu0 %v5714_v24  ;;  %v5746_v24 = vor.u32 %v7413_v13, %v5743_v17  ;;  %v5727_v30 = vld [vmem:[#allocation5 + $0x608] sm:$0xf0]  ;;  %v7469_v13 = vld [vmem:[#allocation5 + $0x7e4] sm:$0xf] }
 0x122   : > { %2367 = vmatpush.bf16.msrb.mxu1 %v5778_v25  ;;  %v5810_v25 = vor.u32 %v7429_v18, %v5807_v19  ;;  %v7485_v17 = vld [vmem:[#allocation5 + $0x864] sm:$0xf]  ;;  %v6031_v18 = vld [vmem:[#allocation5 + $0x868] sm:$0xf0]  ;;  %v1986_v50 = vadd.f32 %v8270_v1, %v1972_v8 }
 0x123   : > { %2381 = vmatpush.bf16.msrb.mxu2 %v5842_v26  ;;  %v7395_v26 = vld [vmem:[#allocation5 + $0x594] sm:$0xf]  ;;  %v7465_v49 = vld [vmem:[#allocation5 + $0x7c4] sm:$0xf] }
 0x124   : > { %2395 = vmatpush.bf16.msrb.mxu3 %v5906_v34  ;;  %v5735_v34 = vld [vmem:[#allocation5 + $0x618] sm:$0xf0] }
 0x125   : > { %2354 = vmatpush.bf16.msrb.mxu0 %v5706_v51  ;;  %v8279_v51 = vpop.f32.mrf.mxu1  ;;  %v5738_v53 = vor.u32 %v7411_v28, %v5735_v34  ;;  %v8281_v57 = vpop.f32.mrf.mxu2  ;;  %v7483_v34 = vld [vmem:[#allocation5 + $0x854] sm:$0xf] }
 0x126   : > { %2368 = vmatpush.bf16.msrb.mxu1 %v5770_v48  ;;  %v5674_v48 = vor.u32 %v7395_v26, %v5671_v27  ;;  %v8286_v7 = vpop.f32.mrf.mxu3  ;;  %v7467_v26 = vld [vmem:[#allocation5 + $0x7d4] sm:$0xf]  ;;  %v5959_v27 = vld [vmem:[#allocation5 + $0x7d8] sm:$0xf0] }
 0x127   : > { %2382 = vmatpush.bf16.msrb.mxu2 %v5834_v52  ;;  %v7393_v52 = vld [vmem:[#allocation5 + $0x584] sm:$0xf]  ;;  %v5962_v1 = vor.u32 %v7467_v26, %v5959_v27  ;;  %v6117_v26 = vld [vmem:[%s8192_s22 + $0x90] sm:$0xf]  ;;  %v7516_v27 = vld [vmem:[%s8192_s22 + $0xd4] sm:$0xf0] }
 0x128   : > { %2396 = vmatpush.bf16.msrb.mxu3 %v5898_v37  ;;  %v7409_v37 = vld [vmem:[#allocation5 + $0x604] sm:$0xf]  ;;  %v5666_v44 = vor.u32 %v7393_v52, %v5663_v55 }
 0x129   : > { %2355 = vmatpush.bf16.msrb.mxu0 %v5698_v35  ;;  %v1984_v35 = vadd.f32 %v8258_v23, %v1970_v46  ;;  %v5730_v5 = vor.u32 %v7409_v37, %v5727_v30  ;;  %v2000_v46 = vadd.f32 %v8272_v40, %v1986_v50  ;;  %v7481_v52 = vld [vmem:[#allocation5 + $0x844] sm:$0xf]  ;;  %v6333_v37 = vld [vmem:[%s8192_s22 + $0x240] sm:$0xf]  ;;  %v7570_v30 = vld [vmem:[%s8192_s22 + $0x284] sm:$0xf0] }
 0x12a   : > { %2369 = vmatpush.bf16.msrb.mxu1 %v5762_v14  ;;  %v5975_v14 = vld [vmem:[#allocation5 + $0x7f8] sm:$0xf0] }
 0x12b   : > { %2383 = vmatpush.bf16.msrb.mxu2 %v5826_v62  ;;  %v7487_v62 = vld [vmem:[#allocation5 + $0x874] sm:$0xf]  ;;  %v5978_v9 = vor.u32 %v7471_v61, %v5975_v14  ;;  %v2014_v40 = vadd.f32 %v8276_v2, %v2000_v46  ;;  %v6007_v14 = vld [vmem:[#allocation5 + $0x838] sm:$0xf0]  ;;  %v7552_v2 = vld [vmem:[%s8192_s22 + $0x1f4] sm:$0xf0] }
 0x12c   : > { %2397 = vmatpush.bf16.msrb.mxu3 %v5890_v3  ;;  %v7441_v3 = vld [vmem:[#allocation5 + $0x704] sm:$0xf]  ;;  %v6042_v23 = vor.u32 %v7487_v62, %v6039_v63  ;;  %v6334_v63 = vor.u32 %v7570_v30, %v6333_v37  ;;  %v6557_v37 = vld [vmem:[%s8192_s22 + $0x3f8] sm:$0xf]  ;;  %v7625_v30 = vld [vmem:[%s8192_s22 + $0x43c] sm:$0xf0] }
 0x12d   : > { %2356 = vmatpush.bf16.msrb.mxu0 %v5690_v10  ;;  %v6549_v10 = vld [vmem:[%s8192_s22 + $0x3f0] sm:$0xf]  ;;  %v5858_v60 = vor.u32 %v7441_v3, %v5855_v36  ;;  %v8292_v20 = vpop.f32.mrf.mxu1  ;;  %v2055_v28 = vpop.f32.mrf.mxu2  ;;  %v2028_v62 = vadd.f32 %v8284_v0, %v2014_v40  ;;  %v5946_v3 = vor.u32 %v7463_v59, %v5943_v4 }
 0x12e   : > { %2370 = vmatpush.bf16.msrb.mxu1 %v5754_v11  ;;  %v7624_v11 = vld [vmem:[%s8192_s22 + $0x434] sm:$0xf0]  ;;  %v6261_v36 = vld [vmem:[%s8192_s22 + $0x1b0] sm:$0xf] }
 0x12f   : > { %2384 = vmatpush.bf16.msrb.mxu2 %v5818_v12  ;;  %v1998_v12 = vadd.f32 %v8260_v33, %v1984_v35  ;;  %v6550_v19 = vor.u32 %v7624_v11, %v6549_v10  ;;  %v7479_v35 = vld [vmem:[#allocation5 + $0x834] sm:$0xf]  ;;  %v7477_v10 = vld [vmem:[#allocation5 + $0x824] sm:$0xf]  ;;  %v5999_v11 = vld [vmem:[#allocation5 + $0x828] sm:$0xf0]  ;;  %v2042_v0 = vadd.f32 %v8292_v20, %v2028_v62 }
 0x130   : > { %2398 = vmatpush.bf16.msrb.mxu3 %v5882_v16  ;;  %v5967_v16 = vld [vmem:[#allocation5 + $0x7e8] sm:$0xf0] }
 0x131   : > { %2357 = vmatpush.bf16.msrb.mxu0 %v5682_v22  ;;  %v5970_v21 = vor.u32 %v7469_v13, %v5967_v16  ;;  %v6477_v22 = vld [vmem:[%s8192_s22 + $0x360] sm:$0xf]  ;;  %v2012_v33 = vadd.f32 %v8268_v56, %v1998_v12  ;;  %v6262_v12 = vor.u32 %v7552_v2, %v6261_v36  ;;  %v7534_v13 = vld [vmem:[%s8192_s22 + $0x164] sm:$0xf0]  ;;  %v7579_v36 = vld [vmem:[%s8192_s22 + $0x2d4] sm:$0xf] }
 0x132   : > { %2371 = vmatpush.bf16.msrb.mxu1 %v5746_v24  ;;  %v7606_v24 = vld [vmem:[%s8192_s22 + $0x3a4] sm:$0xf0]  ;;  %v6407_v2 = vld [vmem:[%s8192_s22 + $0x318] sm:$0xf0] }
 0x133   : > { %2385 = vmatpush.bf16.msrb.mxu2 %v5810_v25  ;;  %v6034_v25 = vor.u32 %v7485_v17, %v6031_v18  ;;  %v6478_v56 = vor.u32 %v7606_v24, %v6477_v22  ;;  %v2026_v47 = vadd.f32 %v8274_v15, %v2012_v33  ;;  %v2056_v17 = vadd.f32 %v2055_v28, %v2042_v0  ;;  %v7459_v18 = vld [vmem:[#allocation5 + $0x794] sm:$0xf]  ;;  %v5991_v24 = vld [vmem:[#allocation5 + $0x818] sm:$0xf0]  ;;  %v7561_v0 = vld [vmem:[%s8192_s22 + $0x244] sm:$0xf] }
 0x134   : > { %2399 = vmatpush.bf16.msrb.mxu3 %v5874_v29  ;;  %v8299_v29 = vpop.f32.mrf.mxu0  ;;  %v7475_v22 = vld [vmem:[#allocation5 + $0x814] sm:$0xf] }
 0x135   : > { %2358 = vmatpush.bf16.msrb.mxu0 %v5674_v48  ;;  %v2069_v48 = vpop.f32.mrf.mxu3  ;;  %v2040_v15 = vadd.f32 %v8279_v51, %v2026_v47  ;;  %v2109_v61 = vpop.f32.mrf.mxu2 }
 0x136   : > { %2372 = vmatpush.bf16.msrb.mxu1 %v5738_v53  ;;  %v6015_v53 = vld [vmem:[#allocation5 + $0x848] sm:$0xf0]  ;;  %v2070_v28 = vadd.f32 %v2069_v48, %v2056_v17  ;;  %v6045_v48 = vld [vmem:[%s8192_s22] sm:$0xf]  ;;  %v6341_v17 = vld [vmem:[%s8192_s22 + $0x248] sm:$0xf] }
 0x137   : > { %2386 = vmatpush.bf16.msrb.mxu2 %v5802_v54  ;;  %v2054_v51 = vadd.f32 %v8281_v57, %v2040_v15  ;;  %v6002_v57 = vor.u32 %v7477_v10, %v5999_v11  ;;  %v6479_v15 = vld [vmem:[%s8192_s22 + $0x3a8] sm:$0xf0]  ;;  %v6413_v10 = vld [vmem:[%s8192_s22 + $0x2d8] sm:$0xf]  ;;  %v7589_v11 = vld [vmem:[%s8192_s22 + $0x31c] sm:$0xf0] }
 0x138   : > { %2400 = vmatpush.bf16.msrb.mxu3 %v5866_v58  ;;  %v6018_v58 = vor.u32 %v7481_v52, %v6015_v53  ;;  %v7498_v52 = vld [vmem:[%s8192_s22 + $0x44] sm:$0xf0] }
 0x139   : > { %2359 = vmatpush.bf16.msrb.mxu0 %v5666_v44  ;;  %v2068_v16 = vadd.f32 %v8286_v7, %v2054_v51  ;;  %v6046_v59 = vor.u32 %v7498_v52, %v6045_v48  ;;  %v6125_v52 = vld [vmem:[%s8192_s22 + $0x98] sm:$0xf] }
 0x13a   : > { %2373 = vmatpush.bf16.msrb.mxu1 %v5730_v5  ;;  %v6010_v5 = vor.u32 %v7479_v35, %v6007_v14  ;;  %v6558_v35 = vor.u32 %v7625_v30, %v6557_v37  ;;  %v7616_v37 = vld [vmem:[%s8192_s22 + $0x3fc] sm:$0xf]  ;;  %v6559_v30 = vld [vmem:[%s8192_s22 + $0x440] sm:$0xf0] }
 0x13b   : > { %2387 = vmatpush.bf16.msrb.mxu2 %v5794_v6  ;;  %v7461_v6 = vld [vmem:[#allocation5 + $0x7a4] sm:$0xf]  ;;  %v2082_v20 = vadd.f32 %v8299_v29, %v2068_v16  ;;  %v7615_v29 = vld [vmem:[%s8192_s22 + $0x3f4] sm:$0xf] }
 0x13c   : > { %2401 = vmatpush.bf16.msrb.mxu3 %v5858_v60  ;;  %2360 = vmatmul.bf16.vlgmr.msrb.gmra.mxu0 %v8228_v41  ;;  %v6405_v41 = vld [vmem:[%s8192_s22 + $0x2d0] sm:$0xf]  ;;  %v2083_v44 = vpop.f32.mrf.mxu0  ;;  %v6189_v60 = vld [vmem:[%s8192_s22 + $0x120] sm:$0xf] }
 0x13d   : > { %2408 = vmatpush.bf16.msra.mxu0 %v5978_v9  ;;  %2374 = vmatmul.bf16.vlgmr.msrb.gmra.mxu1 %v8234_v31  ;;  %v5951_v31 = vld [vmem:[#allocation5 + $0x7c8] sm:$0xf0]  ;;  %v6406_v54 = vor.u32 %v7588_v45, %v6405_v41  ;;  %v6190_v33 = vor.u32 %v7534_v13, %v6189_v60  ;;  %v2111_v50 = vpop.f32.mrf.mxu2  ;;  %v6551_v45 = vld [vmem:[%s8192_s22 + $0x438] sm:$0xf0]  ;;  %v2084_v47 = vadd.f32 %v2083_v44, %v2070_v28  ;;  %v7607_v44 = vld [vmem:[%s8192_s22 + $0x3ac] sm:$0xf0] }
 0x13e   : > { %2422 = vmatpush.bf16.msra.mxu1 %v6042_v23  ;;  %2388 = vmatmul.bf16.vlgmr.msrb.gmra.mxu2 %v8238_v42  ;;  %v6026_v42 = vor.u32 %v7483_v34, %v6023_v38  ;;  %v5954_v55 = vor.u32 %v7465_v49, %v5951_v31  ;;  %v5935_v9 = vld [vmem:[#allocation5 + $0x7a8] sm:$0xf0]  ;;  %v2123_v23 = vpop.f32.mrf.mxu3  ;;  %v5994_v34 = vor.u32 %v7475_v22, %v5991_v24  ;;  %v7457_v38 = vld [vmem:[#allocation5 + $0x784] sm:$0xf]  ;;  %v6263_v22 = vld [vmem:[%s8192_s22 + $0x1f8] sm:$0xf0] }
 0x13f   : > { %4174 = vmatpush.bf16.msra.mxu2 %v6550_v19  ;;  %2402 = vmatmul.bf16.vlgmr.msrb.gmra.mxu3 %v8236_v32  ;;  %v8308_v32 = vpop.f32.mrf.mxu1  ;;  %v5938_v8 = vor.u32 %v7461_v6, %v5935_v9  ;;  %v5927_v19 = vld [vmem:[#allocation5 + $0x798] sm:$0xf0]  ;;  %v5983_v41 = vld [vmem:[#allocation5 + $0x808] sm:$0xf0]  ;;  %v6414_v13 = vor.u32 %v7589_v11, %v6413_v10  ;;  %v7525_v28 = vld [vmem:[%s8192_s22 + $0x124] sm:$0xf] }
 0x140   : > { %v5930_v7 = vor.u32 %v7459_v18, %v5927_v19  ;;  %v2096_v46 = vadd.f32 %v8308_v32, %v2082_v20  ;;  %v7597_v32 = vld [vmem:[%s8192_s22 + $0x364] sm:$0xf]  ;;  %v7608_v10 = vld [vmem:[%s8192_s22 + $0x3b4] sm:$0xf0] }
 0x141   : > { %2409 = vmatpush.bf16.msra.mxu0 %v5970_v21  ;;  %v6482_v62 = vor.u32 %v7597_v32, %v6479_v15 }
 0x142   : > { %2423 = vmatpush.bf16.msra.mxu1 %v6034_v25  ;;  %v2110_v53 = vadd.f32 %v2109_v61, %v2096_v46 }
 0x143   : > { %4175 = vmatpush.bf16.msra.mxu2 %v6478_v56  ;;  %v5919_v56 = vld [vmem:[#allocation5 + $0x788] sm:$0xf0] }
 0x144   : > { %v2137_v25 = vpop.f32.mrf.mxu0  ;;  %v5922_v31 = vor.u32 %v7457_v38, %v5919_v56  ;;  %v2124_v14 = vadd.f32 %v2123_v23, %v2110_v53  ;;  %v6410_v23 = vor.u32 %v7579_v36, %v6407_v2  ;;  %v7517_v53 = vld [vmem:[%s8192_s22 + $0xdc] sm:$0xf0] }
 0x145   : > { %2410 = vmatpush.bf16.msra.mxu0 %v5962_v1  ;;  %v7473_v1 = vld [vmem:[#allocation5 + $0x804] sm:$0xf]  ;;  %v2165_v4 = vpop.f32.mrf.mxu2 }
 0x146   : > { %2424 = vmatpush.bf16.msra.mxu1 %v6026_v42  ;;  %v6118_v42 = vor.u32 %v7516_v27, %v6117_v26  ;;  %v2125_v49 = vpop.f32.mrf.mxu3  ;;  %v2138_v51 = vadd.f32 %v2137_v25, %v2124_v14  ;;  %v7553_v26 = vld [vmem:[%s8192_s22 + $0x1fc] sm:$0xf0] }
 0x147   : > { %4176 = vmatpush.bf16.msra.mxu2 %v6406_v54  ;;  %v2097_v21 = vpop.f32.mrf.mxu1  ;;  %v5986_v54 = vor.u32 %v7473_v1, %v5983_v41 }
 0x149   : > { %2411 = vmatpush.bf16.msra.mxu0 %v5954_v55  ;;  %v6554_v55 = vor.u32 %v7615_v29, %v6551_v45  ;;  %v6197_v29 = vld [vmem:[%s8192_s22 + $0x128] sm:$0xf]  ;;  %v7535_v45 = vld [vmem:[%s8192_s22 + $0x16c] sm:$0xf0] }
 0x14a   : > { %2425 = vmatpush.bf16.msra.mxu1 %v6018_v58  ;;  %v2098_v58 = vadd.f32 %v2097_v21, %v2084_v47  ;;  %v7543_v21 = vld [vmem:[%s8192_s22 + $0x1b4] sm:$0xf] }
 0x14b   : > { %4177 = vmatpush.bf16.msra.mxu2 %v6334_v63  ;;  %v6485_v63 = vld [vmem:[%s8192_s22 + $0x368] sm:$0xf]  ;;  %v6266_v25 = vor.u32 %v7543_v21, %v6263_v22  ;;  %v7507_v47 = vld [vmem:[%s8192_s22 + $0x94] sm:$0xf]  ;;  %v7526_v22 = vld [vmem:[%s8192_s22 + $0x12c] sm:$0xf] }
 0x14c   : > { %v2112_v61 = vadd.f32 %v2111_v50, %v2098_v58  ;;  %v6486_v6 = vor.u32 %v7607_v44, %v6485_v63  ;;  %v6053_v58 = vld [vmem:[%s8192_s22 + $0x8] sm:$0xf] }
 0x14d   : > { %2412 = vmatpush.bf16.msra.mxu0 %v5946_v3  ;;  %v2139_v3 = vpop.f32.mrf.mxu0  ;;  %v2167_v18 = vpop.f32.mrf.mxu2  ;;  %v7626_v63 = vld [vmem:[%s8192_s22 + $0x444] sm:$0xf0] }
 0x14e   : > { %2426 = vmatpush.bf16.msra.mxu1 %v6010_v5  ;;  %v2179_v5 = vpop.f32.mrf.mxu3  ;;  %v2126_v9 = vadd.f32 %v2125_v49, %v2112_v61  ;;  %v6487_v61 = vld [vmem:[%s8192_s22 + $0x3b0] sm:$0xf0] }
 0x14f   : > { %4178 = vmatpush.bf16.msra.mxu2 %v6262_v12  ;;  %v2151_v40 = vpop.f32.mrf.mxu1  ;;  %v6335_v12 = vld [vmem:[%s8192_s22 + $0x288] sm:$0xf0] }
 0x150   : > { %v2140_v60 = vadd.f32 %v2139_v3, %v2126_v9  ;;  %v6415_v9 = vld [vmem:[%s8192_s22 + $0x320] sm:$0xf0] }
 0x151   : > { %2413 = vmatpush.bf16.msra.mxu0 %v5938_v8  ;;  %v2152_v8 = vadd.f32 %v2151_v40, %v2138_v51  ;;  %v6126_v40 = vor.u32 %v7517_v53, %v6125_v52  ;;  %v7500_v52 = vld [vmem:[%s8192_s22 + $0x54] sm:$0xf0]  ;;  %v7599_v53 = vld [vmem:[%s8192_s22 + $0x374] sm:$0xf] }
 0x152   : > { %2427 = vmatpush.bf16.msra.mxu1 %v6002_v57  ;;  %v7571_v57 = vld [vmem:[%s8192_s22 + $0x28c] sm:$0xf0] }
 0x153   : > { %4179 = vmatpush.bf16.msra.mxu2 %v6190_v33  ;;  %v2166_v16 = vadd.f32 %v2165_v4, %v2152_v8  ;;  %v6342_v20 = vor.u32 %v7571_v57, %v6341_v17  ;;  %v6562_v4 = vor.u32 %v7616_v37, %v6559_v30  ;;  %v6343_v8 = vld [vmem:[%s8192_s22 + $0x290] sm:$0xf0]  ;;  %v6271_v17 = vld [vmem:[%s8192_s22 + $0x200] sm:$0xf0]  ;;  %v6349_v57 = vld [vmem:[%s8192_s22 + $0x250] sm:$0xf] }
 0x154   : > { %v7627_v37 = vld [vmem:[%s8192_s22 + $0x44c] sm:$0xf0] }
 0x155   : > { %2414 = vmatpush.bf16.msra.mxu0 %v5930_v7  ;;  %v2180_v33 = vadd.f32 %v2179_v5, %v2166_v16  ;;  %v6269_v7 = vld [vmem:[%s8192_s22 + $0x1b8] sm:$0xf] }
 0x156   : > { %2428 = vmatpush.bf16.msra.mxu1 %v5994_v34  ;;  %v2181_v27 = vpop.f32.mrf.mxu3  ;;  %v6191_v34 = vld [vmem:[%s8192_s22 + $0x168] sm:$0xf0]  ;;  %v6270_v56 = vor.u32 %v7553_v26, %v6269_v7  ;;  %v7508_v7 = vld [vmem:[%s8192_s22 + $0x9c] sm:$0xf]  ;;  %v6127_v26 = vld [vmem:[%s8192_s22 + $0xe0] sm:$0xf0] }
 0x157   : > { %4180 = vmatpush.bf16.msra.mxu2 %v6118_v42  ;;  %v6194_v41 = vor.u32 %v7525_v28, %v6191_v34  ;;  %v6119_v42 = vld [vmem:[%s8192_s22 + $0xd8] sm:$0xf0]  ;;  %v7536_v28 = vld [vmem:[%s8192_s22 + $0x174] sm:$0xf0]  ;;  %v6130_v34 = vor.u32 %v7508_v7, %v6127_v26 }
 0x158   : > { %v6122_v48 = vor.u32 %v7507_v47, %v6119_v42 }
 0x159   : > { %2415 = vmatpush.bf16.msra.mxu0 %v5922_v31  ;;  %v2193_v19 = vpop.f32.mrf.mxu0  ;;  %v6198_v31 = vor.u32 %v7535_v45, %v6197_v29  ;;  %v7518_v29 = vld [vmem:[%s8192_s22 + $0xe4] sm:$0xf0]  ;;  %v7617_v45 = vld [vmem:[%s8192_s22 + $0x404] sm:$0xf] }
 0x15a   : > { %2429 = vmatpush.bf16.msra.mxu1 %v5986_v54  ;;  %v2194_v38 = vadd.f32 %v2193_v19, %v2180_v33  ;;  %v7489_v54 = vld [vmem:[%s8192_s22 + $0x4] sm:$0xf]  ;;  %v7554_v33 = vld [vmem:[%s8192_s22 + $0x204] sm:$0xf0] }
 0x15b   : > { %4181 = vmatpush.bf16.msra.mxu2 %v6046_v59  ;;  %v7499_v59 = vld [vmem:[%s8192_s22 + $0x4c] sm:$0xf0] }
 0x15c   : > { %2416 = vmatmul.bf16.vlgmr.msra.gmra.mxu0 %v8240_v43  ;;  %v2153_v43 = vpop.f32.mrf.mxu1  ;;  %7858 = vlog2.f32 %v2194_v38  ;;  %v6054_v36 = vor.u32 %v7499_v59, %v6053_v58  ;;  %v6423_v58 = vld [vmem:[%s8192_s22 + $0x328] sm:$0xf0]  ;;  %v6501_v59 = vld [vmem:[%s8192_s22 + $0x378] sm:$0xf] }
 0x15d   : > { %4202 = vmatpush.bf16.msrb.mxu0 %v6554_v55  ;;  %2430 = vmatmul.bf16.vlgmr.msra.gmra.mxu1 %v8246_v39  ;;  %v6338_v39 = vor.u32 %v7561_v0, %v6335_v12  ;;  %v2154_v24 = vadd.f32 %v2153_v43, %v2140_v60  ;;  %v6047_v55 = vld [vmem:[%s8192_s22 + $0x48] sm:$0xf0]  ;;  %v6421_v60 = vld [vmem:[%s8192_s22 + $0x2e0] sm:$0xf]  ;;  %v7590_v43 = vld [vmem:[%s8192_s22 + $0x324] sm:$0xf0] }
 0x15e   : > { %v6050_v15 = vor.u32 %v7489_v54, %v6047_v55  ;;  %v7562_v12 = vld [vmem:[%s8192_s22 + $0x24c] sm:$0xf]  ;;  %v6422_v16 = vor.u32 %v7590_v43, %v6421_v60  ;;  %v6495_v54 = vld [vmem:[%s8192_s22 + $0x3b8] sm:$0xf0]  ;;  %v6573_v55 = vld [vmem:[%s8192_s22 + $0x408] sm:$0xf] }
 0x15f   : > { %4230 = vmatpush.bf16.msrb.mxu2 %v6558_v35  ;;  %v2168_v50 = vadd.f32 %v2167_v18, %v2154_v24  ;;  %v7598_v35 = vld [vmem:[%s8192_s22 + $0x36c] sm:$0xf]  ;;  %v7572_v18 = vld [vmem:[%s8192_s22 + $0x294] sm:$0xf0]  ;;  %v6199_v24 = vld [vmem:[%s8192_s22 + $0x170] sm:$0xf0] }
 0x160   : > { %v6490_v51 = vor.u32 %v7598_v35, %v6487_v61  ;;  %v6350_v21 = vor.u32 %v7572_v18, %v6349_v57  ;;  %v7125_v35 = vld [vmem:[%s8192_s22 + $0x870] sm:$0xf]  ;;  %v7759_v61 = vld [vmem:[%s8192_s22 + $0x874] sm:$0xf]  ;;  %v7055_v60 = vld [vmem:[%s8192_s22 + $0x828] sm:$0xf0] }
 0x161   : > { %4203 = vmatpush.bf16.msrb.mxu0 %v6482_v62  ;;  %v2182_v1 = vadd.f32 %v2181_v27, %v2168_v50  ;;  %v2195_v46 = vpop.f32.mrf.mxu0  ;;  %v6565_v62 = vld [vmem:[%s8192_s22 + $0x400] sm:$0xf]  ;;  %v6202_v50 = vor.u32 %v7526_v22, %v6199_v24  ;;  %v6205_v27 = vld [vmem:[%s8192_s22 + $0x130] sm:$0xf]  ;;  %v6279_v57 = vld [vmem:[%s8192_s22 + $0x208] sm:$0xf0] }
 0x162   : > { %v7859_v32 = vpop.eup %7858  ;;  %v6566_v5 = vor.u32 %v7626_v63, %v6565_v62  ;;  %v6206_v38 = vor.u32 %v7536_v28, %v6205_v27  ;;  %v7127_v63 = vld [vmem:[%s8192_s22 + $0x8b8] sm:$0xf0]  ;;  %v8429_v43 = vpop.f32.mrf.mxu3  ;;  %v6357_v18 = vld [vmem:[%s8192_s22 + $0x258] sm:$0xf]  ;;  %v7723_v24 = vld [vmem:[%s8192_s22 + $0x754] sm:$0xf] }
 0x163   : > { %4231 = vmatpush.bf16.msrb.mxu2 %v6486_v6  ;;  %v2196_v49 = vadd.f32 %v2195_v46, %v2182_v1  ;;  %v2437_v44 = vmul.f32 0.6931472, %v7859_v32  ;;  %v7580_v6 = vld [vmem:[%s8192_s22 + $0x2dc] sm:$0xf]  ;;  %v6055_v1 = vld [vmem:[%s8192_s22 + $0x50] sm:$0xf0]  ;;  %v6498_v32 = vor.u32 %v7599_v53, %v6495_v54 }
 0x164   : > { %v6418_v11 = vor.u32 %v7580_v6, %v6415_v9  ;;  %v6567_v46 = vld [vmem:[%s8192_s22 + $0x448] sm:$0xf0]  ;;  %v6351_v6 = vld [vmem:[%s8192_s22 + $0x298] sm:$0xf0]  ;;  %v6429_v9 = vld [vmem:[%s8192_s22 + $0x2e8] sm:$0xf] }
 0x165   : > { %4204 = vmatpush.bf16.msrb.mxu0 %v6410_v23  ;;  %7860 = vlog2.f32 %v2196_v49  ;;  %v6493_v23 = vld [vmem:[%s8192_s22 + $0x370] sm:$0xf]  ;;  %v8399_v49 = vpop.f32.mrf.mxu1  ;;  %v7732_v22 = vld [vmem:[%s8192_s22 + $0x794] sm:$0xf0]  ;;  %v6207_v27 = vld [vmem:[%s8192_s22 + $0x178] sm:$0xf0] }
 0x166   : > { %v6494_v0 = vor.u32 %v7608_v10, %v6493_v23  ;;  %v7591_v23 = vld [vmem:[%s8192_s22 + $0x32c] sm:$0xf0]  ;;  %v7053_v10 = vld [vmem:[%s8192_s22 + $0x7e0] sm:$0xf]  ;;  %v6285_v28 = vld [vmem:[%s8192_s22 + $0x1c8] sm:$0xf] }
 0x167   : > { %4232 = vmatpush.bf16.msrb.mxu2 %v6414_v13  ;;  %v6346_v13 = vor.u32 %v7562_v12, %v6343_v8  ;;  %v6135_v53 = vld [vmem:[%s8192_s22 + $0xe8] sm:$0xf0]  ;;  %v6213_v54 = vld [vmem:[%s8192_s22 + $0x138] sm:$0xf] }
 0x169   : > { %4205 = vmatpush.bf16.msrb.mxu0 %v6338_v39  ;;  %v7544_v39 = vld [vmem:[%s8192_s22 + $0x1bc] sm:$0xf] }
 0x16a   : > { %v6274_v19 = vor.u32 %v7544_v39, %v6271_v17  ;;  %v6430_v17 = vor.u32 %v7591_v23, %v6429_v9  ;;  %v6767_v23 = vld [vmem:[%s8192_s22 + $0x5e8] sm:$0xf0] }
 0x16b   : > { %4233 = vmatpush.bf16.msrb.mxu2 %v6342_v20  ;;  %v7861_v14 = vpop.eup %7860  ;;  %v6277_v20 = vld [vmem:[%s8192_s22 + $0x1c0] sm:$0xf] }
 0x16c   : > { %v2441_v3 = vmul.f32 0.6931472, %v7861_v14  ;;  %v7768_v14 = vld [vmem:[%s8192_s22 + $0x8b4] sm:$0xf0] }
 0x16d   : > { %4206 = vmatpush.bf16.msrb.mxu0 %v6266_v25  ;;  %v6278_v25 = vor.u32 %v7554_v33, %v6277_v20  ;;  %v7126_v62 = vor.u32 %v7768_v14, %v7125_v35  ;;  %v8425_v12 = vpop.f32.mrf.mxu1  ;;  %v6983_v33 = vld [vmem:[%s8192_s22 + $0x798] sm:$0xf0] }
 0x16e   : > { %v8368_v2 = vpack.c.bf16 %v2441_v3, %v2437_v44  ;;  %v8416_v44 = vpop.f32.mrf.mxu2  ;;  %v7563_v3 = vld [vmem:[%s8192_s22 + $0x254] sm:$0xf] }
 0x16f   : > { %4234 = vmatpush.bf16.msrb.mxu2 %v6270_v56  ;;  %v7490_v56 = vld [vmem:[%s8192_s22 + $0xc] sm:$0xf]  ;;  %4188 = vmatpush.bf16.msra.mxu3 %v7126_v62  ;;  %v6354_v39 = vor.u32 %v7563_v3, %v6351_v6  ;;  %v6063_v62 = vld [vmem:[%s8192_s22 + $0x58] sm:$0xf0]  ;;  %v7519_v3 = vld [vmem:[%s8192_s22 + $0xec] sm:$0xf0] }
 0x170   : > { %4182 = vmatmul.bf16.vlgmr.msra.gmra.mxu2 %v8368_v2  ;;  %v6058_v47 = vor.u32 %v7490_v56, %v6055_v1  ;;  %v6909_v56 = vld [vmem:[%s8192_s22 + $0x6c0] sm:$0xf]  ;;  %v7714_v1 = vld [vmem:[%s8192_s22 + $0x704] sm:$0xf0]  ;;  %v6575_v6 = vld [vmem:[%s8192_s22 + $0x450] sm:$0xf0] }
 0x171   : > { %4207 = vmatpush.bf16.msrb.mxu0 %v6194_v41  ;;  %v6133_v41 = vld [vmem:[%s8192_s22 + $0xa0] sm:$0xf] }
 0x172   : > { %v6134_v42 = vor.u32 %v7518_v29, %v6133_v41  ;;  %v7705_v41 = vld [vmem:[%s8192_s22 + $0x6c4] sm:$0xf]  ;;  %v6910_v29 = vor.u32 %v7714_v1, %v6909_v56 }
 0x173   : > { %4235 = vmatpush.bf16.msrb.mxu2 %v6198_v31  ;;  %v6570_v31 = vor.u32 %v7617_v45, %v6567_v46  ;;  %v6911_v45 = vld [vmem:[%s8192_s22 + $0x708] sm:$0xf0] }
 0x175   : > { %4208 = vmatpush.bf16.msrb.mxu0 %v6122_v48  ;;  %v6061_v48 = vld [vmem:[%s8192_s22 + $0x10] sm:$0xf] }
 0x176   : > { %v6062_v30 = vor.u32 %v7500_v52, %v6061_v48 }
 0x177   : > { %4236 = vmatpush.bf16.msrb.mxu2 %v6126_v40  ;;  %v7581_v40 = vld [vmem:[%s8192_s22 + $0x2e4] sm:$0xf] }
 0x179   : > { %4209 = vmatpush.bf16.msrb.mxu0 %v6050_v15  ;;  %v6574_v15 = vor.u32 %v7627_v37, %v6573_v55  ;;  %v8449_v46 = vpop.f32.mrf.mxu0  ;;  %v7537_v55 = vld [vmem:[%s8192_s22 + $0x17c] sm:$0xf0]  ;;  %v8457_v37 = vpop.f32.mrf.mxu3 }
 0x17b   : > { %4237 = vmatpush.bf16.msrb.mxu2 %v6054_v36  ;;  %v7130_v36 = vor.u32 %v7759_v61, %v7127_v63  ;;  %v6214_v61 = vor.u32 %v7537_v55, %v6213_v54  ;;  %v6141_v63 = vld [vmem:[%s8192_s22 + $0xa8] sm:$0xf]  ;;  %v7769_v55 = vld [vmem:[%s8192_s22 + $0x8bc] sm:$0xf0] }
 0x17c   : > { %4210 = vmatmul.bf16.vlgmr.msrb.gmra.mxu0 %v8368_v2 }
 0x17d   : > { %4258 = vmatpush.bf16.msra.mxu0 %v6562_v4  ;;  %v7609_v4 = vld [vmem:[%s8192_s22 + $0x3bc] sm:$0xf0]  ;;  %4216 = vmatpush.bf16.msrb.mxu1 %v7130_v36 }
 0x17e   : > { %v6765_v36 = vld [vmem:[%s8192_s22 + $0x5a0] sm:$0xf] }
 0x17f   : > { %4286 = vmatpush.bf16.msra.mxu2 %v6566_v5  ;;  %v6502_v5 = vor.u32 %v7609_v4, %v6501_v59  ;;  %v2208_v59 = vadd.f32 0.0001, %v8399_v49  ;;  %v7491_v4 = vld [vmem:[%s8192_s22 + $0x14] sm:$0xf]  ;;  %v7669_v49 = vld [vmem:[%s8192_s22 + $0x5a4] sm:$0xf] }
 0x180   : > { %4238 = vmatmul.bf16.vlgmr.msrb.gmra.mxu2 %v8368_v2 }
 0x181   : > { %4259 = vmatpush.bf16.msra.mxu0 %v6490_v51  ;;  %v6426_v51 = vor.u32 %v7581_v40, %v6423_v58  ;;  %v7696_v40 = vld [vmem:[%s8192_s22 + $0x674] sm:$0xf0]  ;;  %v6839_v58 = vld [vmem:[%s8192_s22 + $0x678] sm:$0xf0] }
 0x183   : > { %4287 = vmatpush.bf16.msra.mxu2 %v6494_v0  ;;  %v7741_v0 = vld [vmem:[%s8192_s22 + $0x7e4] sm:$0xf] }
 0x185   : > { %4260 = vmatpush.bf16.msra.mxu0 %v6418_v11  ;;  %v7750_v11 = vld [vmem:[%s8192_s22 + $0x824] sm:$0xf0] }
 0x186   : > { %v7054_v8 = vor.u32 %v7750_v11, %v7053_v10  ;;  %v6069_v11 = vld [vmem:[%s8192_s22 + $0x18] sm:$0xf] }
 0x187   : > { %4288 = vmatpush.bf16.msra.mxu2 %v6422_v16  ;;  %v7058_v16 = vor.u32 %v7741_v0, %v7055_v60  ;;  %v6770_v0 = vor.u32 %v7669_v49, %v6767_v23  ;;  %v6142_v60 = vor.u32 %v7519_v3, %v6141_v63  ;;  %v7742_v49 = vld [vmem:[%s8192_s22 + $0x7ec] sm:$0xf] }
 0x188   : > { %4189 = vmatpush.bf16.msra.mxu3 %v7054_v8  ;;  %v6066_v8 = vor.u32 %v7491_v4, %v6063_v62  ;;  %v6437_v62 = vld [vmem:[%s8192_s22 + $0x2f0] sm:$0xf] }
 0x189   : > { %4261 = vmatpush.bf16.msra.mxu0 %v6346_v13  ;;  %v7545_v13 = vld [vmem:[%s8192_s22 + $0x1c4] sm:$0xf]  ;;  %4217 = vmatpush.bf16.msrb.mxu1 %v7058_v16  ;;  %v7600_v16 = vld [vmem:[%s8192_s22 + $0x37c] sm:$0xf] }
 0x18a   : > { %v6282_v7 = vor.u32 %v7545_v13, %v6279_v57  ;;  %v7501_v13 = vld [vmem:[%s8192_s22 + $0x5c] sm:$0xf0] }
 0x18b   : > { %4289 = vmatpush.bf16.msra.mxu2 %v6350_v21  ;;  %v6981_v21 = vld [vmem:[%s8192_s22 + $0x750] sm:$0xf] }
 0x18c   : > { %v6982_v20 = vor.u32 %v7732_v22, %v6981_v21  ;;  %v7651_v21 = vld [vmem:[%s8192_s22 + $0x514] sm:$0xf]  ;;  %v2222_v22 = vadd.f32 %v8416_v44, %v2208_v59 }
 0x18d   : > { %4262 = vmatpush.bf16.msra.mxu0 %v6274_v19  ;;  %v7573_v19 = vld [vmem:[%s8192_s22 + $0x29c] sm:$0xf0]  ;;  %v6431_v44 = vld [vmem:[%s8192_s22 + $0x330] sm:$0xf0] }
 0x18e   : > { %v6358_v26 = vor.u32 %v7573_v19, %v6357_v18  ;;  %4190 = vmatpush.bf16.msra.mxu3 %v6982_v20  ;;  %v6693_v18 = vld [vmem:[%s8192_s22 + $0x510] sm:$0xf]  ;;  %v7660_v19 = vld [vmem:[%s8192_s22 + $0x554] sm:$0xf0] }
 0x18f   : > { %4290 = vmatpush.bf16.msra.mxu2 %v6278_v25  ;;  %v6986_v25 = vor.u32 %v7723_v24, %v6983_v33  ;;  %v6581_v20 = vld [vmem:[%s8192_s22 + $0x410] sm:$0xf]  ;;  %v7628_v33 = vld [vmem:[%s8192_s22 + $0x454] sm:$0xf0] }
 0x190   : > { %v6582_v1 = vor.u32 %v7628_v33, %v6581_v20  ;;  %v7528_v20 = vld [vmem:[%s8192_s22 + $0x13c] sm:$0xf] }
 0x191   : > { %4263 = vmatpush.bf16.msra.mxu0 %v6202_v50  ;;  %v7527_v50 = vld [vmem:[%s8192_s22 + $0x134] sm:$0xf]  ;;  %4218 = vmatpush.bf16.msrb.mxu1 %v6986_v25  ;;  %v6695_v25 = vld [vmem:[%s8192_s22 + $0x558] sm:$0xf0] }
 0x192   : > { %v6210_v48 = vor.u32 %v7527_v50, %v6207_v27  ;;  %4191 = vmatpush.bf16.msra.mxu3 %v6910_v29  ;;  %v6694_v50 = vor.u32 %v7660_v19, %v6693_v18  ;;  %v6070_v27 = vor.u32 %v7501_v13, %v6069_v11  ;;  %v6621_v29 = vld [vmem:[%s8192_s22 + $0x480] sm:$0xf]  ;;  %v7724_v18 = vld [vmem:[%s8192_s22 + $0x75c] sm:$0xf] }
 0x193   : > { %4291 = vmatpush.bf16.msra.mxu2 %v6206_v38  ;;  %v8443_v38 = vpop.f32.mrf.mxu2  ;;  %v6365_v13 = vld [vmem:[%s8192_s22 + $0x260] sm:$0xf] }
 0x195   : > { %4264 = vmatpush.bf16.msra.mxu0 %v6130_v34  ;;  %v7555_v34 = vld [vmem:[%s8192_s22 + $0x20c] sm:$0xf0] }
 0x196   : > { %v6286_v52 = vor.u32 %v7555_v34, %v6285_v28  ;;  %v7582_v28 = vld [vmem:[%s8192_s22 + $0x2ec] sm:$0xf]  ;;  %v6509_v34 = vld [vmem:[%s8192_s22 + $0x380] sm:$0xf] }
 0x197   : > { %4292 = vmatpush.bf16.msra.mxu2 %v6134_v42  ;;  %v6914_v42 = vor.u32 %v7705_v41, %v6911_v45  ;;  %v7610_v41 = vld [vmem:[%s8192_s22 + $0x3c4] sm:$0xf0] }
 0x198   : > { %v7642_v45 = vld [vmem:[%s8192_s22 + $0x4c4] sm:$0xf0] }
 0x199   : > { %4265 = vmatpush.bf16.msra.mxu0 %v6058_v47  ;;  %v7509_v47 = vld [vmem:[%s8192_s22 + $0xa4] sm:$0xf]  ;;  %4219 = vmatpush.bf16.msrb.mxu1 %v6914_v42  ;;  %v6622_v42 = vor.u32 %v7642_v45, %v6621_v29  ;;  %v6919_v45 = vld [vmem:[%s8192_s22 + $0x710] sm:$0xf0] }
 0x19a   : > { %v6138_v14 = vor.u32 %v7509_v47, %v6135_v53  ;;  %v2236_v47 = vadd.f32 %v8429_v43, %v2222_v22  ;;  %v7133_v53 = vld [vmem:[%s8192_s22 + $0x878] sm:$0xf] }
 0x19b   : > { %4293 = vmatpush.bf16.msra.mxu2 %v6062_v30  ;;  %v6837_v30 = vld [vmem:[%s8192_s22 + $0x630] sm:$0xf]  ;;  %v8474_v10 = vpop.f32.mrf.mxu2  ;;  %v7134_v43 = vor.u32 %v7769_v55, %v7133_v53  ;;  %v6143_v53 = vld [vmem:[%s8192_s22 + $0xf0] sm:$0xf0]  ;;  %v7538_v55 = vld [vmem:[%s8192_s22 + $0x184] sm:$0xf0] }
 0x19c   : > { %4266 = vmatmul.bf16.vlgmr.msra.gmra.mxu0 %v8368_v2  ;;  %v2250_v63 = vadd.f32 %v8449_v46, %v2236_v47 }
 0x19d   : > { %4314 = vmatpush.bf16.msrb.mxu0 %v6570_v31  ;;  %v8452_v31 = vpop.f32.mrf.mxu1 }
 0x19e   : > { %4294 = vmatmul.bf16.vlgmr.msra.gmra.mxu2 %v8368_v2 }
 0x19f   : > { %4342 = vmatpush.bf16.msrb.mxu2 %v6574_v15  ;;  %v6838_v15 = vor.u32 %v7696_v40, %v6837_v30  ;;  %v7760_v30 = vld [vmem:[%s8192_s22 + $0x87c] sm:$0xf]  ;;  %v7135_v40 = vld [vmem:[%s8192_s22 + $0x8c0] sm:$0xf0] }
 0x1a1   : > { %4315 = vmatpush.bf16.msrb.mxu0 %v6498_v32  ;;  %v7687_v32 = vld [vmem:[%s8192_s22 + $0x634] sm:$0xf]  ;;  %4192 = vmatpush.bf16.msra.mxu3 %v6838_v15  ;;  %v7564_v15 = vld [vmem:[%s8192_s22 + $0x25c] sm:$0xf] }
 0x1a2   : > { %v6842_v35 = vor.u32 %v7687_v32, %v6839_v58  ;;  %v2210_v32 = vadd.f32 0.0001, %v8425_v12  ;;  %v7138_v58 = vor.u32 %v7760_v30, %v7135_v40  ;;  %v7592_v12 = vld [vmem:[%s8192_s22 + $0x334] sm:$0xf0] }
 0x1a3   : > { %4343 = vmatpush.bf16.msrb.mxu2 %v6502_v5  ;;  %v7618_v5 = vld [vmem:[%s8192_s22 + $0x40c] sm:$0xf]  ;;  %v8509_v59 = vpop.f32.mrf.mxu2 }
 0x1a4   : > { %4220 = vmatpush.bf16.msrb.mxu1 %v6842_v35  ;;  %v6578_v57 = vor.u32 %v7618_v5, %v6575_v6  ;;  %v6434_v35 = vor.u32 %v7582_v28, %v6431_v44  ;;  %v7063_v6 = vld [vmem:[%s8192_s22 + $0x830] sm:$0xf0]  ;;  %v2224_v46 = vadd.f32 %v8443_v38, %v2210_v32  ;;  %v7733_v38 = vld [vmem:[%s8192_s22 + $0x79c] sm:$0xf0]  ;;  %v7556_v28 = vld [vmem:[%s8192_s22 + $0x214] sm:$0xf0] }
 0x1a5   : > { %4316 = vmatpush.bf16.msrb.mxu0 %v6426_v51  ;;  %v7678_v51 = vld [vmem:[%s8192_s22 + $0x5e4] sm:$0xf0]  ;;  %v8486_v24 = vpop.f32.mrf.mxu1  ;;  %v7066_v23 = vor.u32 %v7742_v49, %v7063_v6  ;;  %v6845_v32 = vld [vmem:[%s8192_s22 + $0x638] sm:$0xf]  ;;  %v7670_v6 = vld [vmem:[%s8192_s22 + $0x5ac] sm:$0xf] }
 0x1a6   : > { %v6766_v9 = vor.u32 %v7678_v51, %v6765_v36  ;;  %v7061_v36 = vld [vmem:[%s8192_s22 + $0x7e8] sm:$0xf]  ;;  %v7751_v51 = vld [vmem:[%s8192_s22 + $0x82c] sm:$0xf0]  ;;  %v2238_v22 = vadd.f32 %v8457_v37, %v2224_v46 }
 0x1a7   : > { %4344 = vmatpush.bf16.msrb.mxu2 %v6430_v17  ;;  %v8480_v17 = vpop.f32.mrf.mxu0  ;;  %v7062_v5 = vor.u32 %v7751_v51, %v7061_v36  ;;  %v6917_v37 = vld [vmem:[%s8192_s22 + $0x6c8] sm:$0xf]  ;;  %v6149_v36 = vld [vmem:[%s8192_s22 + $0xb0] sm:$0xf]  ;;  %v7520_v51 = vld [vmem:[%s8192_s22 + $0xf4] sm:$0xf0] }
 0x1a8   : > { %4193 = vmatpush.bf16.msra.mxu3 %v6766_v9  ;;  %4221 = vmatpush.bf16.msrb.mxu1 %v6770_v0  ;;  %v7546_v9 = vld [vmem:[%s8192_s22 + $0x1cc] sm:$0xf]  ;;  %v6773_v49 = vld [vmem:[%s8192_s22 + $0x5a8] sm:$0xf] }
 0x1a9   : > { %4317 = vmatpush.bf16.msrb.mxu0 %v6354_v39  ;;  %v6503_v39 = vld [vmem:[%s8192_s22 + $0x3c0] sm:$0xf0] }
 0x1aa   : > { %v6506_v56 = vor.u32 %v7600_v16, %v6503_v39  ;;  %v7574_v16 = vld [vmem:[%s8192_s22 + $0x2a4] sm:$0xf0]  ;;  %v2264_v39 = vadd.f32 %v8452_v31, %v2250_v63  ;;  %v6071_v63 = vld [vmem:[%s8192_s22 + $0x60] sm:$0xf0] }
 0x1ab   : > { %4345 = vmatpush.bf16.msrb.mxu2 %v6358_v26  ;;  %v6698_v26 = vor.u32 %v7651_v21, %v6695_v25  ;;  %v6991_v21 = vld [vmem:[%s8192_s22 + $0x7a0] sm:$0xf0]  ;;  %v6366_v25 = vor.u32 %v7574_v16, %v6365_v13  ;;  %v6077_v16 = vld [vmem:[%s8192_s22 + $0x20] sm:$0xf] }
 0x1ac   : > { %4194 = vmatpush.bf16.msra.mxu3 %v6694_v50  ;;  %v6994_v33 = vor.u32 %v7724_v18, %v6991_v21  ;;  %v8538_v50 = vpop.f32.mrf.mxu2  ;;  %v2278_v44 = vadd.f32 %v8474_v10, %v2264_v39  ;;  %v7502_v18 = vld [vmem:[%s8192_s22 + $0x64] sm:$0xf0] }
 0x1ad   : > { %4318 = vmatpush.bf16.msrb.mxu0 %v6282_v7  ;;  %v8491_v7 = vpop.f32.mrf.mxu3  ;;  %4222 = vmatpush.bf16.msrb.mxu1 %v6698_v26  ;;  %v8517_v3 = vpop.f32.mrf.mxu1  ;;  %v6215_v26 = vld [vmem:[%s8192_s22 + $0x180] sm:$0xf0] }
 0x1ae   : > { %v2292_v30 = vadd.f32 %v8491_v7, %v2278_v44  ;;  %v7492_v7 = vld [vmem:[%s8192_s22 + $0x1c] sm:$0xf]  ;;  %v6703_v44 = vld [vmem:[%s8192_s22 + $0x560] sm:$0xf0] }
 0x1af   : > { %4346 = vmatpush.bf16.msrb.mxu2 %v6286_v52  ;;  %v6623_v52 = vld [vmem:[%s8192_s22 + $0x4c8] sm:$0xf0]  ;;  %v8511_v4 = vpop.f32.mrf.mxu0 }
 0x1b0   : > { %4195 = vmatpush.bf16.msra.mxu3 %v6622_v42  ;;  %v7510_v42 = vld [vmem:[%s8192_s22 + $0xac] sm:$0xf] }
 0x1b1   : > { %4319 = vmatpush.bf16.msrb.mxu0 %v6210_v48  ;;  %v7633_v48 = vld [vmem:[%s8192_s22 + $0x484] sm:$0xf] }
 0x1b2   : > { %v6626_v54 = vor.u32 %v7633_v48, %v6623_v52  ;;  %v6218_v48 = vor.u32 %v7528_v20, %v6215_v26  ;;  %v6701_v20 = vld [vmem:[%s8192_s22 + $0x518] sm:$0xf] }
 0x1b3   : > { %4347 = vmatpush.bf16.msrb.mxu2 %v6214_v61  ;;  %v6359_v61 = vld [vmem:[%s8192_s22 + $0x2a0] sm:$0xf0]  ;;  %v6589_v26 = vld [vmem:[%s8192_s22 + $0x418] sm:$0xf] }
 0x1b4   : > { %4223 = vmatpush.bf16.msrb.mxu1 %v6626_v54  ;;  %4244 = vmatpush.bf16.msrb.mxu3 %v7134_v43  ;;  %v6362_v0 = vor.u32 %v7564_v15, %v6359_v61  ;;  %v6221_v54 = vld [vmem:[%s8192_s22 + $0x140] sm:$0xf]  ;;  %v7688_v43 = vld [vmem:[%s8192_s22 + $0x63c] sm:$0xf]  ;;  %v2306_v61 = vadd.f32 %v8511_v4, %v2292_v30  ;;  %v7619_v4 = vld [vmem:[%s8192_s22 + $0x414] sm:$0xf] }
 0x1b5   : > { %4320 = vmatpush.bf16.msrb.mxu0 %v6138_v14  ;;  %v6510_v14 = vor.u32 %v7610_v41, %v6509_v34  ;;  %v8526_v11 = vpop.f32.mrf.mxu3  ;;  %v2252_v34 = vadd.f32 %v8480_v17, %v2238_v22  ;;  %v8549_v47 = vpop.f32.mrf.mxu1  ;;  %v7697_v15 = vld [vmem:[%s8192_s22 + $0x67c] sm:$0xf0]  ;;  %v6631_v30 = vld [vmem:[%s8192_s22 + $0x4d0] sm:$0xf0] }
 0x1b7   : > { %4348 = vmatpush.bf16.msrb.mxu2 %v6142_v60  ;;  %v6287_v60 = vld [vmem:[%s8192_s22 + $0x210] sm:$0xf0]  ;;  %v2307_v41 = vpop.f32.mrf.mxu0  ;;  %v2266_v40 = vadd.f32 %v8486_v24, %v2252_v34 }
 0x1b8   : > { %4272 = vmatpush.bf16.msra.mxu1 %v7138_v58  ;;  %4245 = vmatpush.bf16.msrb.mxu3 %v7062_v5  ;;  %v6290_v31 = vor.u32 %v7546_v9, %v6287_v60  ;;  %v6846_v58 = vor.u32 %v7697_v15, %v6845_v32  ;;  %v7679_v5 = vld [vmem:[%s8192_s22 + $0x5ec] sm:$0xf0]  ;;  %v6583_v9 = vld [vmem:[%s8192_s22 + $0x458] sm:$0xf0]  ;;  %v2320_v60 = vadd.f32 %v8517_v3, %v2306_v61 }
 0x1b9   : > { %4321 = vmatpush.bf16.msrb.mxu0 %v6066_v8  ;;  %v6438_v8 = vor.u32 %v7592_v12, %v6437_v62  ;;  %v6146_v62 = vor.u32 %v7510_v42, %v6143_v53  ;;  %v6222_v12 = vor.u32 %v7538_v55, %v6221_v54  ;;  %v6586_v22 = vor.u32 %v7619_v4, %v6583_v9  ;;  %v6517_v42 = vld [vmem:[%s8192_s22 + $0x388] sm:$0xf]  ;;  %v7611_v53 = vld [vmem:[%s8192_s22 + $0x3cc] sm:$0xf0]  ;;  %v7634_v55 = vld [vmem:[%s8192_s22 + $0x48c] sm:$0xf] }
 0x1ba   : > { %v2334_v21 = vadd.f32 %v8538_v50, %v2320_v60  ;;  %v6078_v50 = vor.u32 %v7502_v18, %v6077_v16  ;;  %v7529_v16 = vld [vmem:[%s8192_s22 + $0x144] sm:$0xf] }
 0x1bb   : > { %4349 = vmatpush.bf16.msrb.mxu2 %v6070_v27  ;;  %v6293_v27 = vld [vmem:[%s8192_s22 + $0x1d0] sm:$0xf] }
 0x1bc   : > { %4322 = vmatmul.bf16.vlgmr.msrb.gmra.mxu0 %v8368_v2  ;;  %4273 = vmatpush.bf16.msra.mxu1 %v7066_v23  ;;  %v6294_v52 = vor.u32 %v7556_v28, %v6293_v27  ;;  %v6774_v23 = vor.u32 %v7679_v5, %v6773_v49  ;;  %v7629_v27 = vld [vmem:[%s8192_s22 + $0x45c] sm:$0xf0]  ;;  %v7547_v5 = vld [vmem:[%s8192_s22 + $0x1d4] sm:$0xf] }
 0x1bd   : > { %4370 = vmatpush.bf16.msra.mxu0 %v6578_v57  ;;  %v6989_v57 = vld [vmem:[%s8192_s22 + $0x758] sm:$0xf]  ;;  %v8552_v17 = vpop.f32.mrf.mxu3  ;;  %v8577_v13 = vpop.f32.mrf.mxu1 }
 0x1be   : > { %4350 = vmatmul.bf16.vlgmr.msrb.gmra.mxu2 %v8368_v2  ;;  %v6990_v19 = vor.u32 %v7733_v38, %v6989_v57  ;;  %v6074_v57 = vor.u32 %v7492_v7, %v6071_v63  ;;  %v6150_v38 = vor.u32 %v7520_v51, %v6149_v36  ;;  %v6445_v7 = vld [vmem:[%s8192_s22 + $0x2f8] sm:$0xf] }
 0x1bf   : > { %4398 = vmatpush.bf16.msra.mxu2 %v6582_v1  ;;  %v7706_v1 = vld [vmem:[%s8192_s22 + $0x6cc] sm:$0xf]  ;;  %v2361_v46 = vpop.f32.mrf.mxu0 }
 0x1c0   : > { %4246 = vmatpush.bf16.msrb.mxu3 %v6990_v19  ;;  %4274 = vmatpush.bf16.msra.mxu1 %v6994_v33  ;;  %v6922_v10 = vor.u32 %v7706_v1, %v6919_v45  ;;  %v7601_v19 = vld [vmem:[%s8192_s22 + $0x384] sm:$0xf]  ;;  %v7661_v33 = vld [vmem:[%s8192_s22 + $0x55c] sm:$0xf0]  ;;  %v2348_v1 = vadd.f32 %v8552_v17, %v2334_v21  ;;  %v6590_v45 = vor.u32 %v7629_v27, %v6589_v26 }
 0x1c1   : > { %4371 = vmatpush.bf16.msra.mxu0 %v6506_v56  ;;  %v7715_v56 = vld [vmem:[%s8192_s22 + $0x70c] sm:$0xf0]  ;;  %v6702_v28 = vor.u32 %v7661_v33, %v6701_v20  ;;  %v6151_v20 = vld [vmem:[%s8192_s22 + $0xf8] sm:$0xf0]  ;;  %v6229_v33 = vld [vmem:[%s8192_s22 + $0x148] sm:$0xf] }
 0x1c2   : > { %v6918_v29 = vor.u32 %v7715_v56, %v6917_v37  ;;  %v7583_v37 = vld [vmem:[%s8192_s22 + $0x2f4] sm:$0xf]  ;;  %v6439_v56 = vld [vmem:[%s8192_s22 + $0x338] sm:$0xf0]  ;;  %v2362_v17 = vadd.f32 %v2361_v46, %v2348_v1  ;;  %v7575_v46 = vld [vmem:[%s8192_s22 + $0x2ac] sm:$0xf0] }
 0x1c3   : > { %4399 = vmatpush.bf16.msra.mxu2 %v6510_v14  ;;  %v2280_v14 = vadd.f32 %v8509_v59, %v2266_v40  ;;  %v2335_v59 = vpop.f32.mrf.mxu2  ;;  %v6157_v1 = vld [vmem:[%s8192_s22 + $0xb8] sm:$0xf] }
 0x1c4   : > { %4247 = vmatpush.bf16.msrb.mxu3 %v6918_v29  ;;  %4275 = vmatpush.bf16.msra.mxu1 %v6922_v10  ;;  %v6629_v10 = vld [vmem:[%s8192_s22 + $0x488] sm:$0xf] }
 0x1c5   : > { %4372 = vmatpush.bf16.msra.mxu0 %v6434_v35  ;;  %v6847_v35 = vld [vmem:[%s8192_s22 + $0x680] sm:$0xf0]  ;;  %v2377_v15 = vpop.f32.mrf.mxu1 }
 0x1c6   : > { %v6850_v24 = vor.u32 %v7688_v43, %v6847_v35  ;;  %v6442_v43 = vor.u32 %v7583_v37, %v6439_v56  ;;  %v7565_v35 = vld [vmem:[%s8192_s22 + $0x264] sm:$0xf]  ;;  %v6079_v56 = vld [vmem:[%s8192_s22 + $0x68] sm:$0xf0] }
 0x1c7   : > { %4400 = vmatpush.bf16.msra.mxu2 %v6438_v8  ;;  %v2294_v8 = vadd.f32 %v8526_v11, %v2280_v14  ;;  %v6511_v11 = vld [vmem:[%s8192_s22 + $0x3c8] sm:$0xf0]  ;;  %v2363_v32 = vpop.f32.mrf.mxu0 }
 0x1c8   : > { %4248 = vmatpush.bf16.msrb.mxu3 %v6846_v58  ;;  %4276 = vmatpush.bf16.msra.mxu1 %v6850_v24  ;;  %v6514_v29 = vor.u32 %v7601_v19, %v6511_v11  ;;  %v6518_v58 = vor.u32 %v7611_v53, %v6517_v42  ;;  %v6367_v14 = vld [vmem:[%s8192_s22 + $0x2a8] sm:$0xf0]  ;;  %v7593_v24 = vld [vmem:[%s8192_s22 + $0x33c] sm:$0xf0]  ;;  %v6591_v42 = vld [vmem:[%s8192_s22 + $0x460] sm:$0xf0] }
 0x1c9   : > { %4373 = vmatpush.bf16.msra.mxu0 %v6362_v0  ;;  %v6775_v0 = vld [vmem:[%s8192_s22 + $0x5f0] sm:$0xf0]  ;;  %v2308_v3 = vadd.f32 %v2307_v41, %v2294_v8  ;;  %v6370_v63 = vor.u32 %v7565_v35, %v6367_v14  ;;  %v6446_v49 = vor.u32 %v7593_v24, %v6445_v7  ;;  %v6085_v53 = vld [vmem:[%s8192_s22 + $0x28] sm:$0xf]  ;;  %v7761_v14 = vld [vmem:[%s8192_s22 + $0x884] sm:$0xf] }
 0x1ca   : > { %v6778_v39 = vor.u32 %v7670_v6, %v6775_v0  ;;  %v6295_v6 = vld [vmem:[%s8192_s22 + $0x218] sm:$0xf0]  ;;  %v7770_v35 = vld [vmem:[%s8192_s22 + $0x8c4] sm:$0xf0] }
 0x1cb   : > { %4401 = vmatpush.bf16.msra.mxu2 %v6366_v25  ;;  %v2349_v25 = vpop.f32.mrf.mxu3  ;;  %v2322_v41 = vadd.f32 %v8549_v47, %v2308_v3  ;;  %v6634_v47 = vor.u32 %v7634_v55, %v6631_v30  ;;  %v7602_v55 = vld [vmem:[%s8192_s22 + $0x38c] sm:$0xf]  ;;  %v6519_v30 = vld [vmem:[%s8192_s22 + $0x3d0] sm:$0xf0]  ;;  %v7584_v24 = vld [vmem:[%s8192_s22 + $0x2fc] sm:$0xf] }
 0x1cc   : > { %4249 = vmatpush.bf16.msrb.mxu3 %v6774_v23  ;;  %4277 = vmatpush.bf16.msra.mxu1 %v6778_v39  ;;  %v6298_v23 = vor.u32 %v7547_v5, %v6295_v6  ;;  %v6223_v39 = vld [vmem:[%s8192_s22 + $0x188] sm:$0xf0]  ;;  %v7069_v6 = vld [vmem:[%s8192_s22 + $0x7f0] sm:$0xf] }
 0x1cd   : > { %4374 = vmatpush.bf16.msra.mxu0 %v6290_v31  ;;  %v7652_v31 = vld [vmem:[%s8192_s22 + $0x51c] sm:$0xf]  ;;  %v2336_v40 = vadd.f32 %v2335_v59, %v2322_v41  ;;  %v6373_v59 = vld [vmem:[%s8192_s22 + $0x268] sm:$0xf]  ;;  %v6226_v21 = vor.u32 %v7529_v16, %v6223_v39  ;;  %v7521_v41 = vld [vmem:[%s8192_s22 + $0xfc] sm:$0xf0] }
 0x1ce   : > { %v6706_v34 = vor.u32 %v7652_v31, %v6703_v44  ;;  %v7539_v31 = vld [vmem:[%s8192_s22 + $0x18c] sm:$0xf0]  ;;  %v7594_v16 = vld [vmem:[%s8192_s22 + $0x344] sm:$0xf0] }
 0x1cf   : > { %4402 = vmatpush.bf16.msra.mxu2 %v6294_v52  ;;  %v2389_v52 = vpop.f32.mrf.mxu2 }
 0x1d0   : > { %4250 = vmatpush.bf16.msrb.mxu3 %v6702_v28  ;;  %4278 = vmatpush.bf16.msra.mxu1 %v6706_v34  ;;  %v6230_v34 = vor.u32 %v7539_v31, %v6229_v33  ;;  %v6381_v33 = vld [vmem:[%s8192_s22 + $0x270] sm:$0xf]  ;;  %v7576_v31 = vld [vmem:[%s8192_s22 + $0x2b4] sm:$0xf0] }
 0x1d1   : > { %4375 = vmatpush.bf16.msra.mxu0 %v6218_v48  ;;  %v7643_v48 = vld [vmem:[%s8192_s22 + $0x4cc] sm:$0xf0] }
 0x1d2   : > { %v6630_v54 = vor.u32 %v7643_v48, %v6629_v10  ;;  %v6158_v48 = vor.u32 %v7521_v41, %v6157_v1  ;;  %v6231_v1 = vld [vmem:[%s8192_s22 + $0x190] sm:$0xf0]  ;;  %v6309_v41 = vld [vmem:[%s8192_s22 + $0x1e0] sm:$0xf] }
 0x1d3   : > { %4403 = vmatpush.bf16.msra.mxu2 %v6222_v12  ;;  %v2403_v61 = vpop.f32.mrf.mxu3  ;;  %v2376_v12 = vadd.f32 %v8577_v13, %v2362_v17  ;;  %v6374_v13 = vor.u32 %v7575_v46, %v6373_v59  ;;  %v7630_v17 = vld [vmem:[%s8192_s22 + $0x464] sm:$0xf0] }
 0x1d4   : > { %4251 = vmatpush.bf16.msrb.mxu3 %v6630_v54  ;;  %4279 = vmatpush.bf16.msra.mxu1 %v6634_v47  ;;  %v7503_v54 = vld [vmem:[%s8192_s22 + $0x6c] sm:$0xf0] }
 0x1d5   : > { %4376 = vmatpush.bf16.msra.mxu0 %v6146_v62  ;;  %v2350_v62 = vadd.f32 %v2349_v25, %v2336_v40  ;;  %v2390_v36 = vadd.f32 %v2389_v52, %v2376_v12  ;;  %v6597_v40 = vld [vmem:[%s8192_s22 + $0x420] sm:$0xf]  ;;  %v6525_v12 = vld [vmem:[%s8192_s22 + $0x390] sm:$0xf] }
 0x1d7   : > { %4404 = vmatpush.bf16.msra.mxu2 %v6150_v38  ;;  %v2364_v51 = vadd.f32 %v2363_v32, %v2350_v62  ;;  %v2391_v4 = vpop.f32.mrf.mxu2  ;;  %v2404_v0 = vadd.f32 %v2403_v61, %v2390_v36  ;;  %v7557_v38 = vld [vmem:[%s8192_s22 + $0x21c] sm:$0xf0]  ;;  %v6086_v32 = vor.u32 %v7503_v54, %v6085_v53  ;;  %v7143_v61 = vld [vmem:[%s8192_s22 + $0x8c8] sm:$0xf0]  ;;  %v6447_v62 = vld [vmem:[%s8192_s22 + $0x340] sm:$0xf0] }
 0x1d8   : > { %v7146_v5 = vor.u32 %v7761_v14, %v7143_v61  ;;  %v6450_v46 = vor.u32 %v7584_v24, %v6447_v62  ;;  %v7689_v53 = vld [vmem:[%s8192_s22 + $0x644] sm:$0xf]  ;;  %v6855_v54 = vld [vmem:[%s8192_s22 + $0x688] sm:$0xf0]  ;;  %v7671_v14 = vld [vmem:[%s8192_s22 + $0x5b4] sm:$0xf] }
 0x1d9   : > { %4377 = vmatpush.bf16.msra.mxu0 %v6074_v57  ;;  %v2417_v9 = vpop.f32.mrf.mxu0  ;;  %v2378_v8 = vadd.f32 %v2377_v15, %v2364_v51  ;;  %v6301_v57 = vld [vmem:[%s8192_s22 + $0x1d8] sm:$0xf]  ;;  %v7141_v15 = vld [vmem:[%s8192_s22 + $0x880] sm:$0xf]  ;;  %v6783_v61 = vld [vmem:[%s8192_s22 + $0x5f8] sm:$0xf0] }
 0x1da   : > { %v2431_v60 = vpop.f32.mrf.mxu1  ;;  %v2418_v19 = vadd.f32 %v2417_v9, %v2404_v0  ;;  %v6302_v3 = vor.u32 %v7557_v38, %v6301_v57  ;;  %v7612_v51 = vld [vmem:[%s8192_s22 + $0x3d4] sm:$0xf0]  ;;  %v7743_v9 = vld [vmem:[%s8192_s22 + $0x7f4] sm:$0xf]  ;;  %v6997_v38 = vld [vmem:[%s8192_s22 + $0x760] sm:$0xf] }
 0x1db   : > { %4405 = vmatpush.bf16.msra.mxu2 %v6078_v50  ;;  %v2392_v18 = vadd.f32 %v2391_v4, %v2378_v8  ;;  %v2405_v11 = vpop.f32.mrf.mxu3  ;;  %v7493_v50 = vld [vmem:[%s8192_s22 + $0x24] sm:$0xf]  ;;  %v7752_v4 = vld [vmem:[%s8192_s22 + $0x834] sm:$0xf0]  ;;  %v6526_v0 = vor.u32 %v7612_v51, %v6525_v12  ;;  %v7566_v8 = vld [vmem:[%s8192_s22 + $0x26c] sm:$0xf] }
 0x1dc   : > { %4378 = vmatmul.bf16.vlgmr.msra.gmra.mxu0 %v8368_v2  ;;  %v2432_v26 = vadd.f32 %v2431_v60, %v2418_v19  ;;  %v6082_v10 = vor.u32 %v7493_v50, %v6079_v56  ;;  %v6375_v60 = vld [vmem:[%s8192_s22 + $0x2b0] sm:$0xf0]  ;;  %v7070_v39 = vor.u32 %v7752_v4, %v7069_v6  ;;  %v7734_v19 = vld [vmem:[%s8192_s22 + $0x7a4] sm:$0xf0]  ;;  %v6927_v50 = vld [vmem:[%s8192_s22 + $0x718] sm:$0xf0] }
 0x1dd   : > { %4426 = vmatpush.bf16.msrb.mxu0 %v6586_v22  ;;  %v7511_v22 = vld [vmem:[%s8192_s22 + $0xb4] sm:$0xf]  ;;  %v2406_v25 = vadd.f32 %v2405_v11, %v2392_v18  ;;  %v6378_v18 = vor.u32 %v7566_v8, %v6375_v60  ;;  %v7725_v11 = vld [vmem:[%s8192_s22 + $0x764] sm:$0xf]  ;;  %v7530_v56 = vld [vmem:[%s8192_s22 + $0x14c] sm:$0xf] }
 0x1de   : > { %4406 = vmatmul.bf16.vlgmr.msra.gmra.mxu2 %v8368_v2  ;;  %v6154_v44 = vor.u32 %v7511_v22, %v6151_v20  ;;  %7862 = vlog2.f32 %v2432_v26  ;;  %v7548_v22 = vld [vmem:[%s8192_s22 + $0x1dc] sm:$0xf]  ;;  %v6303_v20 = vld [vmem:[%s8192_s22 + $0x220] sm:$0xf0]  ;;  %v7494_v24 = vld [vmem:[%s8192_s22 + $0x2c] sm:$0xf] }
 0x1df   : > { %4454 = vmatpush.bf16.msrb.mxu2 %v6590_v45  ;;  %v7620_v45 = vld [vmem:[%s8192_s22 + $0x41c] sm:$0xf]  ;;  %v6087_v62 = vld [vmem:[%s8192_s22 + $0x70] sm:$0xf0]  ;;  %v6165_v12 = vld [vmem:[%s8192_s22 + $0xc0] sm:$0xf] }
 0x1e0   : > { %v6594_v52 = vor.u32 %v7620_v45, %v6591_v42  ;;  %v6599_v51 = vld [vmem:[%s8192_s22 + $0x468] sm:$0xf0]  ;;  %v6709_v6 = vld [vmem:[%s8192_s22 + $0x520] sm:$0xf]  ;;  %v7662_v4 = vld [vmem:[%s8192_s22 + $0x564] sm:$0xf0] }
 0x1e1   : > { %4427 = vmatpush.bf16.msrb.mxu0 %v6514_v29  ;;  %v2419_v27 = vpop.f32.mrf.mxu0  ;;  %v6093_v60 = vld [vmem:[%s8192_s22 + $0x30] sm:$0xf] }
 0x1e2   : > { %v2420_v28 = vadd.f32 %v2419_v27, %v2406_v25  ;;  %v2433_v37 = vpop.f32.mrf.mxu1  ;;  %v6998_v25 = vor.u32 %v7734_v19, %v6997_v38  ;;  %v6925_v27 = vld [vmem:[%s8192_s22 + $0x6d0] sm:$0xf]  ;;  %v6710_v38 = vor.u32 %v7662_v4, %v6709_v6  ;;  %v6935_v6 = vld [vmem:[%s8192_s22 + $0x720] sm:$0xf0]  ;;  %v7531_v4 = vld [vmem:[%s8192_s22 + $0x154] sm:$0xf] }
 0x1e3   : > { %4455 = vmatpush.bf16.msrb.mxu2 %v6518_v58  ;;  %v6598_v58 = vor.u32 %v7630_v17, %v6597_v40  ;;  %v6159_v40 = vld [vmem:[%s8192_s22 + $0x100] sm:$0xf0]  ;;  %v6237_v17 = vld [vmem:[%s8192_s22 + $0x150] sm:$0xf] }
 0x1e4   : > { %v2434_v29 = vadd.f32 %v2433_v37, %v2420_v28  ;;  %v7863_v47 = vpop.eup %7862  ;;  %v6306_v28 = vor.u32 %v7548_v22, %v6303_v20  ;;  %v6382_v37 = vor.u32 %v7576_v31, %v6381_v33  ;;  %v7631_v19 = vld [vmem:[%s8192_s22 + $0x46c] sm:$0xf0]  ;;  %v6639_v22 = vld [vmem:[%s8192_s22 + $0x4d8] sm:$0xf0]  ;;  %v7149_v20 = vld [vmem:[%s8192_s22 + $0x888] sm:$0xf] }
 0x1e5   : > { %4428 = vmatpush.bf16.msrb.mxu0 %v6442_v43  ;;  %v6522_v43 = vor.u32 %v7602_v55, %v6519_v30  ;;  %v7512_v30 = vld [vmem:[%s8192_s22 + $0xbc] sm:$0xf] }
 0x1e6   : > { %7864 = vlog2.f32 %v2434_v29  ;;  %v7558_v29 = vld [vmem:[%s8192_s22 + $0x224] sm:$0xf0] }
 0x1e7   : > { %4456 = vmatpush.bf16.msrb.mxu2 %v6446_v49  ;;  %v7142_v49 = vor.u32 %v7770_v35, %v7141_v15  ;;  %v6310_v55 = vor.u32 %v7558_v29, %v6309_v41  ;;  %v6858_v15 = vor.u32 %v7689_v53, %v6855_v54  ;;  %v7680_v35 = vld [vmem:[%s8192_s22 + $0x5f4] sm:$0xf0]  ;;  %v7567_v54 = vld [vmem:[%s8192_s22 + $0x274] sm:$0xf] }
 0x1e9   : > { %4429 = vmatpush.bf16.msrb.mxu0 %v6370_v63  ;;  %v2439_v63 = vmul.f32 0.6931472, %v7863_v47  ;;  %v7540_v47 = vld [vmem:[%s8192_s22 + $0x194] sm:$0xf0] }
 0x1eb   : > { %4457 = vmatpush.bf16.msrb.mxu2 %v6374_v13  ;;  %v6453_v13 = vld [vmem:[%s8192_s22 + $0x300] sm:$0xf] }
 0x1ec   : > { %v7865_v7 = vpop.eup %7864 }
 0x1ed   : > { %4430 = vmatpush.bf16.msrb.mxu0 %v6298_v23  ;;  %v2443_v36 = vmul.f32 0.6931472, %v7865_v7  ;;  %v7071_v23 = vld [vmem:[%s8192_s22 + $0x838] sm:$0xf0]  ;;  %v6238_v7 = vor.u32 %v7540_v47, %v6237_v17 }
 0x1ee   : > { %v7074_v57 = vor.u32 %v7743_v9, %v7071_v23  ;;  %v7653_v9 = vld [vmem:[%s8192_s22 + $0x524] sm:$0xf]  ;;  %v6711_v23 = vld [vmem:[%s8192_s22 + $0x568] sm:$0xf0] }
 0x1ef   : > { %4458 = vmatpush.bf16.msrb.mxu2 %v6302_v3  ;;  %v8641_v59 = vpack.c.bf16 %v2443_v36, %v2439_v63  ;;  %v6454_v3 = vor.u32 %v7594_v16, %v6453_v13  ;;  %v7522_v63 = vld [vmem:[%s8192_s22 + $0x104] sm:$0xf0]  ;;  %v7621_v36 = vld [vmem:[%s8192_s22 + $0x424] sm:$0xf]  ;;  %v7504_v13 = vld [vmem:[%s8192_s22 + $0x74] sm:$0xf0] }
 0x1f0   : > { %v6602_v8 = vor.u32 %v7621_v36, %v6599_v51  ;;  %v7603_v16 = vld [vmem:[%s8192_s22 + $0x394] sm:$0xf]  ;;  %v6094_v33 = vor.u32 %v7504_v13, %v6093_v60  ;;  %v6933_v36 = vld [vmem:[%s8192_s22 + $0x6d8] sm:$0xf]  ;;  %v6861_v13 = vld [vmem:[%s8192_s22 + $0x648] sm:$0xf] }
 0x1f1   : > { %4431 = vmatpush.bf16.msrb.mxu0 %v6226_v21  ;;  %4196 = vmatmul.bf16.vlgmr.msra.gmra.mxu3 %v8641_v59  ;;  %v6999_v21 = vld [vmem:[%s8192_s22 + $0x7a8] sm:$0xf0] }
 0x1f2   : > { %4224 = vmatmul.bf16.vlgmr.msrb.gmra.mxu1 %v8641_v59  ;;  %4300 = vmatpush.bf16.msra.mxu3 %v7142_v49  ;;  %v7002_v26 = vor.u32 %v7725_v11, %v6999_v21  ;;  %v6637_v11 = vld [vmem:[%s8192_s22 + $0x490] sm:$0xf]  ;;  %v7644_v21 = vld [vmem:[%s8192_s22 + $0x4d4] sm:$0xf0] }
 0x1f3   : > { %4459 = vmatpush.bf16.msrb.mxu2 %v6230_v34  ;;  %4328 = vmatpush.bf16.msrb.mxu1 %v7146_v5  ;;  %v7707_v34 = vld [vmem:[%s8192_s22 + $0x6d4] sm:$0xf]  ;;  %v6786_v5 = vor.u32 %v7671_v14, %v6783_v61  ;;  %v7549_v61 = vld [vmem:[%s8192_s22 + $0x1e4] sm:$0xf] }
 0x1f4   : > { %v6930_v42 = vor.u32 %v7707_v34, %v6927_v50  ;;  %v6455_v34 = vld [vmem:[%s8192_s22 + $0x348] sm:$0xf0]  ;;  %v6638_v50 = vor.u32 %v7644_v21, %v6637_v11  ;;  %v6245_v21 = vld [vmem:[%s8192_s22 + $0x158] sm:$0xf] }
 0x1f5   : > { %4432 = vmatpush.bf16.msrb.mxu0 %v6154_v44  ;;  %v7716_v44 = vld [vmem:[%s8192_s22 + $0x714] sm:$0xf0]  ;;  %v6167_v11 = vld [vmem:[%s8192_s22 + $0x108] sm:$0xf0] }
 0x1f6   : > { %4301 = vmatpush.bf16.msra.mxu3 %v7070_v39  ;;  %v6926_v45 = vor.u32 %v7716_v44, %v6925_v27  ;;  %v6527_v39 = vld [vmem:[%s8192_s22 + $0x3d8] sm:$0xf0]  ;;  %v7151_v27 = vld [vmem:[%s8192_s22 + $0x8d0] sm:$0xf0]  ;;  %v7585_v44 = vld [vmem:[%s8192_s22 + $0x304] sm:$0xf] }
 0x1f7   : > { %4460 = vmatpush.bf16.msrb.mxu2 %v6158_v48  ;;  %4329 = vmatpush.bf16.msrb.mxu1 %v7074_v57  ;;  %v6234_v48 = vor.u32 %v7530_v56, %v6231_v1  ;;  %v6605_v57 = vld [vmem:[%s8192_s22 + $0x428] sm:$0xf]  ;;  %v6530_v31 = vor.u32 %v7603_v16, %v6527_v39  ;;  %v6533_v56 = vld [vmem:[%s8192_s22 + $0x398] sm:$0xf]  ;;  %v7613_v1 = vld [vmem:[%s8192_s22 + $0x3dc] sm:$0xf0] }
 0x1f8   : > { %v6534_v53 = vor.u32 %v7613_v1, %v6533_v56  ;;  %v7699_v39 = vld [vmem:[%s8192_s22 + $0x68c] sm:$0xf0]  ;;  %v7622_v56 = vld [vmem:[%s8192_s22 + $0x42c] sm:$0xf]  ;;  %v6607_v1 = vld [vmem:[%s8192_s22 + $0x470] sm:$0xf0] }
 0x1f9   : > { %4433 = vmatpush.bf16.msrb.mxu0 %v6082_v10  ;;  %v6853_v10 = vld [vmem:[%s8192_s22 + $0x640] sm:$0xf] }
 0x1fa   : > { %4302 = vmatpush.bf16.msra.mxu3 %v6998_v25  ;;  %v7771_v25 = vld [vmem:[%s8192_s22 + $0x8cc] sm:$0xf0] }
 0x1fb   : > { %4461 = vmatpush.bf16.msrb.mxu2 %v6086_v32  ;;  %4330 = vmatpush.bf16.msrb.mxu1 %v7002_v26  ;;  %v7762_v26 = vld [vmem:[%s8192_s22 + $0x88c] sm:$0xf]  ;;  %v7150_v41 = vor.u32 %v7771_v25, %v7149_v20  ;;  %v7681_v25 = vld [vmem:[%s8192_s22 + $0x5fc] sm:$0xf0] }
 0x1fc   : > { %4434 = vmatmul.bf16.vlgmr.msrb.gmra.mxu0 %v8368_v2  ;;  %v7154_v29 = vor.u32 %v7762_v26, %v7151_v27  ;;  %v7672_v26 = vld [vmem:[%s8192_s22 + $0x5bc] sm:$0xf]  ;;  %v6791_v27 = vld [vmem:[%s8192_s22 + $0x600] sm:$0xf0] }
 0x1fd   : > { %4482 = vmatpush.bf16.msra.mxu0 %v6594_v52  ;;  %v7698_v52 = vld [vmem:[%s8192_s22 + $0x684] sm:$0xf0] }
 0x1fe   : > { %4462 = vmatmul.bf16.vlgmr.msrb.gmra.mxu2 %v8368_v2  ;;  %4303 = vmatpush.bf16.msra.mxu3 %v6926_v45  ;;  %v6854_v32 = vor.u32 %v7698_v52, %v6853_v10  ;;  %v7077_v45 = vld [vmem:[%s8192_s22 + $0x7f8] sm:$0xf]  ;;  %v7753_v10 = vld [vmem:[%s8192_s22 + $0x83c] sm:$0xf0]  ;;  %v7079_v52 = vld [vmem:[%s8192_s22 + $0x840] sm:$0xf0] }
 0x1ff   : > { %4510 = vmatpush.bf16.msra.mxu2 %v6598_v58  ;;  %4331 = vmatpush.bf16.msrb.mxu1 %v6930_v42  ;;  %v6162_v58 = vor.u32 %v7512_v30, %v6159_v40  ;;  %v6458_v42 = vor.u32 %v7585_v44, %v6455_v34  ;;  %v6461_v30 = vld [vmem:[%s8192_s22 + $0x308] sm:$0xf]  ;;  %v7595_v40 = vld [vmem:[%s8192_s22 + $0x34c] sm:$0xf0]  ;;  %v7078_v17 = vor.u32 %v7753_v10, %v7077_v45  ;;  %v7495_v44 = vld [vmem:[%s8192_s22 + $0x34] sm:$0xf] }
 0x200   : > { %v6462_v14 = vor.u32 %v7595_v40, %v6461_v30  ;;  %v6095_v34 = vld [vmem:[%s8192_s22 + $0x78] sm:$0xf0]  ;;  %v6717_v45 = vld [vmem:[%s8192_s22 + $0x528] sm:$0xf]  ;;  %v7663_v10 = vld [vmem:[%s8192_s22 + $0x56c] sm:$0xf0] }
 0x201   : > { %4483 = vmatpush.bf16.msra.mxu0 %v6522_v43  ;;  %v6781_v43 = vld [vmem:[%s8192_s22 + $0x5b0] sm:$0xf]  ;;  %4252 = vmatmul.bf16.vlgmr.msrb.gmra.mxu3 %v8641_v59  ;;  %v7505_v30 = vld [vmem:[%s8192_s22 + $0x7c] sm:$0xf0]  ;;  %v7604_v40 = vld [vmem:[%s8192_s22 + $0x39c] sm:$0xf] }
 0x202   : > { %4280 = vmatmul.bf16.vlgmr.msra.gmra.mxu1 %v8641_v59  ;;  %4304 = vmatpush.bf16.msra.mxu3 %v6854_v32  ;;  %v6782_v49 = vor.u32 %v7680_v35, %v6781_v43  ;;  %v7005_v32 = vld [vmem:[%s8192_s22 + $0x768] sm:$0xf]  ;;  %v7735_v43 = vld [vmem:[%s8192_s22 + $0x7ac] sm:$0xf0]  ;;  %v7007_v35 = vld [vmem:[%s8192_s22 + $0x7b0] sm:$0xf0] }
 0x203   : > { %4511 = vmatpush.bf16.msra.mxu2 %v6526_v0  ;;  %4332 = vmatpush.bf16.msrb.mxu1 %v6858_v15  ;;  %v6166_v0 = vor.u32 %v7522_v63, %v6165_v12  ;;  %v7006_v12 = vor.u32 %v7735_v43, %v7005_v32  ;;  %v6718_v32 = vor.u32 %v7663_v10, %v6717_v45  ;;  %v7632_v43 = vld [vmem:[%s8192_s22 + $0x474] sm:$0xf0]  ;;  %v6943_v45 = vld [vmem:[%s8192_s22 + $0x728] sm:$0xf0]  ;;  %v6247_v10 = vld [vmem:[%s8192_s22 + $0x1a0] sm:$0xf0] }
 0x205   : > { %4484 = vmatpush.bf16.msra.mxu0 %v6450_v46  ;;  %v6090_v46 = vor.u32 %v7494_v24, %v6087_v62  ;;  %v6389_v24 = vld [vmem:[%s8192_s22 + $0x278] sm:$0xf]  ;;  %v7577_v62 = vld [vmem:[%s8192_s22 + $0x2bc] sm:$0xf0] }
 0x206   : > { %4305 = vmatpush.bf16.msra.mxu3 %v6782_v49  ;;  %v7717_v49 = vld [vmem:[%s8192_s22 + $0x71c] sm:$0xf0] }
 0x207   : > { %4512 = vmatpush.bf16.msra.mxu2 %v6454_v3  ;;  %4333 = vmatpush.bf16.msrb.mxu1 %v6786_v5  ;;  %v7635_v3 = vld [vmem:[%s8192_s22 + $0x494] sm:$0xf]  ;;  %v7708_v5 = vld [vmem:[%s8192_s22 + $0x6dc] sm:$0xf] }
 0x208   : > { %v6938_v60 = vor.u32 %v7708_v5, %v6935_v6  ;;  %v6463_v5 = vld [vmem:[%s8192_s22 + $0x350] sm:$0xf0] }
 0x209   : > { %4485 = vmatpush.bf16.msra.mxu0 %v6378_v18  ;;  %v6714_v18 = vor.u32 %v7653_v9, %v6711_v23  ;;  %v6239_v9 = vld [vmem:[%s8192_s22 + $0x198] sm:$0xf0]  ;;  %v6317_v23 = vld [vmem:[%s8192_s22 + $0x1e8] sm:$0xf] }
 0x20a   : > { %4306 = vmatpush.bf16.msra.mxu3 %v6710_v38  ;;  %v6242_v16 = vor.u32 %v7531_v4, %v6239_v9  ;;  %v6863_v38 = vld [vmem:[%s8192_s22 + $0x690] sm:$0xf0] }
 0x20b   : > { %4513 = vmatpush.bf16.msra.mxu2 %v6382_v37  ;;  %4334 = vmatpush.bf16.msrb.mxu1 %v6714_v18  ;;  %v6642_v37 = vor.u32 %v7635_v3, %v6639_v22  ;;  %v7541_v3 = vld [vmem:[%s8192_s22 + $0x19c] sm:$0xf0]  ;;  %v6862_v22 = vor.u32 %v7699_v39, %v6861_v13  ;;  %v7754_v13 = vld [vmem:[%s8192_s22 + $0x844] sm:$0xf0]  ;;  %v7087_v39 = vld [vmem:[%s8192_s22 + $0x848] sm:$0xf0] }
 0x20d   : > { %4486 = vmatpush.bf16.msra.mxu0 %v6306_v28  ;;  %v6606_v28 = vor.u32 %v7631_v19, %v6605_v57  ;;  %v7690_v57 = vld [vmem:[%s8192_s22 + $0x64c] sm:$0xf]  ;;  %v7513_v19 = vld [vmem:[%s8192_s22 + $0xc4] sm:$0xf] }
 0x20e   : > { %4307 = vmatpush.bf16.msra.mxu3 %v6638_v50  ;;  %v6866_v20 = vor.u32 %v7690_v57, %v6863_v38  ;;  %v6173_v50 = vld [vmem:[%s8192_s22 + $0xc8] sm:$0xf]  ;;  %v7568_v57 = vld [vmem:[%s8192_s22 + $0x27c] sm:$0xf]  ;;  %v6391_v38 = vld [vmem:[%s8192_s22 + $0x2c0] sm:$0xf0] }
 0x20f   : > { %4514 = vmatpush.bf16.msra.mxu2 %v6310_v55  ;;  %v6383_v55 = vld [vmem:[%s8192_s22 + $0x2b8] sm:$0xf0]  ;;  %4335 = vmatpush.bf16.msrb.mxu1 %v6642_v37  ;;  %v7523_v37 = vld [vmem:[%s8192_s22 + $0x10c] sm:$0xf0] }
 0x210   : > { %v6386_v15 = vor.u32 %v7567_v54, %v6383_v55  ;;  %v6610_v54 = vor.u32 %v7622_v56, %v6607_v1  ;;  %v6101_v55 = vld [vmem:[%s8192_s22 + $0x38] sm:$0xf]  ;;  %v6941_v56 = vld [vmem:[%s8192_s22 + $0x6e0] sm:$0xf] }
 0x211   : > { %4487 = vmatpush.bf16.msra.mxu0 %v6234_v48  ;;  %v7744_v48 = vld [vmem:[%s8192_s22 + $0x7fc] sm:$0xf]  ;;  %4308 = vmatmul.bf16.vlgmr.msra.gmra.mxu3 %v8641_v59 }
 0x212   : > { %4356 = vmatpush.bf16.msrb.mxu3 %v7150_v41  ;;  %v7082_v47 = vor.u32 %v7744_v48, %v7079_v52  ;;  %4336 = vmatmul.bf16.vlgmr.msrb.gmra.mxu1 %v8641_v59  ;;  %v7654_v48 = vld [vmem:[%s8192_s22 + $0x52c] sm:$0xf]  ;;  %v6719_v52 = vld [vmem:[%s8192_s22 + $0x570] sm:$0xf0] }
 0x213   : > { %4515 = vmatpush.bf16.msra.mxu2 %v6238_v7  ;;  %4384 = vmatpush.bf16.msra.mxu1 %v7154_v29  ;;  %v6311_v7 = vld [vmem:[%s8192_s22 + $0x228] sm:$0xf0]  ;;  %v6794_v29 = vor.u32 %v7672_v26, %v6791_v27  ;;  %v6319_v27 = vld [vmem:[%s8192_s22 + $0x230] sm:$0xf0] }
 0x214   : > { %v6314_v51 = vor.u32 %v7549_v61, %v6311_v7  ;;  %v6647_v61 = vld [vmem:[%s8192_s22 + $0x4e0] sm:$0xf0]  ;;  %v7157_v7 = vld [vmem:[%s8192_s22 + $0x890] sm:$0xf]  ;;  %v7550_v26 = vld [vmem:[%s8192_s22 + $0x1ec] sm:$0xf] }
 0x215   : > { %4488 = vmatpush.bf16.msra.mxu0 %v6162_v58  ;;  %v7726_v58 = vld [vmem:[%s8192_s22 + $0x76c] sm:$0xf]  ;;  %v6322_v1 = vor.u32 %v7550_v26, %v6319_v27  ;;  %v7165_v26 = vld [vmem:[%s8192_s22 + $0x898] sm:$0xf] }
 0x216   : > { %4357 = vmatpush.bf16.msrb.mxu3 %v7078_v17  ;;  %v7010_v63 = vor.u32 %v7726_v58, %v7007_v35  ;;  %v6535_v17 = vld [vmem:[%s8192_s22 + $0x3e0] sm:$0xf0]  ;;  %v6645_v58 = vld [vmem:[%s8192_s22 + $0x498] sm:$0xf]  ;;  %v7645_v35 = vld [vmem:[%s8192_s22 + $0x4dc] sm:$0xf0] }
 0x217   : > { %4516 = vmatpush.bf16.msra.mxu2 %v6166_v0  ;;  %4385 = vmatpush.bf16.msra.mxu1 %v7082_v47  ;;  %v7559_v0 = vld [vmem:[%s8192_s22 + $0x22c] sm:$0xf0]  ;;  %v6646_v6 = vor.u32 %v7645_v35, %v6645_v58 }
 0x218   : > { %v6318_v18 = vor.u32 %v7559_v0, %v6317_v23  ;;  %v6613_v47 = vld [vmem:[%s8192_s22 + $0x430] sm:$0xf]  ;;  %v6541_v23 = vld [vmem:[%s8192_s22 + $0x3a0] sm:$0xf]  ;;  %v7614_v0 = vld [vmem:[%s8192_s22 + $0x3e4] sm:$0xf0] }
 0x219   : > { %4489 = vmatpush.bf16.msra.mxu0 %v6090_v46  ;;  %v6390_v46 = vor.u32 %v7577_v62, %v6389_v24  ;;  %v6102_v24 = vor.u32 %v7505_v30, %v6101_v55  ;;  %v6538_v62 = vor.u32 %v7604_v40, %v6535_v17  ;;  %v7560_v55 = vld [vmem:[%s8192_s22 + $0x234] sm:$0xf0]  ;;  %v6869_v30 = vld [vmem:[%s8192_s22 + $0x650] sm:$0xf] }
 0x21a   : > { %4358 = vmatpush.bf16.msrb.mxu3 %v7006_v12  ;;  %v7772_v12 = vld [vmem:[%s8192_s22 + $0x8d4] sm:$0xf0] }
 0x21b   : > { %4517 = vmatpush.bf16.msra.mxu2 %v6094_v33  ;;  %4386 = vmatpush.bf16.msra.mxu1 %v7010_v63  ;;  %v6789_v33 = vld [vmem:[%s8192_s22 + $0x5b8] sm:$0xf]  ;;  %v7763_v63 = vld [vmem:[%s8192_s22 + $0x894] sm:$0xf]  ;;  %v7158_v4 = vor.u32 %v7772_v12, %v7157_v7  ;;  %v7542_v7 = vld [vmem:[%s8192_s22 + $0x1a4] sm:$0xf0] }
 0x21c   : > { %4490 = vmatmul.bf16.vlgmr.msra.gmra.mxu0 %v8368_v2  ;;  %v6790_v41 = vor.u32 %v7681_v25, %v6789_v33  ;;  %v7736_v33 = vld [vmem:[%s8192_s22 + $0x7b4] sm:$0xf0]  ;;  %v7015_v25 = vld [vmem:[%s8192_s22 + $0x7b8] sm:$0xf0]  ;;  %v7682_v12 = vld [vmem:[%s8192_s22 + $0x604] sm:$0xf0] }
 0x21d   : > { %4538 = vmatpush.bf16.msrb.mxu0 %v6602_v8  ;;  %v6934_v8 = vor.u32 %v7717_v49, %v6933_v36  ;;  %v7159_v36 = vld [vmem:[%s8192_s22 + $0x8d8] sm:$0xf0]  ;;  %v7586_v49 = vld [vmem:[%s8192_s22 + $0x30c] sm:$0xf]  ;;  %v7700_v17 = vld [vmem:[%s8192_s22 + $0x694] sm:$0xf0] }
 0x21e   : > { %4518 = vmatmul.bf16.vlgmr.msra.gmra.mxu2 %v8368_v2  ;;  %v7162_v9 = vor.u32 %v7763_v63, %v7159_v36  ;;  %v6870_v35 = vor.u32 %v7700_v17, %v6869_v30  ;;  %v7673_v63 = vld [vmem:[%s8192_s22 + $0x5c4] sm:$0xf]  ;;  %v6799_v36 = vld [vmem:[%s8192_s22 + $0x608] sm:$0xf0]  ;;  %v7021_v17 = vld [vmem:[%s8192_s22 + $0x778] sm:$0xf] }
 0x21f   : > { %4566 = vmatpush.bf16.msrb.mxu2 %v6606_v28  ;;  %4359 = vmatpush.bf16.msrb.mxu3 %v6934_v8  ;;  %v6246_v28 = vor.u32 %v7541_v3, %v6245_v21  ;;  %v7085_v8 = vld [vmem:[%s8192_s22 + $0x800] sm:$0xf]  ;;  %v6469_v21 = vld [vmem:[%s8192_s22 + $0x310] sm:$0xf]  ;;  %v7596_v3 = vld [vmem:[%s8192_s22 + $0x354] sm:$0xf0] }
 0x220   : > { %4387 = vmatpush.bf16.msra.mxu1 %v6938_v60  ;;  %v6466_v60 = vor.u32 %v7586_v49, %v6463_v5  ;;  %v6103_v49 = vld [vmem:[%s8192_s22 + $0x80] sm:$0xf0] }
 0x221   : > { %4539 = vmatpush.bf16.msrb.mxu0 %v6530_v31  ;;  %v6170_v31 = vor.u32 %v7513_v19, %v6167_v11  ;;  %v7086_v19 = vor.u32 %v7754_v13, %v7085_v8  ;;  %v6725_v8 = vld [vmem:[%s8192_s22 + $0x530] sm:$0xf]  ;;  %v7664_v13 = vld [vmem:[%s8192_s22 + $0x574] sm:$0xf0] }
 0x223   : > { %4567 = vmatpush.bf16.msrb.mxu2 %v6534_v53  ;;  %4360 = vmatpush.bf16.msrb.mxu3 %v6862_v22  ;;  %v6174_v53 = vor.u32 %v7523_v37, %v6173_v50  ;;  %v7013_v22 = vld [vmem:[%s8192_s22 + $0x770] sm:$0xf]  ;;  %v6397_v50 = vld [vmem:[%s8192_s22 + $0x280] sm:$0xf]  ;;  %v7578_v37 = vld [vmem:[%s8192_s22 + $0x2c4] sm:$0xf0] }
 0x224   : > { %4388 = vmatpush.bf16.msra.mxu1 %v6866_v20  ;;  %v6394_v20 = vor.u32 %v7568_v57, %v6391_v38 }
 0x225   : > { %4540 = vmatpush.bf16.msrb.mxu0 %v6458_v42  ;;  %v6098_v42 = vor.u32 %v7495_v44, %v6095_v34  ;;  %v7014_v44 = vor.u32 %v7736_v33, %v7013_v22  ;;  %v7506_v22 = vld [vmem:[%s8192_s22 + $0x84] sm:$0xf0] }
 0x226   : > { %v7646_v33 = vld [vmem:[%s8192_s22 + $0x4e4] sm:$0xf0] }
 0x227   : > { %4568 = vmatpush.bf16.msrb.mxu2 %v6462_v14  ;;  %4361 = vmatpush.bf16.msrb.mxu3 %v6790_v41  ;;  %v7636_v14 = vld [vmem:[%s8192_s22 + $0x49c] sm:$0xf]  ;;  %v7718_v41 = vld [vmem:[%s8192_s22 + $0x724] sm:$0xf0] }
 0x228   : > { %4389 = vmatpush.bf16.msra.mxu1 %v6794_v29  ;;  %v7709_v29 = vld [vmem:[%s8192_s22 + $0x6e4] sm:$0xf] }
 0x229   : > { %4541 = vmatpush.bf16.msrb.mxu0 %v6386_v15  ;;  %v6722_v15 = vor.u32 %v7654_v48, %v6719_v52  ;;  %v6398_v48 = vor.u32 %v7578_v37, %v6397_v50  ;;  %v6942_v52 = vor.u32 %v7718_v41, %v6941_v56  ;;  %v7587_v37 = vld [vmem:[%s8192_s22 + $0x314] sm:$0xf]  ;;  %v6471_v56 = vld [vmem:[%s8192_s22 + $0x358] sm:$0xf0] }
 0x22b   : > { %4569 = vmatpush.bf16.msrb.mxu2 %v6390_v46  ;;  %4362 = vmatpush.bf16.msrb.mxu3 %v6718_v32  ;;  %v6650_v46 = vor.u32 %v7636_v14, %v6647_v61  ;;  %v6871_v32 = vld [vmem:[%s8192_s22 + $0x698] sm:$0xf0]  ;;  %v6253_v61 = vld [vmem:[%s8192_s22 + $0x160] sm:$0xf] }
 0x22c   : > { %4390 = vmatpush.bf16.msra.mxu1 %v6722_v15  ;;  %v7514_v15 = vld [vmem:[%s8192_s22 + $0xcc] sm:$0xf]  ;;  %v6254_v5 = vor.u32 %v7542_v7, %v6253_v61  ;;  %v6949_v7 = vld [vmem:[%s8192_s22 + $0x6e8] sm:$0xf] }
 0x22d   : > { %4542 = vmatpush.bf16.msrb.mxu0 %v6314_v51  ;;  %v6614_v51 = vor.u32 %v7632_v43, %v6613_v47  ;;  %v7691_v47 = vld [vmem:[%s8192_s22 + $0x654] sm:$0xf] }
 0x22e   : > { %v6175_v43 = vld [vmem:[%s8192_s22 + $0x110] sm:$0xf0]  ;;  %v6874_v14 = vor.u32 %v7691_v47, %v6871_v32  ;;  %v7737_v32 = vld [vmem:[%s8192_s22 + $0x7bc] sm:$0xf0] }
 0x22f   : > { %4570 = vmatpush.bf16.msrb.mxu2 %v6318_v18  ;;  %4363 = vmatpush.bf16.msrb.mxu3 %v6646_v6  ;;  %v6542_v18 = vor.u32 %v7614_v0, %v6541_v23  ;;  %v7623_v6 = vld [vmem:[%s8192_s22 + $0x434] sm:$0xf]  ;;  %v6181_v23 = vld [vmem:[%s8192_s22 + $0xd0] sm:$0xf]  ;;  %v7524_v0 = vld [vmem:[%s8192_s22 + $0x114] sm:$0xf0] }
 0x230   : > { %4391 = vmatpush.bf16.msra.mxu1 %v6650_v46  ;;  %v6615_v46 = vld [vmem:[%s8192_s22 + $0x478] sm:$0xf0]  ;;  %v6182_v38 = vor.u32 %v7524_v0, %v6181_v23  ;;  %v6879_v23 = vld [vmem:[%s8192_s22 + $0x6a0] sm:$0xf0]  ;;  %v7515_v0 = vld [vmem:[%s8192_s22 + $0xd4] sm:$0xf] }
 0x231   : > { %4543 = vmatpush.bf16.msrb.mxu0 %v6242_v16  ;;  %v7745_v16 = vld [vmem:[%s8192_s22 + $0x804] sm:$0xf]  ;;  %v6618_v57 = vor.u32 %v7623_v6, %v6615_v46  ;;  %v6877_v6 = vld [vmem:[%s8192_s22 + $0x658] sm:$0xf] }
 0x232   : > { %v7090_v11 = vor.u32 %v7745_v16, %v7087_v39  ;;  %4364 = vmatmul.bf16.vlgmr.msrb.gmra.mxu3 %v8641_v59  ;;  %v7655_v16 = vld [vmem:[%s8192_s22 + $0x534] sm:$0xf]  ;;  %v6727_v39 = vld [vmem:[%s8192_s22 + $0x578] sm:$0xf0] }
 0x233   : > { %4571 = vmatpush.bf16.msrb.mxu2 %v6246_v28  ;;  %4412 = vmatpush.bf16.msra.mxu3 %v7158_v4  ;;  %v6470_v28 = vor.u32 %v7596_v3, %v6469_v21  ;;  %v6726_v21 = vor.u32 %v7664_v13, %v6725_v8  ;;  %v6730_v3 = vor.u32 %v7655_v16, %v6727_v39  ;;  %v6183_v8 = vld [vmem:[%s8192_s22 + $0x118] sm:$0xf0]  ;;  %v6805_v16 = vld [vmem:[%s8192_s22 + $0x5c8] sm:$0xf] }
 0x234   : > { %4440 = vmatpush.bf16.msrb.mxu1 %v7162_v9  ;;  %v6802_v9 = vor.u32 %v7673_v63, %v6799_v36  ;;  %v6951_v63 = vld [vmem:[%s8192_s22 + $0x730] sm:$0xf0]  ;;  %v7533_v36 = vld [vmem:[%s8192_s22 + $0x164] sm:$0xf]  ;;  %v6186_v39 = vor.u32 %v7515_v0, %v6183_v8  ;;  %v6815_v8 = vld [vmem:[%s8192_s22 + $0x618] sm:$0xf0] }
 0x235   : > { %4544 = vmatpush.bf16.msrb.mxu0 %v6170_v31  ;;  %v7727_v31 = vld [vmem:[%s8192_s22 + $0x774] sm:$0xf]  ;;  %4392 = vmatmul.bf16.vlgmr.msra.gmra.mxu1 %v8641_v59 }
 0x236   : > { %v7018_v34 = vor.u32 %v7727_v31, %v7015_v25  ;;  %v7637_v31 = vld [vmem:[%s8192_s22 + $0x4a4] sm:$0xf]  ;;  %v6655_v25 = vld [vmem:[%s8192_s22 + $0x4e8] sm:$0xf0]  ;;  %v7675_v0 = vld [vmem:[%s8192_s22 + $0x5d4] sm:$0xf] }
 0x237   : > { %4572 = vmatpush.bf16.msrb.mxu2 %v6174_v53  ;;  %4413 = vmatpush.bf16.msra.mxu3 %v7086_v19  ;;  %v6946_v53 = vor.u32 %v7709_v29, %v6943_v45  ;;  %v7605_v19 = vld [vmem:[%s8192_s22 + $0x3a4] sm:$0xf]  ;;  %v6658_v41 = vor.u32 %v7637_v31, %v6655_v25  ;;  %v7656_v31 = vld [vmem:[%s8192_s22 + $0x53c] sm:$0xf] }
 0x238   : > { %4441 = vmatpush.bf16.msrb.mxu1 %v7090_v11  ;;  %v6543_v11 = vld [vmem:[%s8192_s22 + $0x3e8] sm:$0xf0]  ;;  %v6735_v25 = vld [vmem:[%s8192_s22 + $0x580] sm:$0xf0] }
 0x239   : > { %4545 = vmatpush.bf16.msrb.mxu0 %v6098_v42  ;;  %v7532_v42 = vld [vmem:[%s8192_s22 + $0x15c] sm:$0xf]  ;;  %v6546_v27 = vor.u32 %v7605_v19, %v6543_v11  ;;  %v7497_v19 = vld [vmem:[%s8192_s22 + $0x44] sm:$0xf]  ;;  %v6111_v11 = vld [vmem:[%s8192_s22 + $0x88] sm:$0xf0] }
 0x23a   : > { %v6250_v40 = vor.u32 %v7532_v42, %v6247_v10  ;;  %v7093_v42 = vld [vmem:[%s8192_s22 + $0x808] sm:$0xf]  ;;  %v6474_v10 = vor.u32 %v7587_v37, %v6471_v56  ;;  %v7173_v37 = vld [vmem:[%s8192_s22 + $0x8a0] sm:$0xf] }
 0x23b   : > { %4573 = vmatpush.bf16.msrb.mxu2 %v6102_v24  ;;  %4414 = vmatpush.bf16.msra.mxu3 %v7014_v44  ;;  %v6797_v24 = vld [vmem:[%s8192_s22 + $0x5c0] sm:$0xf]  ;;  %v7764_v44 = vld [vmem:[%s8192_s22 + $0x89c] sm:$0xf]  ;;  %v7774_v56 = vld [vmem:[%s8192_s22 + $0x8e4] sm:$0xf0] }
 0x23c   : > { %4546 = vmatmul.bf16.vlgmr.msrb.gmra.mxu0 %v8368_v2  ;;  %4442 = vmatpush.bf16.msrb.mxu1 %v7018_v34  ;;  %v6798_v4 = vor.u32 %v7682_v12, %v6797_v24  ;;  %v7167_v34 = vld [vmem:[%s8192_s22 + $0x8e0] sm:$0xf0]  ;;  %v7710_v12 = vld [vmem:[%s8192_s22 + $0x6ec] sm:$0xf] }
 0x23d   : > { %4594 = vmatpush.bf16.msra.mxu0 %v6610_v54  ;;  %v6325_v54 = vld [vmem:[%s8192_s22 + $0x1f0] sm:$0xf]  ;;  %v7170_v45 = vor.u32 %v7764_v44, %v7167_v34  ;;  %v7638_v34 = vld [vmem:[%s8192_s22 + $0x4ac] sm:$0xf] }
 0x23e   : > { %4574 = vmatmul.bf16.vlgmr.msrb.gmra.mxu2 %v8368_v2  ;;  %v6326_v58 = vor.u32 %v7560_v55, %v6325_v54  ;;  %v7569_v54 = vld [vmem:[%s8192_s22 + $0x284] sm:$0xf]  ;;  %v6399_v55 = vld [vmem:[%s8192_s22 + $0x2c8] sm:$0xf0]  ;;  %v7647_v44 = vld [vmem:[%s8192_s22 + $0x4ec] sm:$0xf0] }
 0x23f   : > { %4622 = vmatpush.bf16.msra.mxu2 %v6614_v51  ;;  %4415 = vmatpush.bf16.msra.mxu3 %v6942_v52  ;;  %v7496_v51 = vld [vmem:[%s8192_s22 + $0x3c] sm:$0xf]  ;;  %v7746_v52 = vld [vmem:[%s8192_s22 + $0x80c] sm:$0xf]  ;;  %v6402_v47 = vor.u32 %v7569_v54, %v6399_v55 }
 0x240   : > { %4443 = vmatpush.bf16.msrb.mxu1 %v6946_v53  ;;  %v7095_v53 = vld [vmem:[%s8192_s22 + $0x850] sm:$0xf0]  ;;  %v7103_v54 = vld [vmem:[%s8192_s22 + $0x858] sm:$0xf0] }
 0x241   : > { %4595 = vmatpush.bf16.msra.mxu0 %v6538_v62  ;;  %v6178_v62 = vor.u32 %v7514_v15, %v6175_v43  ;;  %v7728_v15 = vld [vmem:[%s8192_s22 + $0x77c] sm:$0xf]  ;;  %v7023_v43 = vld [vmem:[%s8192_s22 + $0x7c0] sm:$0xf0] }
 0x242   : > { %v7026_v61 = vor.u32 %v7728_v15, %v7023_v43  ;;  %v4183_v15 = vpop.f32.mrf.mxu2 }
 0x243   : > { %4623 = vmatpush.bf16.msra.mxu2 %v6542_v18  ;;  %4416 = vmatpush.bf16.msra.mxu3 %v6870_v35  ;;  %v6109_v18 = vld [vmem:[%s8192_s22 + $0x40] sm:$0xf]  ;;  %v6327_v35 = vld [vmem:[%s8192_s22 + $0x238] sm:$0xf0] }
 0x244   : > { %4444 = vmatpush.bf16.msrb.mxu1 %v6874_v14  ;;  %v6110_v50 = vor.u32 %v7506_v22, %v6109_v18  ;;  %v7022_v14 = vor.u32 %v7737_v32, %v7021_v17  ;;  %v6807_v18 = vld [vmem:[%s8192_s22 + $0x610] sm:$0xf0]  ;;  %v6733_v22 = vld [vmem:[%s8192_s22 + $0x538] sm:$0xf]  ;;  %v7729_v17 = vld [vmem:[%s8192_s22 + $0x784] sm:$0xf]  ;;  %v4211_v32 = vpop.f32.mrf.mxu0 }
 0x245   : > { %4596 = vmatpush.bf16.msra.mxu0 %v6466_v60  ;;  %v6106_v60 = vor.u32 %v7496_v51, %v6103_v49  ;;  %v6255_v51 = vld [vmem:[%s8192_s22 + $0x1a8] sm:$0xf0] }
 0x246   : > { %v6258_v46 = vor.u32 %v7533_v36, %v6255_v51  ;;  %v7702_v51 = vld [vmem:[%s8192_s22 + $0x6a4] sm:$0xf0] }
 0x247   : > { %4624 = vmatpush.bf16.msra.mxu2 %v6470_v28  ;;  %4417 = vmatpush.bf16.msra.mxu3 %v6798_v4  ;;  %v7773_v28 = vld [vmem:[%s8192_s22 + $0x8dc] sm:$0xf0] }
 0x248   : > { %4445 = vmatpush.bf16.msrb.mxu1 %v6802_v9  ;;  %v7166_v29 = vor.u32 %v7773_v28, %v7165_v26  ;;  %v7701_v4 = vld [vmem:[%s8192_s22 + $0x69c] sm:$0xf0]  ;;  %v7692_v9 = vld [vmem:[%s8192_s22 + $0x65c] sm:$0xf]  ;;  %v6661_v28 = vld [vmem:[%s8192_s22 + $0x4a8] sm:$0xf] }
 0x249   : > { %4597 = vmatpush.bf16.msra.mxu0 %v6394_v20  ;;  %v6653_v20 = vld [vmem:[%s8192_s22 + $0x4a0] sm:$0xf]  ;;  %v6882_v13 = vor.u32 %v7692_v9, %v6879_v23  ;;  %v7684_v23 = vld [vmem:[%s8192_s22 + $0x614] sm:$0xf0] }
 0x24b   : > { %4625 = vmatpush.bf16.msra.mxu2 %v6398_v48  ;;  %4418 = vmatpush.bf16.msra.mxu3 %v6726_v21  ;;  %v7755_v48 = vld [vmem:[%s8192_s22 + $0x84c] sm:$0xf0] }
 0x24c   : > { %4446 = vmatpush.bf16.msrb.mxu1 %v6730_v3  ;;  %v7094_v30 = vor.u32 %v7755_v48, %v7093_v42  ;;  %v7174_v42 = vor.u32 %v7774_v56, %v7173_v37  ;;  %v7101_v48 = vld [vmem:[%s8192_s22 + $0x810] sm:$0xf]  ;;  %v4213_v9 = vpop.f32.mrf.mxu0  ;;  %v7183_v37 = vld [vmem:[%s8192_s22 + $0x8f0] sm:$0xf0] }
 0x24d   : > { %4598 = vmatpush.bf16.msra.mxu0 %v6322_v1  ;;  %v6654_v1 = vor.u32 %v7646_v33, %v6653_v20  ;;  %v6114_v20 = vor.u32 %v7497_v19, %v6111_v11  ;;  %v7665_v33 = vld [vmem:[%s8192_s22 + $0x57c] sm:$0xf0]  ;;  %v7666_v11 = vld [vmem:[%s8192_s22 + $0x584] sm:$0xf0] }
 0x24e   : > { %v6734_v26 = vor.u32 %v7665_v33, %v6733_v22  ;;  %v6669_v33 = vld [vmem:[%s8192_s22 + $0x4b0] sm:$0xf] }
 0x24f   : > { %4626 = vmatpush.bf16.msra.mxu2 %v6326_v58  ;;  %4419 = vmatpush.bf16.msra.mxu3 %v6654_v1  ;;  %v7551_v58 = vld [vmem:[%s8192_s22 + $0x1f4] sm:$0xf]  ;;  %v7765_v1 = vld [vmem:[%s8192_s22 + $0x8a4] sm:$0xf] }
 0x250   : > { %4447 = vmatpush.bf16.msrb.mxu1 %v6658_v41  ;;  %v6330_v24 = vor.u32 %v7551_v58, %v6327_v35  ;;  %v7175_v41 = vld [vmem:[%s8192_s22 + $0x8e8] sm:$0xf0]  ;;  %v6957_v35 = vld [vmem:[%s8192_s22 + $0x6f0] sm:$0xf] }
 0x251   : > { %4599 = vmatpush.bf16.msra.mxu0 %v6250_v40  ;;  %v7098_v40 = vor.u32 %v7746_v52, %v7095_v53  ;;  %v7756_v52 = vld [vmem:[%s8192_s22 + $0x854] sm:$0xf0]  ;;  %v7747_v53 = vld [vmem:[%s8192_s22 + $0x814] sm:$0xf] }
 0x252   : > { %4420 = vmatmul.bf16.vlgmr.msra.gmra.mxu3 %v8641_v59  ;;  %v7102_v55 = vor.u32 %v7756_v52, %v7101_v48  ;;  %v7109_v52 = vld [vmem:[%s8192_s22 + $0x818] sm:$0xf] }
 0x253   : > { %4627 = vmatpush.bf16.msra.mxu2 %v6254_v5  ;;  %4468 = vmatpush.bf16.msrb.mxu3 %v7166_v29  ;;  %v6954_v5 = vor.u32 %v7710_v12, %v6951_v63  ;;  %v6662_v29 = vor.u32 %v7647_v44, %v6661_v28  ;;  %v6885_v63 = vld [vmem:[%s8192_s22 + $0x660] sm:$0xf]  ;;  %v7181_v28 = vld [vmem:[%s8192_s22 + $0x8a8] sm:$0xf] }
 0x254   : > { %4496 = vmatpush.bf16.msra.mxu1 %v7170_v45 }
 0x255   : > { %4600 = vmatpush.bf16.msra.mxu0 %v6178_v62  ;;  %4448 = vmatmul.bf16.vlgmr.msrb.gmra.mxu1 %v8641_v59  ;;  %v7719_v62 = vld [vmem:[%s8192_s22 + $0x72c] sm:$0xf0] }
 0x256   : > { %v6950_v49 = vor.u32 %v7719_v62, %v6949_v7  ;;  %v6959_v7 = vld [vmem:[%s8192_s22 + $0x738] sm:$0xf0] }
 0x257   : > { %4628 = vmatpush.bf16.msra.mxu2 %v6182_v38  ;;  %4469 = vmatpush.bf16.msrb.mxu3 %v7094_v30  ;;  %v7674_v38 = vld [vmem:[%s8192_s22 + $0x5cc] sm:$0xf]  ;;  %v7106_v30 = vor.u32 %v7747_v53, %v7103_v54  ;;  %v7757_v53 = vld [vmem:[%s8192_s22 + $0x85c] sm:$0xf0]  ;;  %v7748_v54 = vld [vmem:[%s8192_s22 + $0x81c] sm:$0xf] }
 0x258   : > { %4497 = vmatpush.bf16.msra.mxu1 %v7098_v40  ;;  %v6810_v3 = vor.u32 %v7674_v38, %v6807_v18  ;;  %v7029_v40 = vld [vmem:[%s8192_s22 + $0x780] sm:$0xf]  ;;  %v6818_v38 = vor.u32 %v7675_v0, %v6815_v8 }
 0x259   : > { %4601 = vmatpush.bf16.msra.mxu0 %v6106_v60  ;;  %v6878_v60 = vor.u32 %v7701_v4, %v6877_v6  ;;  %v6886_v6 = vor.u32 %v7702_v51, %v6885_v63  ;;  %v6813_v4 = vld [vmem:[%s8192_s22 + $0x5d0] sm:$0xf]  ;;  %v6741_v18 = vld [vmem:[%s8192_s22 + $0x540] sm:$0xf]  ;;  %v7712_v63 = vld [vmem:[%s8192_s22 + $0x6fc] sm:$0xf] }
 0x25a   : > { %v6742_v22 = vor.u32 %v7666_v11, %v6741_v18  ;;  %v6823_v18 = vld [vmem:[%s8192_s22 + $0x620] sm:$0xf0] }
 0x25b   : > { %4629 = vmatpush.bf16.msra.mxu2 %v6110_v50  ;;  %4470 = vmatpush.bf16.msrb.mxu3 %v7022_v14  ;;  %v6663_v50 = vld [vmem:[%s8192_s22 + $0x4f0] sm:$0xf0]  ;;  %v7720_v14 = vld [vmem:[%s8192_s22 + $0x734] sm:$0xf0] }
 0x25c   : > { %4602 = vmatmul.bf16.vlgmr.msra.gmra.mxu0 %v8368_v2  ;;  %4498 = vmatpush.bf16.msra.mxu1 %v7026_v61  ;;  %v6666_v45 = vor.u32 %v7638_v34, %v6663_v50  ;;  %v7711_v61 = vld [vmem:[%s8192_s22 + $0x6f4] sm:$0xf]  ;;  %v6958_v62 = vor.u32 %v7720_v14, %v6957_v35  ;;  %v7775_v34 = vld [vmem:[%s8192_s22 + $0x8ec] sm:$0xf0]  ;;  %v7766_v50 = vld [vmem:[%s8192_s22 + $0x8ac] sm:$0xf] }
 0x25d   : > { %4650 = vmatpush.bf16.msrb.mxu0 %v6618_v57  ;;  %v7683_v57 = vld [vmem:[%s8192_s22 + $0x60c] sm:$0xf0]  ;;  %v6962_v12 = vor.u32 %v7711_v61, %v6959_v7  ;;  %v7186_v48 = vor.u32 %v7766_v50, %v7183_v37  ;;  %v7649_v50 = vld [vmem:[%s8192_s22 + $0x4fc] sm:$0xf0] }
 0x25e   : > { %4630 = vmatmul.bf16.vlgmr.msra.gmra.mxu2 %v8368_v2  ;;  %v6806_v21 = vor.u32 %v7683_v57, %v6805_v16  ;;  %v6814_v57 = vor.u32 %v7684_v23, %v6813_v4  ;;  %v7694_v4 = vld [vmem:[%s8192_s22 + $0x66c] sm:$0xf] }
 0x25f   : > { %4471 = vmatpush.bf16.msrb.mxu3 %v6950_v49  ;;  %v7693_v49 = vld [vmem:[%s8192_s22 + $0x664] sm:$0xf] }
 0x260   : > { %4499 = vmatpush.bf16.msra.mxu1 %v6954_v5  ;;  %v6887_v5 = vld [vmem:[%s8192_s22 + $0x6a8] sm:$0xf0] }
 0x261   : > { %4651 = vmatpush.bf16.msrb.mxu0 %v6546_v27  ;;  %v6738_v27 = vor.u32 %v7656_v31, %v6735_v25  ;;  %v7648_v31 = vld [vmem:[%s8192_s22 + $0x4f4] sm:$0xf0]  ;;  %v4267_v25 = vpop.f32.mrf.mxu0 }
 0x263   : > { %4472 = vmatpush.bf16.msrb.mxu3 %v6878_v60  ;;  %v4185_v60 = vpop.f32.mrf.mxu2 }
 0x264   : > { %4500 = vmatpush.bf16.msra.mxu1 %v6882_v13 }
 0x265   : > { %4652 = vmatpush.bf16.msrb.mxu0 %v6474_v10  ;;  %v7178_v10 = vor.u32 %v7765_v1, %v7175_v41 }
 0x267   : > { %4473 = vmatpush.bf16.msrb.mxu3 %v6806_v21  ;;  %v7657_v21 = vld [vmem:[%s8192_s22 + $0x544] sm:$0xf] }
 0x268   : > { %4501 = vmatpush.bf16.msra.mxu1 %v6810_v3  ;;  %v6743_v3 = vld [vmem:[%s8192_s22 + $0x588] sm:$0xf0] }
 0x269   : > { %4653 = vmatpush.bf16.msrb.mxu0 %v6402_v47  ;;  %v7031_v47 = vld [vmem:[%s8192_s22 + $0x7c8] sm:$0xf0] }
 0x26a   : > { %v7034_v58 = vor.u32 %v7729_v17, %v7031_v47  ;;  %v7739_v47 = vld [vmem:[%s8192_s22 + $0x7cc] sm:$0xf0] }
 0x26b   : > { %4474 = vmatpush.bf16.msrb.mxu3 %v6734_v26  ;;  %v7639_v26 = vld [vmem:[%s8192_s22 + $0x4b4] sm:$0xf]  ;;  %v4239_v1 = vpop.f32.mrf.mxu2 }
 0x26c   : > { %4502 = vmatpush.bf16.msra.mxu1 %v6738_v27  ;;  %v6671_v27 = vld [vmem:[%s8192_s22 + $0x4f8] sm:$0xf0] }
 0x26d   : > { %4654 = vmatpush.bf16.msrb.mxu0 %v6330_v24 }
 0x26f   : > { %4475 = vmatpush.bf16.msrb.mxu3 %v6662_v29  ;;  %v4225_v24 = vpop.f32.mrf.mxu1  ;;  %v6670_v29 = vor.u32 %v7648_v31, %v6669_v33  ;;  %v7658_v33 = vld [vmem:[%s8192_s22 + $0x54c] sm:$0xf]  ;;  %v6751_v31 = vld [vmem:[%s8192_s22 + $0x590] sm:$0xf0] }
 0x270   : > { %4503 = vmatpush.bf16.msra.mxu1 %v6666_v45  ;;  %v4226_v36 = vadd.f32 %v4225_v24, %v4211_v32  ;;  %v6674_v45 = vor.u32 %v7639_v26, %v6671_v27  ;;  %v7730_v32 = vld [vmem:[%s8192_s22 + $0x78c] sm:$0xf]  ;;  %v6965_v24 = vld [vmem:[%s8192_s22 + $0x6f8] sm:$0xf] }
 0x271   : > { %4655 = vmatpush.bf16.msrb.mxu0 %v6258_v46  ;;  %v6890_v46 = vor.u32 %v7693_v49, %v6887_v5  ;;  %v6893_v5 = vld [vmem:[%s8192_s22 + $0x668] sm:$0xf] }
 0x272   : > { %4476 = vmatmul.bf16.vlgmr.msrb.gmra.mxu3 %v8641_v59  ;;  %4679 = vst [vmem:[%s8909_s30 + $0x8] sm:$0xff] %v4226_v36  ;;  %v6967_v36 = vld [vmem:[%s8192_s22 + $0x740] sm:$0xf0] }
 0x273   : > { %4524 = vmatpush.bf16.msra.mxu3 %v7174_v42  ;;  %4504 = vmatmul.bf16.vlgmr.msra.gmra.mxu1 %v8641_v59  ;;  %v6970_v49 = vor.u32 %v7712_v63, %v6967_v36  ;;  %v6975_v63 = vld [vmem:[%s8192_s22 + $0x748] sm:$0xf0] }
 0x274   : > { %4552 = vmatpush.bf16.msrb.mxu1 %v7178_v10  ;;  %v4197_v13 = vpop.f32.mrf.mxu3  ;;  %v7182_v10 = vor.u32 %v7775_v34, %v7181_v28  ;;  %v6677_v34 = vld [vmem:[%s8192_s22 + $0x4b8] sm:$0xf] }
 0x275   : > { %4656 = vmatpush.bf16.msrb.mxu0 %v6186_v39  ;;  %v4198_v16 = vadd.f32 %v4197_v13, %v4183_v15  ;;  %v7039_v15 = vld [vmem:[%s8192_s22 + $0x7d0] sm:$0xf0] }
 0x276   : > { %v7042_v7 = vor.u32 %v7730_v32, %v7039_v15 }
 0x277   : > { %4525 = vmatpush.bf16.msra.mxu3 %v7102_v55  ;;  %v4227_v39 = vpop.f32.mrf.mxu1  ;;  %4678 = vst [vmem:[%s8909_s30] sm:$0xff] %v4198_v16  ;;  %v7111_v55 = vld [vmem:[%s8192_s22 + $0x860] sm:$0xf0]  ;;  %v6821_v16 = vld [vmem:[%s8192_s22 + $0x5d8] sm:$0xf] }
 0x278   : > { %4553 = vmatpush.bf16.msrb.mxu1 %v7106_v30  ;;  %v4228_v19 = vadd.f32 %v4227_v39, %v4213_v9  ;;  %v7110_v30 = vor.u32 %v7757_v53, %v7109_v52  ;;  %v6895_v9 = vld [vmem:[%s8192_s22 + $0x6b0] sm:$0xf0] }
 0x279   : > { %4657 = vmatpush.bf16.msrb.mxu0 %v6114_v20  ;;  %v6746_v20 = vor.u32 %v7657_v21, %v6743_v3  ;;  %v6898_v13 = vor.u32 %v7694_v4, %v6895_v9  ;;  %v6749_v3 = vld [vmem:[%s8192_s22 + $0x548] sm:$0xf]  ;;  %v6903_v4 = vld [vmem:[%s8192_s22 + $0x6b8] sm:$0xf0] }
 0x27a   : > { %4697 = vst [vmem:[%s8909_s30 + $0x98] sm:$0xff] %v4228_v19 }
 0x27c   : > { %4658 = vmatmul.bf16.vlgmr.msrb.gmra.mxu0 %v8368_v2  ;;  %v7738_v2 = vld [vmem:[%s8192_s22 + $0x7c4] sm:$0xf0]  ;;  %4554 = vmatpush.bf16.msrb.mxu1 %v7034_v58  ;;  %v4199_v44 = vpop.f32.mrf.mxu3 }
 0x27d   : > { %v7030_v43 = vor.u32 %v7738_v2, %v7029_v40  ;;  %v4200_v56 = vadd.f32 %v4199_v44, %v4185_v60  ;;  %v7114_v40 = vor.u32 %v7748_v54, %v7111_v55  ;;  %v7037_v2 = vld [vmem:[%s8192_s22 + $0x788] sm:$0xf]  ;;  %v6754_v44 = vor.u32 %v7658_v33, %v6751_v31 }
 0x27e   : > { %v7038_v61 = vor.u32 %v7739_v47, %v7037_v2  ;;  %v7758_v2 = vld [vmem:[%s8192_s22 + $0x864] sm:$0xf0]  ;;  %v7119_v47 = vld [vmem:[%s8192_s22 + $0x868] sm:$0xf0] }
 0x27f   : > { %4526 = vmatpush.bf16.msra.mxu3 %v7030_v43  ;;  %v4281_v41 = vpop.f32.mrf.mxu1  ;;  %4696 = vst [vmem:[%s8909_s30 + $0x90] sm:$0xff] %v4200_v56  ;;  %v4269_v43 = vpop.f32.mrf.mxu0  ;;  %v7640_v56 = vld [vmem:[%s8192_s22 + $0x4bc] sm:$0xf] }
 0x280   : > { %4555 = vmatpush.bf16.msrb.mxu1 %v6962_v12  ;;  %v4282_v42 = vadd.f32 %v4281_v41, %v4267_v25  ;;  %v7721_v12 = vld [vmem:[%s8192_s22 + $0x73c] sm:$0xf0]  ;;  %v7189_v41 = vld [vmem:[%s8192_s22 + $0x8b0] sm:$0xf] }
 0x281   : > { %v6966_v51 = vor.u32 %v7721_v12, %v6965_v24  ;;  %v6973_v24 = vld [vmem:[%s8192_s22 + $0x700] sm:$0xf]  ;;  %v7713_v12 = vld [vmem:[%s8192_s22 + $0x704] sm:$0xf] }
 0x282   : > { %4681 = vst [vmem:[%s8909_s30 + $0x18] sm:$0xff] %v4282_v42  ;;  %v7191_v42 = vld [vmem:[%s8192_s22 + $0x8f8] sm:$0xf0] }
 0x283   : > { %4527 = vmatpush.bf16.msra.mxu3 %v6958_v62  ;;  %v4241_v62 = vpop.f32.mrf.mxu2 }
 0x284   : > { %4556 = vmatpush.bf16.msrb.mxu1 %v6890_v46  ;;  %v4253_v17 = vpop.f32.mrf.mxu3  ;;  %v7703_v46 = vld [vmem:[%s8192_s22 + $0x6ac] sm:$0xf0] }
 0x285   : > { %v4254_v58 = vadd.f32 %v4253_v17, %v4239_v1  ;;  %v6894_v60 = vor.u32 %v7703_v46, %v6893_v5  ;;  %v6679_v1 = vld [vmem:[%s8192_s22 + $0x500] sm:$0xf0]  ;;  %v7695_v46 = vld [vmem:[%s8192_s22 + $0x674] sm:$0xf] }
 0x286   : > { %v7749_v17 = vld [vmem:[%s8192_s22 + $0x824] sm:$0xf] }
 0x287   : > { %4528 = vmatpush.bf16.msra.mxu3 %v6886_v6  ;;  %v4283_v35 = vpop.f32.mrf.mxu1  ;;  %4680 = vst [vmem:[%s8909_s30 + $0x10] sm:$0xff] %v4254_v58  ;;  %v4323_v23 = vpop.f32.mrf.mxu0  ;;  %v7122_v15 = vor.u32 %v7749_v17, %v7119_v47  ;;  %v7740_v58 = vld [vmem:[%s8192_s22 + $0x7d4] sm:$0xf0] }
 0x288   : > { %4557 = vmatpush.bf16.msrb.mxu1 %v6818_v38  ;;  %v4284_v14 = vadd.f32 %v4283_v35, %v4269_v43  ;;  %v7676_v38 = vld [vmem:[%s8192_s22 + $0x5dc] sm:$0xf]  ;;  %v7045_v43 = vld [vmem:[%s8192_s22 + $0x790] sm:$0xf]  ;;  %v7731_v35 = vld [vmem:[%s8192_s22 + $0x794] sm:$0xf] }
 0x289   : > { %v6826_v21 = vor.u32 %v7676_v38, %v6823_v18 }
 0x28a   : > { %4699 = vst [vmem:[%s8909_s30 + $0xa8] sm:$0xff] %v4284_v14  ;;  %v7047_v14 = vld [vmem:[%s8192_s22 + $0x7d8] sm:$0xf0] }
 0x28b   : > { %4529 = vmatpush.bf16.msra.mxu3 %v6814_v57  ;;  %v7685_v57 = vld [vmem:[%s8192_s22 + $0x61c] sm:$0xf0]  ;;  %v4295_v19 = vpop.f32.mrf.mxu2 }
 0x28c   : > { %4558 = vmatpush.bf16.msrb.mxu1 %v6746_v20  ;;  %v4255_v6 = vpop.f32.mrf.mxu3  ;;  %v6822_v11 = vor.u32 %v7685_v57, %v6821_v16  ;;  %v7667_v20 = vld [vmem:[%s8192_s22 + $0x58c] sm:$0xf0]  ;;  %v7677_v16 = vld [vmem:[%s8192_s22 + $0x5e4] sm:$0xf] }
 0x28d   : > { %v4256_v0 = vadd.f32 %v4255_v6, %v4241_v62  ;;  %v6750_v28 = vor.u32 %v7667_v20, %v6749_v3  ;;  %v7722_v62 = vld [vmem:[%s8192_s22 + $0x744] sm:$0xf0]  ;;  %v7704_v6 = vld [vmem:[%s8192_s22 + $0x6b4] sm:$0xf0]  ;;  %v7659_v3 = vld [vmem:[%s8192_s22 + $0x554] sm:$0xf] }
 0x28e   : > { %v6974_v36 = vor.u32 %v7722_v62, %v6973_v24 }
 0x28f   : > { %4530 = vmatpush.bf16.msra.mxu3 %v6742_v22  ;;  %4698 = vst [vmem:[%s8909_s30 + $0xa0] sm:$0xff] %v4256_v0  ;;  %v4337_v8 = vpop.f32.mrf.mxu1  ;;  %v4325_v26 = vpop.f32.mrf.mxu0 }
 0x290   : > { %4559 = vmatpush.bf16.msrb.mxu1 %v6674_v45  ;;  %v4338_v39 = vadd.f32 %v4337_v8, %v4323_v23  ;;  %v7767_v45 = vld [vmem:[%s8192_s22 + $0x8b4] sm:$0xf]  ;;  %v6906_v8 = vor.u32 %v7695_v46, %v6903_v4 }
 0x291   : > { %v7194_v55 = vor.u32 %v7767_v45, %v7191_v42 }
 0x292   : > { %4683 = vst [vmem:[%s8909_s30 + $0x28] sm:$0xff] %v4338_v39  ;;  %v6831_v39 = vld [vmem:[%s8192_s22 + $0x628] sm:$0xf0] }
 0x293   : > { %4531 = vmatpush.bf16.msra.mxu3 %v6670_v29  ;;  %4560 = vmatmul.bf16.vlgmr.msrb.gmra.mxu1 %v8641_v59  ;;  %v7776_v29 = vld [vmem:[%s8192_s22 + $0x8f4] sm:$0xf0]  ;;  %v4297_v52 = vpop.f32.mrf.mxu2  ;;  %v6834_v18 = vor.u32 %v7677_v16, %v6831_v39 }
 0x294   : > { %4608 = vmatpush.bf16.msra.mxu1 %v7186_v48  ;;  %v4309_v22 = vpop.f32.mrf.mxu3  ;;  %v6682_v48 = vor.u32 %v7640_v56, %v6679_v1  ;;  %v7190_v54 = vor.u32 %v7776_v29, %v7189_v41 }
 0x295   : > { %v4310_v25 = vadd.f32 %v4309_v22, %v4295_v19  ;;  %v6757_v19 = vld [vmem:[%s8192_s22 + $0x550] sm:$0xf]  ;;  %v6759_v22 = vld [vmem:[%s8192_s22 + $0x598] sm:$0xf0] }
 0x296   : > { %4532 = vmatmul.bf16.vlgmr.msra.gmra.mxu3 %v8641_v59 }
 0x297   : > { %4580 = vmatpush.bf16.msrb.mxu3 %v7182_v10  ;;  %4682 = vst [vmem:[%s8909_s30 + $0x20] sm:$0xff] %v4310_v25  ;;  %v4339_v27 = vpop.f32.mrf.mxu1  ;;  %v6678_v10 = vor.u32 %v7649_v50, %v6677_v34  ;;  %v4379_v5 = vpop.f32.mrf.mxu0  ;;  %v7641_v34 = vld [vmem:[%s8192_s22 + $0x4c4] sm:$0xf]  ;;  %v6687_v50 = vld [vmem:[%s8192_s22 + $0x508] sm:$0xf0] }
 0x298   : > { %4609 = vmatpush.bf16.msra.mxu1 %v7114_v40  ;;  %v4340_v37 = vadd.f32 %v4339_v27, %v4325_v26  ;;  %v6762_v27 = vor.u32 %v7659_v3, %v6759_v22  ;;  %v6690_v56 = vor.u32 %v7641_v34, %v6687_v50 }
 0x29a   : > { %4701 = vst [vmem:[%s8909_s30 + $0xb8] sm:$0xff] %v4340_v37 }
 0x29b   : > { %4581 = vmatpush.bf16.msrb.mxu3 %v7110_v30  ;;  %v7117_v30 = vld [vmem:[%s8192_s22 + $0x820] sm:$0xf]  ;;  %v4351_v57 = vpop.f32.mrf.mxu2 }
 0x29c   : > { %4610 = vmatpush.bf16.msra.mxu1 %v7042_v7  ;;  %v4311_v53 = vpop.f32.mrf.mxu3  ;;  %v7118_v32 = vor.u32 %v7758_v2, %v7117_v30  ;;  %v7050_v7 = vor.u32 %v7731_v35, %v7047_v14 }
 0x29d   : > { %v4312_v40 = vadd.f32 %v4311_v53, %v4297_v52 }
 0x29f   : > { %4582 = vmatpush.bf16.msrb.mxu3 %v7038_v61  ;;  %4700 = vst [vmem:[%s8909_s30 + $0xb0] sm:$0xff] %v4312_v40  ;;  %v7046_v61 = vor.u32 %v7740_v58, %v7045_v43  ;;  %v4381_v33 = vpop.f32.mrf.mxu0 }
 0x2a0   : > { %4611 = vmatpush.bf16.msra.mxu1 %v6970_v49  ;;  %v6901_v49 = vld [vmem:[%s8192_s22 + $0x670] sm:$0xf] }
 0x2a1   : > { %v6902_v0 = vor.u32 %v7704_v6, %v6901_v49 }
 0x2a3   : > { %4583 = vmatpush.bf16.msrb.mxu3 %v6966_v51  ;;  %v6978_v51 = vor.u32 %v7713_v12, %v6975_v63  ;;  %v4353_v1 = vpop.f32.mrf.mxu2 }
 0x2a4   : > { %4612 = vmatpush.bf16.msra.mxu1 %v6898_v13  ;;  %v7686_v13 = vld [vmem:[%s8192_s22 + $0x624] sm:$0xf0] }
 0x2a7   : > { %4584 = vmatpush.bf16.msrb.mxu3 %v6894_v60  ;;  %v6829_v60 = vld [vmem:[%s8192_s22 + $0x5e0] sm:$0xf]  ;;  %v4435_v45 = vpop.f32.mrf.mxu0 }
 0x2a8   : > { %4613 = vmatpush.bf16.msra.mxu1 %v6826_v21  ;;  %v6830_v38 = vor.u32 %v7686_v13, %v6829_v60  ;;  %v7668_v21 = vld [vmem:[%s8192_s22 + $0x594] sm:$0xf0] }
 0x2a9   : > { %v6758_v26 = vor.u32 %v7668_v21, %v6757_v19 }
 0x2ab   : > { %4585 = vmatpush.bf16.msrb.mxu3 %v6822_v11 }
 0x2ac   : > { %4614 = vmatpush.bf16.msra.mxu1 %v6754_v44  ;;  %v7650_v44 = vld [vmem:[%s8192_s22 + $0x504] sm:$0xf0] }
 0x2af   : > { %4586 = vmatpush.bf16.msrb.mxu3 %v6750_v28  ;;  %v6685_v28 = vld [vmem:[%s8192_s22 + $0x4c0] sm:$0xf] }
 0x2b0   : > { %4615 = vmatpush.bf16.msra.mxu1 %v6682_v48  ;;  %v6686_v37 = vor.u32 %v7650_v44, %v6685_v28  ;;  %v4407_v48 = vpop.f32.mrf.mxu2 }
 0x2b2   : > { %v4393_v9 = vpop.f32.mrf.mxu1 }
 0x2b3   : > { %4587 = vmatpush.bf16.msrb.mxu3 %v6678_v10  ;;  %4616 = vmatmul.bf16.vlgmr.msra.gmra.mxu1 %v8641_v59  ;;  %v4394_v23 = vadd.f32 %v4393_v9, %v4379_v5 }
 0x2b4   : > { %4664 = vmatpush.bf16.msrb.mxu1 %v7194_v55 }
 0x2b5   : > { %4685 = vst [vmem:[%s8909_s30 + $0x38] sm:$0xff] %v4394_v23  ;;  %v4365_v11 = vpop.f32.mrf.mxu3 }
 0x2b6   : > { %4588 = vmatmul.bf16.vlgmr.msrb.gmra.mxu3 %v8641_v59  ;;  %v4366_v20 = vadd.f32 %v4365_v11, %v4351_v57 }
 0x2b7   : > { %4636 = vmatpush.bf16.msra.mxu3 %v7190_v54  ;;  %v4437_v54 = vpop.f32.mrf.mxu0 }
 0x2b8   : > { %4665 = vmatpush.bf16.msrb.mxu1 %v7122_v15  ;;  %4684 = vst [vmem:[%s8909_s30 + $0x30] sm:$0xff] %v4366_v20  ;;  %v4409_v40 = vpop.f32.mrf.mxu2 }
 0x2ba   : > { %v4395_v31 = vpop.f32.mrf.mxu1 }
 0x2bb   : > { %4637 = vmatpush.bf16.msra.mxu3 %v7118_v32  ;;  %v4396_v25 = vadd.f32 %v4395_v31, %v4381_v33 }
 0x2bc   : > { %4666 = vmatpush.bf16.msrb.mxu1 %v7050_v7 }
 0x2bd   : > { %4703 = vst [vmem:[%s8909_s30 + $0xc8] sm:$0xff] %v4396_v25  ;;  %v4367_v41 = vpop.f32.mrf.mxu3 }
 0x2be   : > { %v4368_v29 = vadd.f32 %v4367_v41, %v4353_v1 }
 0x2bf   : > { %4638 = vmatpush.bf16.msra.mxu3 %v7046_v61 }
 0x2c0   : > { %4667 = vmatpush.bf16.msrb.mxu1 %v6978_v51  ;;  %4702 = vst [vmem:[%s8909_s30 + $0xc0] sm:$0xff] %v4368_v29  ;;  %v4463_v15 = vpop.f32.mrf.mxu2 }
 0x2c3   : > { %4639 = vmatpush.bf16.msra.mxu3 %v6974_v36 }
 0x2c4   : > { %4668 = vmatpush.bf16.msrb.mxu1 %v6906_v8 }
 0x2c7   : > { %4640 = vmatpush.bf16.msra.mxu3 %v6902_v0 }
 0x2c8   : > { %4669 = vmatpush.bf16.msrb.mxu1 %v6834_v18  ;;  %v4465_v7 = vpop.f32.mrf.mxu2 }
 0x2cb   : > { %4641 = vmatpush.bf16.msra.mxu3 %v6830_v38 }
 0x2cc   : > { %4670 = vmatpush.bf16.msrb.mxu1 %v6762_v27 }
 0x2cf   : > { %4642 = vmatpush.bf16.msra.mxu3 %v6758_v26 }
 0x2d0   : > { %4671 = vmatpush.bf16.msrb.mxu1 %v6690_v56  ;;  %v4519_v51 = vpop.f32.mrf.mxu2 }
 0x2d2   : > { %v4449_v42 = vpop.f32.mrf.mxu1 }
 0x2d3   : > { %4643 = vmatpush.bf16.msra.mxu3 %v6686_v37  ;;  %4672 = vmatmul.bf16.vlgmr.msrb.gmra.mxu1 %v8641_v59  ;;  %v4450_v10 = vadd.f32 %v4449_v42, %v4435_v45 }
 0x2d5   : > { %4687 = vst [vmem:[%s8909_s30 + $0x48] sm:$0xff] %v4450_v10  ;;  %v4421_v52 = vpop.f32.mrf.mxu3 }
 0x2d6   : > { %4644 = vmatmul.bf16.vlgmr.msra.gmra.mxu3 %v8641_v59  ;;  %v4422_v53 = vadd.f32 %v4421_v52, %v4407_v48  ;;  %v4491_v59 = vpop.f32.mrf.mxu0 }
 0x2d8   : > { %4686 = vst [vmem:[%s8909_s30 + $0x40] sm:$0xff] %v4422_v53  ;;  %v4521_v9 = vpop.f32.mrf.mxu2 }
 0x2da   : > { %v4451_v55 = vpop.f32.mrf.mxu1 }
 0x2db   : > { %v4452_v30 = vadd.f32 %v4451_v55, %v4437_v54 }
 0x2dd   : > { %4705 = vst [vmem:[%s8909_s30 + $0xd8] sm:$0xff] %v4452_v30  ;;  %v4423_v2 = vpop.f32.mrf.mxu3 }
 0x2de   : > { %v4424_v17 = vadd.f32 %v4423_v2, %v4409_v40  ;;  %v4493_v35 = vpop.f32.mrf.mxu0 }
 0x2e0   : > { %4704 = vst [vmem:[%s8909_s30 + $0xd0] sm:$0xff] %v4424_v17  ;;  %v4575_v16 = vpop.f32.mrf.mxu2 }
 0x2e6   : > { %v4547_v12 = vpop.f32.mrf.mxu0 }
 0x2e8   : > { %v4577_v11 = vpop.f32.mrf.mxu2 }
 0x2ee   : > { %v4549_v6 = vpop.f32.mrf.mxu0 }
 0x2f0   : > { %v4505_v47 = vpop.f32.mrf.mxu1  ;;  %v4631_v31 = vpop.f32.mrf.mxu2 }
 0x2f1   : > { %v4506_v32 = vadd.f32 %v4505_v47, %v4491_v59 }
 0x2f3   : > { %4689 = vst [vmem:[%s8909_s30 + $0x58] sm:$0xff] %v4506_v32 }
 0x2f5   : > { %v4477_v43 = vpop.f32.mrf.mxu3 }
 0x2f6   : > { %v4478_v58 = vadd.f32 %v4477_v43, %v4463_v15  ;;  %v4603_v8 = vpop.f32.mrf.mxu0 }
 0x2f8   : > { %v4507_v14 = vpop.f32.mrf.mxu1  ;;  %4688 = vst [vmem:[%s8909_s30 + $0x50] sm:$0xff] %v4478_v58  ;;  %v4633_v34 = vpop.f32.mrf.mxu2 }
 0x2f9   : > { %v4508_v61 = vadd.f32 %v4507_v14, %v4493_v35 }
 0x2fb   : > { %4707 = vst [vmem:[%s8909_s30 + $0xe8] sm:$0xff] %v4508_v61 }
 0x2fd   : > { %v4479_v24 = vpop.f32.mrf.mxu3 }
 0x2fe   : > { %v4480_v62 = vadd.f32 %v4479_v24, %v4465_v7  ;;  %v4605_v38 = vpop.f32.mrf.mxu0 }
 0x300   : > { %4706 = vst [vmem:[%s8909_s30 + $0xe0] sm:$0xff] %v4480_v62 }
 0x306   : > { %v4659_v22 = vpop.f32.mrf.mxu0 }
 0x30e   : > { %v4661_v27 = vpop.f32.mrf.mxu0 }
 0x310   : > { %v4561_v63 = vpop.f32.mrf.mxu1 }
 0x311   : > { %v4562_v36 = vadd.f32 %v4561_v63, %v4547_v12 }
 0x313   : > { %4691 = vst [vmem:[%s8909_s30 + $0x68] sm:$0xff] %v4562_v36 }
 0x318   : > { %v4563_v46 = vpop.f32.mrf.mxu1 }
 0x319   : > { %v4533_v49 = vpop.f32.mrf.mxu3  ;;  %v4564_v4 = vadd.f32 %v4563_v46, %v4549_v6 }
 0x31a   : > { %v4534_v5 = vadd.f32 %v4533_v49, %v4519_v51 }
 0x31b   : > { %4709 = vst [vmem:[%s8909_s30 + $0xf8] sm:$0xff] %v4564_v4 }
 0x31c   : > { %4690 = vst [vmem:[%s8909_s30 + $0x60] sm:$0xff] %v4534_v5 }
 0x321   : > { %v4535_v23 = vpop.f32.mrf.mxu3 }
 0x322   : > { %v4536_v0 = vadd.f32 %v4535_v23, %v4521_v9 }
 0x324   : > { %4708 = vst [vmem:[%s8909_s30 + $0xf0] sm:$0xff] %v4536_v0 }
 0x330   : > { %v4617_v60 = vpop.f32.mrf.mxu1 }
 0x331   : > { %v4618_v13 = vadd.f32 %v4617_v60, %v4603_v8 }
 0x333   : > { %4693 = vst [vmem:[%s8909_s30 + $0x78] sm:$0xff] %v4618_v13 }
 0x338   : > { %v4619_v18 = vpop.f32.mrf.mxu1 }
 0x339   : > { %v4589_v39 = vpop.f32.mrf.mxu3  ;;  %v4620_v19 = vadd.f32 %v4619_v18, %v4605_v38 }
 0x33a   : > { %v4590_v57 = vadd.f32 %v4589_v39, %v4575_v16 }
 0x33b   : > { %4711 = vst [vmem:[%s8909_s30 + $0x108] sm:$0xff] %v4620_v19 }
 0x33c   : > { %4692 = vst [vmem:[%s8909_s30 + $0x70] sm:$0xff] %v4590_v57 }
 0x341   : > { %v4591_v21 = vpop.f32.mrf.mxu3 }
 0x342   : > { %v4592_v3 = vadd.f32 %v4591_v21, %v4577_v11 }
 0x344   : > { %4710 = vst [vmem:[%s8909_s30 + $0x100] sm:$0xff] %v4592_v3 }
 0x350   : > { %v4673_v20 = vpop.f32.mrf.mxu1 }
 0x351   : > { %v9025_v33 = vadd.f32 %v4673_v20, %v4659_v22 }
 0x353   : > { %4695 = vst [vmem:[%s8909_s30 + $0x88] sm:$0xff] %v9025_v33 }
 0x358   : > { %v4675_v28 = vpop.f32.mrf.mxu1 }
 0x359   : > { %v4645_v25 = vpop.f32.mrf.mxu3  ;;  %v4676_v44 = vadd.f32 %v4675_v28, %v4661_v27 }
 0x35a   : > { %v4646_v26 = vadd.f32 %v4645_v25, %v4631_v31 }
 0x35b   : > { %4713 = vst [vmem:[%s8909_s30 + $0x118] sm:$0xff] %v4676_v44 }
 0x35c   : > { %4694 = vst [vmem:[%s8909_s30 + $0x80] sm:$0xff] %v4646_v26 }
 0x360   : > { %4717 = sbr.rel (%p7195_p4) target bundleno = 910 (0x38e), region = 48 }
 0x361   : > { %v4647_v50 = vpop.f32.mrf.mxu3 }
 0x362   : > { %v4648_v37 = vadd.f32 %v4647_v50, %v4633_v34 }
 0x364   : > { %4712 = vst [vmem:[%s8909_s30 + $0x110] sm:$0xff] %v4648_v37 }
 0x365   : > { %v4718_v56 = vand.u32 2147483647, %v9025_v33  ;;  %v4719_v1 = vand.u32 2147483647, %v4676_v44  ;;  %vm4726_vm8 = vcmp.ge.f32.partialorder %v9025_v33, 0.0  ;;  %vm4727_vm9 = vcmp.ge.f32.partialorder %v4676_v44, 0.0 }
 0x367   : > { %v4720_v41 = vsub.f32 0.0, %v4718_v56  ;;  %v4721_v29 = vsub.f32 0.0, %v4719_v1 }
 0x369   : > { %v4722_v45 = vmul.f32 1.442695, %v4720_v41  ;;  %v4724_v42 = vmul.f32 1.442695, %v4721_v29 }
 0x36b   : > { %7866 = vpow2.f32 %v4722_v45 }
 0x36c   : > { %7868 = vpow2.f32 %v4724_v42 }
 0x371   : > { %v7867_v10 = vpop.eup %7866 }
 0x372   : > { %v7869_v48 = vpop.eup %7868  ;;  %v4728_v52 = vadd.f32 1.0, %v7867_v10 }
 0x373   : > { %v4729_v53 = vadd.f32 1.0, %v7869_v48 }
 0x374   : > { %7870 = vrcp.f32 %v4728_v52  ;;  %vm4735_vm0 = vweird.f32 %v4728_v52  ;;  %v4741_v40 = vand.u32 2147483648, %v4728_v52  ;;  %v4739_v59 = vand.u32 2147483647, %v4728_v52 }
 0x375   : > { %7872 = vrcp.f32 %v4729_v53  ;;  %v4756_v47 = vand.u32 2147483648, %v4729_v53  ;;  %vm4750_vm2 = vweird.f32 %v4729_v53  ;;  %v4754_v15 = vand.u32 2147483647, %v4729_v53 }
 0x376   : > { %v4742_v58 = vor.u32 1.1754944e-38, %v4741_v40  ;;  %vm4740_vm5 = vcmp.eq.f32.partialorder %v4739_v59, 8.507059e+37 }
 0x377   : > { %v4757_v61 = vor.u32 1.1754944e-38, %v4756_v47  ;;  %vm4755_vm7 = vcmp.eq.f32.partialorder %v4754_v15, 8.507059e+37 }
 0x37a   : > { %v7871_v54 = vpop.eup %7870 }
 0x37b   : > { %v7873_v55 = vpop.eup %7872  ;;  %v4731_v30 = vmul.f32 %v7871_v54, %v4728_v52  ;;  %vm4736_vm1 = vweird.f32 %v7871_v54 }
 0x37c   : > { %v4746_v2 = vmul.f32 %v7873_v55, %v4729_v53  ;;  %vm4751_vm3 = vweird.f32 %v7873_v55  ;;  %vm4737_vm4 = vmor %vm4735_vm0, %vm4736_vm1 }
 0x37d   : > { %v4732_v17 = vsub.f32 1.0, %v4731_v30  ;;  %vm4752_vm6 = vmor %vm4750_vm2, %vm4751_vm3 }
 0x37e   : > { %v4747_v32 = vsub.f32 1.0, %v4746_v2 }
 0x37f   : > { %v4733_v43 = vmul.f32 %v7871_v54, %v4732_v17 }
 0x380   : > { %v4748_v35 = vmul.f32 %v7873_v55, %v4747_v32 }
 0x381   : > { %v4734_v14 = vadd.f32 %v7871_v54, %v4733_v43 }
 0x382   : > { %v4749_v7 = vadd.f32 %v7873_v55, %v4748_v35 }
 0x383   : > { %v4738_v24 = vsel %vm4737_vm4, %v7871_v54, %v4734_v14 }
 0x384   : > { %v4743_v62 = vsel %vm4740_vm5, %v4742_v58, %v4738_v24  ;;  %v4753_v12 = vsel %vm4752_vm6, %v7873_v55, %v4749_v7 }
 0x385   : > { %v4760_v63 = vmul.f32 %v7867_v10, %v4743_v62  ;;  %v4758_v36 = vsel %vm4755_vm7, %v4757_v61, %v4753_v12 }
 0x386   : > { %v4761_v51 = vmul.f32 %v7869_v48, %v4758_v36 }
 0x387   : > { %v4762_v49 = vsel %vm4726_vm8, %v4743_v62, %v4760_v63 }
 0x388   : > { %v4764_v5 = vmul.f32 255.0, %v4762_v49  ;;  %v4763_v6 = vsel %vm4727_vm9, %v4758_v36, %v4761_v51 }
 0x389   : > { %v4765_v46 = vmul.f32 255.0, %v4763_v6 }
 0x38a   : > { %v4766_v4 = vadd.f32 -128.0, %v4764_v5 }
 0x38b   : > { %v4767_v9 = vadd.f32 -128.0, %v4765_v46 }
 0x38c   : > { %4768 = vst [vmem:[%s8909_s30 + $0x88] sm:$0xff] %v4766_v4 }
 0x38d   : > { %4769 = vst [vmem:[%s8909_s30 + $0x118] sm:$0xff] %v4767_v9 }
 0x38e PF: > { %s7777_s4 = smul.u32 144, %s8093_s16  ;;  %s4783_s6 = sshll.u32 %s8909_s30, 4  ;;  %s4784_s6 = int_to_ptr.vmem [resolvable:$true] %s4783_s6 }
 0x38f   : > { %s4771_s5 = scalar_lea.sflag [#allocation4], %s8189_s21  ;;  %s7984_s16 = scalar_lea.hbm %s9073_s3, 864 }
 0x390   : > { %s4782_s10 = scalar_lea.hbm %s9073_s3, %s7777_s4 }
 0x391   : > { %s4785_s17 = sshll.u32 %s4782_s10, 4  ;;  %s4786_s17 = int_to_ptr.hbm [resolvable:$true] %s4785_s17 }
 0x392   : > { %s7978_s11 = sshra.s32 %s4786_s17, 4  ;;  %s7979_s11 = int_to_ptr.hbm [resolvable:$true] %s7978_s11 }
 0x393   : > { %s7980_s19 = scalar_lea.hbm %s7979_s11, 288  ;;  %p7985_p5 = scmp.lt.s32.totalorder %s7979_s11, %s9073_s3 }
 0x394   : > { %p7981_p6 = scmp.ne.s32.totalorder %s7979_s11, %s7980_s19  ;;  %p7986_p7 = scmp.lt.s32.totalorder %s7984_s16, %s7980_s19 }
 0x396   : > { %p7982_p13 = pnand %p7981_p6, %p8124_p11  ;;  %p7987_p8 = por %p7986_p7, %p7985_p5 }
 0x398   : > { %p7983_p3 = pneg %p7982_p13 }
 0x39a   : > { %p7988_p9 = pnand %p7987_p8, %p7983_p3 }
 0x39c   : > { %7991 = shalt.err (!%p7988_p9)
}
 0x39d   : > { %s8049_s29 = smov 2304   ;;  %s8050_s1 = smov 6912  }
 0x39e   : > { %s8051_s21 = smov 144  }
 0x39f   : > { %7791 = dma.vmem_to_hbm [thread:$0]  (%p8124_p11), %s4784_s6, 4608, %s4786_s17, %s4771_s5, %s8049_s29, %s8050_s1, %s8051_s21  }
 0x3a0 PF: > { %p7813_p10 = scmp.ge.s32.totalorder %s8038_s15, 2  ;;  %s4800_s26 = sand.u32 1, %s8026_s12  }
 0x3a1   : > { %s4801_s8 = scalar_lea.sflag [#allocation4], %s4800_s26 }
 0x3a2   : > { %p7805_p1 = pnand %p7813_p10, %p8128_p12 }
 0x3a4   : > { %p7806_p0 = pneg %p7805_p1 }
 0x3a6   : > { %8021 = dma.done.wait (%p7806_p0), %s4801_s8, 4608  }
 0x3a7   : > { %8023 = vsyncadd (%p7806_p0), %s4801_s8, 4294962688  ;;  %s9086_s22 = sld [smem:[#allocation13_spill]]  ;;  %p15_p2 = scmp.ge.s32.totalorder %s8097_s18, 5  }
 0x3a8   : > { %s9087_s12 = smov %s8030_s13  ;;  %s9088_s13 = smov %s8034_s14 }
 0x3a9   : > { %s9090_s15 = smov %s8097_s18  ;;  %17 = sbr.rel (!%p15_p2) target bundleno = 8 (0x8), region = 88 }
 0x3ad   : > { %s9089_s14 = smov %s9086_s22 }
 0x3ae   :  { %4807 = vsyncpa [#allocation3], 1 }
 0x3af   :  { %4809 = vsyncpa [#allocation3 + $0x1], 1 }
 0x3b0   :  { %4810 = vsyncpa [#allocation6], 1 }
 0x3b1   :  { %4811 = vsyncpa [#allocation4], 1 }
 0x3b2   :  { %4813 = vsyncpa [#allocation4 + $0x1], 1 }

</bundles_post_ra>
